<compile_context>
chip_gen: v6e
topology: v6e:2x2x1
jax: 0.10.0
libtpu: 0.0.40
codegen_flags: <defaults>
</compile_context>

<pallas_src>
import jax
import jax.numpy as jnp
from jax.experimental import pallas as pl
from jax.experimental.pallas import tpu as pltpu

K1, C1 = 9, 64   # conv1: 9x9, 1 -> 64, stride 1, VALID
K2, C2 = 1, 32   # conv2: 1x1, 64 -> 32
K3, C3 = 5, 1    # conv3: 5x5, 32 -> 1
HALO = (K1 - 1) + (K3 - 1)          # 12 extra input rows per output-row tile
MAX_TILE_ROWS = 32                  # output rows per grid step (VMEM-bounded)


def srcnn_kernel(x_ref, w1_ref, b1_ref, w2_ref, b2_ref, w3_ref, b3_ref, o_ref):
    # x_ref: (1, 1, Th+12, W) bf16 (W on lanes); o_ref: (1, Th, W3) f32.
    _, th, w3_cols = o_ref.shape
    th1 = th + (K3 - 1)                     # conv1/conv2 rows needed by this tile
    w1_cols = w3_cols + (K3 - 1)            # conv1/conv2 cols

    x = x_ref[0, 0]                         # (Th+12, W) bf16

    # ---- conv1: 9x9, 1 -> 64 on the MXU via row-batched im2col -------------
    # R[i, kh, :] = x[i+kh, :]   (stack along the sublane axis, lanes untouched)
    r = jnp.stack([x[kh:kh + th1, :] for kh in range(K1)], axis=1)      # (Th1, 9, W)
    # P[i, kw*9+kh, j] = x[i+kh, j+kw]   (lane-shift slices, sublane-axis concat)
    p = jnp.concatenate([r[:, :, kw:kw + w1_cols] for kw in range(K1)],
                        axis=1)                                         # (Th1, 81, W1)
    w1b = jnp.broadcast_to(w1_ref[...][None], (th1, C1, K1 * K1))       # (Th1, 64, 81) bf16
    h1 = jnp.einsum('bck,bkw->bcw', w1b, p,
                    preferred_element_type=jnp.float32)                 # (Th1, 64, W1) f32
    h1 = jnp.maximum(h1 + b1_ref[...], 0.0)                             # b1: (64, 1)

    # ---- conv2: 1x1, 64 -> 32 as a batched channel matmul on the MXU -------
    w2b = jnp.broadcast_to(w2_ref[...][None], (th1, C2, C1))            # (Th1, 32, 64) bf16
    h2 = jnp.einsum('bck,bkw->bcw', w2b, h1.astype(jnp.bfloat16),
                    preferred_element_type=jnp.float32)                 # (Th1, 32, W1) f32
    h2 = jnp.maximum(h2 + b2_ref[...], 0.0)                             # b2: (32, 1)

    # ---- conv3: 5x5, 32 -> 1 on the VPU (W3 on lanes), one channel reduce ---
    acc = jnp.zeros((th, C2, w3_cols), jnp.float32)
    for kw in range(K3):
        hs = h2[:, :, kw:kw + w3_cols]                                  # (Th1, 32, W3)
        for kh in range(K3):
            t = kh * K3 + kw
            acc = acc + hs[kh:kh + th, :, :] * w3_ref[:, t:t + 1]       # (32,1) bcast
    out = jnp.sum(acc, axis=1) + b3_ref[...]                            # (Th, W3)
    o_ref[0] = out.astype(o_ref.dtype)


def _pick_tile_rows(h3, max_rows):
    """Output rows per grid step: divides H3 and keeps blocks (8,128)-legal."""
    if h3 <= max_rows:
        return h3
    for d in range(max_rows, 0, -1):
        if h3 % d == 0 and d % 8 == 0:
            return d
    # TODO(synk): pad the row dimension instead of whole-image fallback.
    return h3


def srcnn_forward(x_nchw, params, *, max_tile_rows=MAX_TILE_ROWS):
    w1, b1, w2, b2, w3, b3 = params
    n, cin, h, w = x_nchw.shape
    assert cin == 1, "SRCNN expects single-channel input"
    assert h > HALO and w > HALO, "image too small for valid 9x9 + 5x5 convs"

    h3, w3_cols = h - HALO, w - HALO
    th = _pick_tile_rows(h3, max_tile_rows)
    num_tiles = h3 // th
    th_in = th + HALO

    # Lane-dense input (C==1 squeezed), rows pre-tiled with the 12-row halo so
    # a plain Blocked BlockSpec pipelines the overlapping windows.
    x2 = x_nchw[:, 0, :, :].astype(jnp.bfloat16)                  # (N, H, W)
    rows = (jnp.arange(num_tiles) * th)[:, None] + jnp.arange(th_in)[None, :]
    x_tiles = x2[:, rows, :]                                      # (N, T, Th_in, W)

    # Repack weights for the kernel layouts.
    w1p = jnp.transpose(w1[:, :, 0, :], (2, 1, 0)).reshape(C1, K1 * K1)  # [c, kw*9+kh]
    w1p = w1p.astype(jnp.bfloat16)
    b1p = b1.reshape(C1, 1).astype(jnp.float32)
    w2p = jnp.transpose(w2, (1, 0)).astype(jnp.bfloat16)                 # (32, 64)
    b2p = b2.reshape(C2, 1).astype(jnp.float32)
    w3p = jnp.transpose(w3[:, :, :, 0].reshape(K3 * K3, C2), (1, 0))     # (32, 25) [c, kh*5+kw]
    w3p = w3p.astype(jnp.float32)
    b3p = b3.reshape(1, 1).astype(jnp.float32)

    out = pl.pallas_call(
        srcnn_kernel,
        out_shape=jax.ShapeDtypeStruct((n, h3, w3_cols), jnp.float32),
        grid_spec=pltpu.PrefetchScalarGridSpec(
            num_scalar_prefetch=0,
            grid=(n, num_tiles),
            in_specs=[
                pl.BlockSpec((1, 1, th_in, w), lambda i, t: (i, t, 0, 0)),  # x tiles
                pl.BlockSpec(w1p.shape, lambda i, t: (0, 0)),               # (64, 81)
                pl.BlockSpec(b1p.shape, lambda i, t: (0, 0)),               # (64, 1)
                pl.BlockSpec(w2p.shape, lambda i, t: (0, 0)),               # (32, 64)
                pl.BlockSpec(b2p.shape, lambda i, t: (0, 0)),               # (32, 1)
                pl.BlockSpec(w3p.shape, lambda i, t: (0, 0)),               # (32, 25)
                pl.BlockSpec(b3p.shape, lambda i, t: (0, 0)),               # (1, 1)
            ],
            out_specs=pl.BlockSpec((1, th, w3_cols), lambda i, t: (i, t, 0)),
        ),
        compiler_params=pltpu.CompilerParams(
            dimension_semantics=("parallel", "parallel"),
            vmem_limit_bytes=48 * 1024 * 1024,
        ),
    )(x_tiles, w1p, b1p, w2p, b2p, w3p, b3p)

    return out[:, None, :, :]                                     # NCHW (C=1)


def init_params(key):
    ks = jax.random.split(key, 6)
    w1 = jax.random.normal(ks[0], (K1, K1, 1, C1), jnp.float32) * 0.05
    b1 = jax.random.normal(ks[1], (1, C1), jnp.float32) * 0.01
    w2 = jax.random.normal(ks[2], (C1, C2), jnp.float32) * 0.05
    b2 = jax.random.normal(ks[3], (1, C2), jnp.float32) * 0.01
    w3 = jax.random.normal(ks[4], (K3, K3, C2, C3), jnp.float32) * 0.05
    b3 = jax.random.normal(ks[5], (1, C3), jnp.float32) * 0.01
    return (w1, b1, w2, b2, w3, b3)


def srcnn_reference(x_nchw, params):
    """Plain-JAX reference (valid convs, NHWC) for correctness checking."""
    w1, b1, w2, b2, w3, b3 = params
    dn = ("NHWC", "HWIO", "NHWC")
    y = jnp.transpose(x_nchw, (0, 2, 3, 1)).astype(jnp.float32)
    y = jax.lax.conv_general_dilated(y, w1, (1, 1), "VALID",
                                     dimension_numbers=dn) + b1.reshape(1, 1, 1, -1)
    y = jax.nn.relu(y)
    y = jax.lax.conv_general_dilated(y, w2.reshape(1, 1, C1, C2), (1, 1), "VALID",
                                     dimension_numbers=dn) + b2.reshape(1, 1, 1, -1)
    y = jax.nn.relu(y)
    y = jax.lax.conv_general_dilated(y, w3, (1, 1), "VALID",
                                     dimension_numbers=dn) + b3.reshape(1, 1, 1, -1)
    return jnp.transpose(y, (0, 3, 1, 2))


if __name__ == "__main__":
    key = jax.random.PRNGKey(0)
    pkey, xkey, xkey2 = jax.random.split(key, 3)
    params = init_params(pkey)

    # batch=2, channels=1 (SRCNN is single-channel), spatial=16  -> single tile
    x = jax.random.normal(xkey, (2, 1, 16, 16), jnp.float32)
    out = jax.block_until_ready(srcnn_forward(x, params))         # (2, 1, 4, 4)
    ref = jax.block_until_ready(srcnn_reference(x, params))
    assert out.shape == (2, 1, 4, 4), out.shape
    assert jnp.allclose(out, ref, rtol=3e-2, atol=3e-2), "mismatch vs reference (small)"

    # exercises the multi-tile (row-tiled, halo'd) path: H3=48 -> 2 tiles of 24 rows
    x2 = jax.random.normal(xkey2, (1, 1, 60, 44), jnp.float32)
    out2 = jax.block_until_ready(srcnn_forward(x2, params))       # (1, 1, 48, 32)
    ref2 = jax.block_until_ready(srcnn_reference(x2, params))
    assert out2.shape == (1, 1, 48, 32), out2.shape
    assert jnp.allclose(out2, ref2, rtol=3e-2, atol=3e-2), "mismatch vs reference (tiled)"

    print("KERNEL_OK")
</pallas_src>

<mosaic_0001>
module attributes {stable_mosaic.version = 11 : i64} {
  func.func @srcnn_kernel(%arg0: i32, %arg1: i32, %arg2: memref<1x1x16x16xbf16, #tpu.memory_space<vmem>>, %arg3: memref<64x81xbf16, #tpu.memory_space<vmem>>, %arg4: memref<64x1xf32, #tpu.memory_space<vmem>>, %arg5: memref<32x64xbf16, #tpu.memory_space<vmem>>, %arg6: memref<32x1xf32, #tpu.memory_space<vmem>>, %arg7: memref<32x25xf32, #tpu.memory_space<vmem>>, %arg8: memref<1x1xf32, #tpu.memory_space<vmem>>, %arg9: memref<1x4x4xf32, #tpu.memory_space<vmem>>) attributes {dimension_semantics = [#tpu.dimension_semantics<parallel>, #tpu.dimension_semantics<parallel>], iteration_bounds = array<i64: 2, 1>, scalar_prefetch = 0 : i64, scratch_operands = 0 : i64, tpu.core_type = #tpu.core_type<tc>, window_params = [{transform_indices = @transform_0, window_bounds = array<i64: 1, 1, 16, 16>}, {pipeline_mode = #tpu.pipeline_mode<synchronous>, transform_indices = @transform_1, window_bounds = array<i64: 64, 81>}, {pipeline_mode = #tpu.pipeline_mode<synchronous>, transform_indices = @transform_2, window_bounds = array<i64: 64, 1>}, {pipeline_mode = #tpu.pipeline_mode<synchronous>, transform_indices = @transform_3, window_bounds = array<i64: 32, 64>}, {pipeline_mode = #tpu.pipeline_mode<synchronous>, transform_indices = @transform_4, window_bounds = array<i64: 32, 1>}, {pipeline_mode = #tpu.pipeline_mode<synchronous>, transform_indices = @transform_5, window_bounds = array<i64: 32, 25>}, {pipeline_mode = #tpu.pipeline_mode<synchronous>, transform_indices = @transform_6, window_bounds = array<i64: 1, 1>}, {transform_indices = @transform_7, window_bounds = array<i64: 1, 4, 4>}]} {
    %c0 = arith.constant 0 : index
    %c0_0 = arith.constant 0 : index
    %c0_1 = arith.constant 0 : index
    %c0_2 = arith.constant 0 : index
    %0 = vector.load %arg2[%c0, %c0_0, %c0_1, %c0_2] : memref<1x1x16x16xbf16, #tpu.memory_space<vmem>>, vector<1x1x16x16xbf16>
    %1 = vector.shape_cast %0 : vector<1x1x16x16xbf16> to vector<16x16xbf16>
    %2 = vector.extract_strided_slice %1 {offsets = [0, 0], sizes = [8, 16], strides = [1, 1]} : vector<16x16xbf16> to vector<8x16xbf16>
    %3 = vector.extract_strided_slice %1 {offsets = [1, 0], sizes = [8, 16], strides = [1, 1]} : vector<16x16xbf16> to vector<8x16xbf16>
    %4 = vector.extract_strided_slice %1 {offsets = [2, 0], sizes = [8, 16], strides = [1, 1]} : vector<16x16xbf16> to vector<8x16xbf16>
    %5 = vector.extract_strided_slice %1 {offsets = [3, 0], sizes = [8, 16], strides = [1, 1]} : vector<16x16xbf16> to vector<8x16xbf16>
    %6 = vector.extract_strided_slice %1 {offsets = [4, 0], sizes = [8, 16], strides = [1, 1]} : vector<16x16xbf16> to vector<8x16xbf16>
    %7 = vector.extract_strided_slice %1 {offsets = [5, 0], sizes = [8, 16], strides = [1, 1]} : vector<16x16xbf16> to vector<8x16xbf16>
    %8 = vector.extract_strided_slice %1 {offsets = [6, 0], sizes = [8, 16], strides = [1, 1]} : vector<16x16xbf16> to vector<8x16xbf16>
    %9 = vector.extract_strided_slice %1 {offsets = [7, 0], sizes = [8, 16], strides = [1, 1]} : vector<16x16xbf16> to vector<8x16xbf16>
    %10 = vector.extract_strided_slice %1 {offsets = [8, 0], sizes = [8, 16], strides = [1, 1]} : vector<16x16xbf16> to vector<8x16xbf16>
    %11 = vector.shape_cast %2 : vector<8x16xbf16> to vector<8x1x16xbf16>
    %12 = vector.shape_cast %3 : vector<8x16xbf16> to vector<8x1x16xbf16>
    %13 = vector.shape_cast %4 : vector<8x16xbf16> to vector<8x1x16xbf16>
    %14 = vector.shape_cast %5 : vector<8x16xbf16> to vector<8x1x16xbf16>
    %15 = vector.shape_cast %6 : vector<8x16xbf16> to vector<8x1x16xbf16>
    %16 = vector.shape_cast %7 : vector<8x16xbf16> to vector<8x1x16xbf16>
    %17 = vector.shape_cast %8 : vector<8x16xbf16> to vector<8x1x16xbf16>
    %18 = vector.shape_cast %9 : vector<8x16xbf16> to vector<8x1x16xbf16>
    %19 = vector.shape_cast %10 : vector<8x16xbf16> to vector<8x1x16xbf16>
    %20 = tpu.concatenate %11, %12, %13, %14, %15, %16, %17, %18, %19 in 1 : vector<8x1x16xbf16>, vector<8x1x16xbf16>, vector<8x1x16xbf16>, vector<8x1x16xbf16>, vector<8x1x16xbf16>, vector<8x1x16xbf16>, vector<8x1x16xbf16>, vector<8x1x16xbf16>, vector<8x1x16xbf16> -> vector<8x9x16xbf16>
    %21 = vector.extract_strided_slice %20 {offsets = [0, 0, 0], sizes = [8, 9, 8], strides = [1, 1, 1]} : vector<8x9x16xbf16> to vector<8x9x8xbf16>
    %22 = vector.extract_strided_slice %20 {offsets = [0, 0, 1], sizes = [8, 9, 8], strides = [1, 1, 1]} : vector<8x9x16xbf16> to vector<8x9x8xbf16>
    %23 = vector.extract_strided_slice %20 {offsets = [0, 0, 2], sizes = [8, 9, 8], strides = [1, 1, 1]} : vector<8x9x16xbf16> to vector<8x9x8xbf16>
    %24 = vector.extract_strided_slice %20 {offsets = [0, 0, 3], sizes = [8, 9, 8], strides = [1, 1, 1]} : vector<8x9x16xbf16> to vector<8x9x8xbf16>
    %25 = vector.extract_strided_slice %20 {offsets = [0, 0, 4], sizes = [8, 9, 8], strides = [1, 1, 1]} : vector<8x9x16xbf16> to vector<8x9x8xbf16>
    %26 = vector.extract_strided_slice %20 {offsets = [0, 0, 5], sizes = [8, 9, 8], strides = [1, 1, 1]} : vector<8x9x16xbf16> to vector<8x9x8xbf16>
    %27 = vector.extract_strided_slice %20 {offsets = [0, 0, 6], sizes = [8, 9, 8], strides = [1, 1, 1]} : vector<8x9x16xbf16> to vector<8x9x8xbf16>
    %28 = vector.extract_strided_slice %20 {offsets = [0, 0, 7], sizes = [8, 9, 8], strides = [1, 1, 1]} : vector<8x9x16xbf16> to vector<8x9x8xbf16>
    %29 = vector.extract_strided_slice %20 {offsets = [0, 0, 8], sizes = [8, 9, 8], strides = [1, 1, 1]} : vector<8x9x16xbf16> to vector<8x9x8xbf16>
    %30 = tpu.concatenate %21, %22, %23, %24, %25, %26, %27, %28, %29 in 1 : vector<8x9x8xbf16>, vector<8x9x8xbf16>, vector<8x9x8xbf16>, vector<8x9x8xbf16>, vector<8x9x8xbf16>, vector<8x9x8xbf16>, vector<8x9x8xbf16>, vector<8x9x8xbf16>, vector<8x9x8xbf16> -> vector<8x81x8xbf16>
    %c0_3 = arith.constant 0 : index
    %c0_4 = arith.constant 0 : index
    %31 = vector.load %arg3[%c0_3, %c0_4] : memref<64x81xbf16, #tpu.memory_space<vmem>>, vector<64x81xbf16>
    %32 = vector.shape_cast %31 : vector<64x81xbf16> to vector<1x64x81xbf16>
    %33 = vector.shape_cast %32 : vector<1x64x81xbf16> to vector<1x64x81xbf16>
    %34 = vector.broadcast %33 : vector<1x64x81xbf16> to vector<8x64x81xbf16>
    "tpu.trace_start"() <{level = 10 : i32, message = "bck,bkw->bcw"}> : () -> ()
    %cst = arith.constant dense<0.000000e+00> : vector<8x64x8xf32>
    %35 = tpu.matmul %34, %30, %cst {dimension_numbers = #tpu.dot_dimension_numbers<[2], [1], [1], [2], [0, 0, 0, 1, 1, 2], [0], [0]>} : vector<8x64x81xbf16>, vector<8x81x8xbf16>, vector<8x64x8xf32> -> vector<8x64x8xf32>
    "tpu.trace_stop"() : () -> ()
    %c0_5 = arith.constant 0 : index
    %c0_6 = arith.constant 0 : index
    %36 = vector.load %arg4[%c0_5, %c0_6] : memref<64x1xf32, #tpu.memory_space<vmem>>, vector<64x1xf32>
    %37 = vector.shape_cast %36 : vector<64x1xf32> to vector<1x64x1xf32>
    %38 = vector.broadcast %37 : vector<1x64x1xf32> to vector<8x64x8xf32>
    %39 = arith.addf %35, %38 : vector<8x64x8xf32>
    %cst_7 = arith.constant 0.000000e+00 : f32
    %40 = vector.broadcast %cst_7 : f32 to vector<8x64x8xf32>
    %41 = arith.maximumf %39, %40 : vector<8x64x8xf32>
    %c0_8 = arith.constant 0 : index
    %c0_9 = arith.constant 0 : index
    %42 = vector.load %arg5[%c0_8, %c0_9] : memref<32x64xbf16, #tpu.memory_space<vmem>>, vector<32x64xbf16>
    %43 = vector.shape_cast %42 : vector<32x64xbf16> to vector<1x32x64xbf16>
    %44 = vector.shape_cast %43 : vector<1x32x64xbf16> to vector<1x32x64xbf16>
    %45 = vector.broadcast %44 : vector<1x32x64xbf16> to vector<8x32x64xbf16>
    %46 = arith.truncf %41 : vector<8x64x8xf32> to vector<8x64x8xbf16>
    "tpu.trace_start"() <{level = 10 : i32, message = "bck,bkw->bcw"}> : () -> ()
    %cst_10 = arith.constant dense<0.000000e+00> : vector<8x32x8xf32>
    %47 = tpu.matmul %45, %46, %cst_10 {dimension_numbers = #tpu.dot_dimension_numbers<[2], [1], [1], [2], [0, 0, 0, 1, 1, 2], [0], [0]>} : vector<8x32x64xbf16>, vector<8x64x8xbf16>, vector<8x32x8xf32> -> vector<8x32x8xf32>
    "tpu.trace_stop"() : () -> ()
    %c0_11 = arith.constant 0 : index
    %c0_12 = arith.constant 0 : index
    %48 = vector.load %arg6[%c0_11, %c0_12] : memref<32x1xf32, #tpu.memory_space<vmem>>, vector<32x1xf32>
    %49 = vector.shape_cast %48 : vector<32x1xf32> to vector<1x32x1xf32>
    %50 = vector.broadcast %49 : vector<1x32x1xf32> to vector<8x32x8xf32>
    %51 = arith.addf %47, %50 : vector<8x32x8xf32>
    %cst_13 = arith.constant 0.000000e+00 : f32
    %52 = vector.broadcast %cst_13 : f32 to vector<8x32x8xf32>
    %53 = arith.maximumf %51, %52 : vector<8x32x8xf32>
    %cst_14 = arith.constant 0.000000e+00 : f32
    %54 = vector.broadcast %cst_14 : f32 to vector<4x32x4xf32>
    %55 = vector.extract_strided_slice %53 {offsets = [0, 0, 0], sizes = [8, 32, 4], strides = [1, 1, 1]} : vector<8x32x8xf32> to vector<8x32x4xf32>
    %56 = vector.extract_strided_slice %55 {offsets = [0, 0, 0], sizes = [4, 32, 4], strides = [1, 1, 1]} : vector<8x32x4xf32> to vector<4x32x4xf32>
    %c0_15 = arith.constant 0 : index
    %c0_16 = arith.constant 0 : index
    %57 = vector.load %arg7[%c0_15, %c0_16] : memref<32x25xf32, #tpu.memory_space<vmem>>, vector<32x1xf32>
    %58 = vector.shape_cast %57 : vector<32x1xf32> to vector<1x32x1xf32>
    %59 = vector.broadcast %58 : vector<1x32x1xf32> to vector<4x32x4xf32>
    %60 = arith.mulf %56, %59 : vector<4x32x4xf32>
    %61 = arith.addf %54, %60 : vector<4x32x4xf32>
    %62 = vector.extract_strided_slice %55 {offsets = [1, 0, 0], sizes = [4, 32, 4], strides = [1, 1, 1]} : vector<8x32x4xf32> to vector<4x32x4xf32>
    %c0_17 = arith.constant 0 : index
    %c5 = arith.constant 5 : index
    %63 = vector.load %arg7[%c0_17, %c5] : memref<32x25xf32, #tpu.memory_space<vmem>>, vector<32x1xf32>
    %64 = vector.shape_cast %63 : vector<32x1xf32> to vector<1x32x1xf32>
    %65 = vector.broadcast %64 : vector<1x32x1xf32> to vector<4x32x4xf32>
    %66 = arith.mulf %62, %65 : vector<4x32x4xf32>
    %67 = arith.addf %61, %66 : vector<4x32x4xf32>
    %68 = vector.extract_strided_slice %55 {offsets = [2, 0, 0], sizes = [4, 32, 4], strides = [1, 1, 1]} : vector<8x32x4xf32> to vector<4x32x4xf32>
    %c0_18 = arith.constant 0 : index
    %c10 = arith.constant 10 : index
    %69 = vector.load %arg7[%c0_18, %c10] : memref<32x25xf32, #tpu.memory_space<vmem>>, vector<32x1xf32>
    %70 = vector.shape_cast %69 : vector<32x1xf32> to vector<1x32x1xf32>
    %71 = vector.broadcast %70 : vector<1x32x1xf32> to vector<4x32x4xf32>
    %72 = arith.mulf %68, %71 : vector<4x32x4xf32>
    %73 = arith.addf %67, %72 : vector<4x32x4xf32>
    %74 = vector.extract_strided_slice %55 {offsets = [3, 0, 0], sizes = [4, 32, 4], strides = [1, 1, 1]} : vector<8x32x4xf32> to vector<4x32x4xf32>
    %c0_19 = arith.constant 0 : index
    %c15 = arith.constant 15 : index
    %75 = vector.load %arg7[%c0_19, %c15] : memref<32x25xf32, #tpu.memory_space<vmem>>, vector<32x1xf32>
    %76 = vector.shape_cast %75 : vector<32x1xf32> to vector<1x32x1xf32>
    %77 = vector.broadcast %76 : vector<1x32x1xf32> to vector<4x32x4xf32>
    %78 = arith.mulf %74, %77 : vector<4x32x4xf32>
    %79 = arith.addf %73, %78 : vector<4x32x4xf32>
    %80 = vector.extract_strided_slice %55 {offsets = [4, 0, 0], sizes = [4, 32, 4], strides = [1, 1, 1]} : vector<8x32x4xf32> to vector<4x32x4xf32>
    %c0_20 = arith.constant 0 : index
    %c20 = arith.constant 20 : index
    %81 = vector.load %arg7[%c0_20, %c20] : memref<32x25xf32, #tpu.memory_space<vmem>>, vector<32x1xf32>
    %82 = vector.shape_cast %81 : vector<32x1xf32> to vector<1x32x1xf32>
    %83 = vector.broadcast %82 : vector<1x32x1xf32> to vector<4x32x4xf32>
    %84 = arith.mulf %80, %83 : vector<4x32x4xf32>
    %85 = arith.addf %79, %84 : vector<4x32x4xf32>
    %86 = vector.extract_strided_slice %53 {offsets = [0, 0, 1], sizes = [8, 32, 4], strides = [1, 1, 1]} : vector<8x32x8xf32> to vector<8x32x4xf32>
    %87 = vector.extract_strided_slice %86 {offsets = [0, 0, 0], sizes = [4, 32, 4], strides = [1, 1, 1]} : vector<8x32x4xf32> to vector<4x32x4xf32>
    %c0_21 = arith.constant 0 : index
    %c1 = arith.constant 1 : index
    %88 = vector.load %arg7[%c0_21, %c1] : memref<32x25xf32, #tpu.memory_space<vmem>>, vector<32x1xf32>
    %89 = vector.shape_cast %88 : vector<32x1xf32> to vector<1x32x1xf32>
    %90 = vector.broadcast %89 : vector<1x32x1xf32> to vector<4x32x4xf32>
    %91 = arith.mulf %87, %90 : vector<4x32x4xf32>
    %92 = arith.addf %85, %91 : vector<4x32x4xf32>
    %93 = vector.extract_strided_slice %86 {offsets = [1, 0, 0], sizes = [4, 32, 4], strides = [1, 1, 1]} : vector<8x32x4xf32> to vector<4x32x4xf32>
    %c0_22 = arith.constant 0 : index
    %c6 = arith.constant 6 : index
    %94 = vector.load %arg7[%c0_22, %c6] : memref<32x25xf32, #tpu.memory_space<vmem>>, vector<32x1xf32>
    %95 = vector.shape_cast %94 : vector<32x1xf32> to vector<1x32x1xf32>
    %96 = vector.broadcast %95 : vector<1x32x1xf32> to vector<4x32x4xf32>
    %97 = arith.mulf %93, %96 : vector<4x32x4xf32>
    %98 = arith.addf %92, %97 : vector<4x32x4xf32>
    %99 = vector.extract_strided_slice %86 {offsets = [2, 0, 0], sizes = [4, 32, 4], strides = [1, 1, 1]} : vector<8x32x4xf32> to vector<4x32x4xf32>
    %c0_23 = arith.constant 0 : index
    %c11 = arith.constant 11 : index
    %100 = vector.load %arg7[%c0_23, %c11] : memref<32x25xf32, #tpu.memory_space<vmem>>, vector<32x1xf32>
    %101 = vector.shape_cast %100 : vector<32x1xf32> to vector<1x32x1xf32>
    %102 = vector.broadcast %101 : vector<1x32x1xf32> to vector<4x32x4xf32>
    %103 = arith.mulf %99, %102 : vector<4x32x4xf32>
    %104 = arith.addf %98, %103 : vector<4x32x4xf32>
    %105 = vector.extract_strided_slice %86 {offsets = [3, 0, 0], sizes = [4, 32, 4], strides = [1, 1, 1]} : vector<8x32x4xf32> to vector<4x32x4xf32>
    %c0_24 = arith.constant 0 : index
    %c16 = arith.constant 16 : index
    %106 = vector.load %arg7[%c0_24, %c16] : memref<32x25xf32, #tpu.memory_space<vmem>>, vector<32x1xf32>
    %107 = vector.shape_cast %106 : vector<32x1xf32> to vector<1x32x1xf32>
    %108 = vector.broadcast %107 : vector<1x32x1xf32> to vector<4x32x4xf32>
    %109 = arith.mulf %105, %108 : vector<4x32x4xf32>
    %110 = arith.addf %104, %109 : vector<4x32x4xf32>
    %111 = vector.extract_strided_slice %86 {offsets = [4, 0, 0], sizes = [4, 32, 4], strides = [1, 1, 1]} : vector<8x32x4xf32> to vector<4x32x4xf32>
    %c0_25 = arith.constant 0 : index
    %c21 = arith.constant 21 : index
    %112 = vector.load %arg7[%c0_25, %c21] : memref<32x25xf32, #tpu.memory_space<vmem>>, vector<32x1xf32>
    %113 = vector.shape_cast %112 : vector<32x1xf32> to vector<1x32x1xf32>
    %114 = vector.broadcast %113 : vector<1x32x1xf32> to vector<4x32x4xf32>
    %115 = arith.mulf %111, %114 : vector<4x32x4xf32>
    %116 = arith.addf %110, %115 : vector<4x32x4xf32>
    %117 = vector.extract_strided_slice %53 {offsets = [0, 0, 2], sizes = [8, 32, 4], strides = [1, 1, 1]} : vector<8x32x8xf32> to vector<8x32x4xf32>
    %118 = vector.extract_strided_slice %117 {offsets = [0, 0, 0], sizes = [4, 32, 4], strides = [1, 1, 1]} : vector<8x32x4xf32> to vector<4x32x4xf32>
    %c0_26 = arith.constant 0 : index
    %c2 = arith.constant 2 : index
    %119 = vector.load %arg7[%c0_26, %c2] : memref<32x25xf32, #tpu.memory_space<vmem>>, vector<32x1xf32>
    %120 = vector.shape_cast %119 : vector<32x1xf32> to vector<1x32x1xf32>
    %121 = vector.broadcast %120 : vector<1x32x1xf32> to vector<4x32x4xf32>
    %122 = arith.mulf %118, %121 : vector<4x32x4xf32>
    %123 = arith.addf %116, %122 : vector<4x32x4xf32>
    %124 = vector.extract_strided_slice %117 {offsets = [1, 0, 0], sizes = [4, 32, 4], strides = [1, 1, 1]} : vector<8x32x4xf32> to vector<4x32x4xf32>
    %c0_27 = arith.constant 0 : index
    %c7 = arith.constant 7 : index
    %125 = vector.load %arg7[%c0_27, %c7] : memref<32x25xf32, #tpu.memory_space<vmem>>, vector<32x1xf32>
    %126 = vector.shape_cast %125 : vector<32x1xf32> to vector<1x32x1xf32>
    %127 = vector.broadcast %126 : vector<1x32x1xf32> to vector<4x32x4xf32>
    %128 = arith.mulf %124, %127 : vector<4x32x4xf32>
    %129 = arith.addf %123, %128 : vector<4x32x4xf32>
    %130 = vector.extract_strided_slice %117 {offsets = [2, 0, 0], sizes = [4, 32, 4], strides = [1, 1, 1]} : vector<8x32x4xf32> to vector<4x32x4xf32>
    %c0_28 = arith.constant 0 : index
    %c12 = arith.constant 12 : index
    %131 = vector.load %arg7[%c0_28, %c12] : memref<32x25xf32, #tpu.memory_space<vmem>>, vector<32x1xf32>
    %132 = vector.shape_cast %131 : vector<32x1xf32> to vector<1x32x1xf32>
    %133 = vector.broadcast %132 : vector<1x32x1xf32> to vector<4x32x4xf32>
    %134 = arith.mulf %130, %133 : vector<4x32x4xf32>
    %135 = arith.addf %129, %134 : vector<4x32x4xf32>
    %136 = vector.extract_strided_slice %117 {offsets = [3, 0, 0], sizes = [4, 32, 4], strides = [1, 1, 1]} : vector<8x32x4xf32> to vector<4x32x4xf32>
    %c0_29 = arith.constant 0 : index
    %c17 = arith.constant 17 : index
    %137 = vector.load %arg7[%c0_29, %c17] : memref<32x25xf32, #tpu.memory_space<vmem>>, vector<32x1xf32>
    %138 = vector.shape_cast %137 : vector<32x1xf32> to vector<1x32x1xf32>
    %139 = vector.broadcast %138 : vector<1x32x1xf32> to vector<4x32x4xf32>
    %140 = arith.mulf %136, %139 : vector<4x32x4xf32>
    %141 = arith.addf %135, %140 : vector<4x32x4xf32>
    %142 = vector.extract_strided_slice %117 {offsets = [4, 0, 0], sizes = [4, 32, 4], strides = [1, 1, 1]} : vector<8x32x4xf32> to vector<4x32x4xf32>
    %c0_30 = arith.constant 0 : index
    %c22 = arith.constant 22 : index
    %143 = vector.load %arg7[%c0_30, %c22] : memref<32x25xf32, #tpu.memory_space<vmem>>, vector<32x1xf32>
    %144 = vector.shape_cast %143 : vector<32x1xf32> to vector<1x32x1xf32>
    %145 = vector.broadcast %144 : vector<1x32x1xf32> to vector<4x32x4xf32>
    %146 = arith.mulf %142, %145 : vector<4x32x4xf32>
    %147 = arith.addf %141, %146 : vector<4x32x4xf32>
    %148 = vector.extract_strided_slice %53 {offsets = [0, 0, 3], sizes = [8, 32, 4], strides = [1, 1, 1]} : vector<8x32x8xf32> to vector<8x32x4xf32>
    %149 = vector.extract_strided_slice %148 {offsets = [0, 0, 0], sizes = [4, 32, 4], strides = [1, 1, 1]} : vector<8x32x4xf32> to vector<4x32x4xf32>
    %c0_31 = arith.constant 0 : index
    %c3 = arith.constant 3 : index
    %150 = vector.load %arg7[%c0_31, %c3] : memref<32x25xf32, #tpu.memory_space<vmem>>, vector<32x1xf32>
    %151 = vector.shape_cast %150 : vector<32x1xf32> to vector<1x32x1xf32>
    %152 = vector.broadcast %151 : vector<1x32x1xf32> to vector<4x32x4xf32>
    %153 = arith.mulf %149, %152 : vector<4x32x4xf32>
    %154 = arith.addf %147, %153 : vector<4x32x4xf32>
    %155 = vector.extract_strided_slice %148 {offsets = [1, 0, 0], sizes = [4, 32, 4], strides = [1, 1, 1]} : vector<8x32x4xf32> to vector<4x32x4xf32>
    %c0_32 = arith.constant 0 : index
    %c8 = arith.constant 8 : index
    %156 = vector.load %arg7[%c0_32, %c8] : memref<32x25xf32, #tpu.memory_space<vmem>>, vector<32x1xf32>
    %157 = vector.shape_cast %156 : vector<32x1xf32> to vector<1x32x1xf32>
    %158 = vector.broadcast %157 : vector<1x32x1xf32> to vector<4x32x4xf32>
    %159 = arith.mulf %155, %158 : vector<4x32x4xf32>
    %160 = arith.addf %154, %159 : vector<4x32x4xf32>
    %161 = vector.extract_strided_slice %148 {offsets = [2, 0, 0], sizes = [4, 32, 4], strides = [1, 1, 1]} : vector<8x32x4xf32> to vector<4x32x4xf32>
    %c0_33 = arith.constant 0 : index
    %c13 = arith.constant 13 : index
    %162 = vector.load %arg7[%c0_33, %c13] : memref<32x25xf32, #tpu.memory_space<vmem>>, vector<32x1xf32>
    %163 = vector.shape_cast %162 : vector<32x1xf32> to vector<1x32x1xf32>
    %164 = vector.broadcast %163 : vector<1x32x1xf32> to vector<4x32x4xf32>
    %165 = arith.mulf %161, %164 : vector<4x32x4xf32>
    %166 = arith.addf %160, %165 : vector<4x32x4xf32>
    %167 = vector.extract_strided_slice %148 {offsets = [3, 0, 0], sizes = [4, 32, 4], strides = [1, 1, 1]} : vector<8x32x4xf32> to vector<4x32x4xf32>
    %c0_34 = arith.constant 0 : index
    %c18 = arith.constant 18 : index
    %168 = vector.load %arg7[%c0_34, %c18] : memref<32x25xf32, #tpu.memory_space<vmem>>, vector<32x1xf32>
    %169 = vector.shape_cast %168 : vector<32x1xf32> to vector<1x32x1xf32>
    %170 = vector.broadcast %169 : vector<1x32x1xf32> to vector<4x32x4xf32>
    %171 = arith.mulf %167, %170 : vector<4x32x4xf32>
    %172 = arith.addf %166, %171 : vector<4x32x4xf32>
    %173 = vector.extract_strided_slice %148 {offsets = [4, 0, 0], sizes = [4, 32, 4], strides = [1, 1, 1]} : vector<8x32x4xf32> to vector<4x32x4xf32>
    %c0_35 = arith.constant 0 : index
    %c23 = arith.constant 23 : index
    %174 = vector.load %arg7[%c0_35, %c23] : memref<32x25xf32, #tpu.memory_space<vmem>>, vector<32x1xf32>
    %175 = vector.shape_cast %174 : vector<32x1xf32> to vector<1x32x1xf32>
    %176 = vector.broadcast %175 : vector<1x32x1xf32> to vector<4x32x4xf32>
    %177 = arith.mulf %173, %176 : vector<4x32x4xf32>
    %178 = arith.addf %172, %177 : vector<4x32x4xf32>
    %179 = vector.extract_strided_slice %53 {offsets = [0, 0, 4], sizes = [8, 32, 4], strides = [1, 1, 1]} : vector<8x32x8xf32> to vector<8x32x4xf32>
    %180 = vector.extract_strided_slice %179 {offsets = [0, 0, 0], sizes = [4, 32, 4], strides = [1, 1, 1]} : vector<8x32x4xf32> to vector<4x32x4xf32>
    %c0_36 = arith.constant 0 : index
    %c4 = arith.constant 4 : index
    %181 = vector.load %arg7[%c0_36, %c4] : memref<32x25xf32, #tpu.memory_space<vmem>>, vector<32x1xf32>
    %182 = vector.shape_cast %181 : vector<32x1xf32> to vector<1x32x1xf32>
    %183 = vector.broadcast %182 : vector<1x32x1xf32> to vector<4x32x4xf32>
    %184 = arith.mulf %180, %183 : vector<4x32x4xf32>
    %185 = arith.addf %178, %184 : vector<4x32x4xf32>
    %186 = vector.extract_strided_slice %179 {offsets = [1, 0, 0], sizes = [4, 32, 4], strides = [1, 1, 1]} : vector<8x32x4xf32> to vector<4x32x4xf32>
    %c0_37 = arith.constant 0 : index
    %c9 = arith.constant 9 : index
    %187 = vector.load %arg7[%c0_37, %c9] : memref<32x25xf32, #tpu.memory_space<vmem>>, vector<32x1xf32>
    %188 = vector.shape_cast %187 : vector<32x1xf32> to vector<1x32x1xf32>
    %189 = vector.broadcast %188 : vector<1x32x1xf32> to vector<4x32x4xf32>
    %190 = arith.mulf %186, %189 : vector<4x32x4xf32>
    %191 = arith.addf %185, %190 : vector<4x32x4xf32>
    %192 = vector.extract_strided_slice %179 {offsets = [2, 0, 0], sizes = [4, 32, 4], strides = [1, 1, 1]} : vector<8x32x4xf32> to vector<4x32x4xf32>
    %c0_38 = arith.constant 0 : index
    %c14 = arith.constant 14 : index
    %193 = vector.load %arg7[%c0_38, %c14] : memref<32x25xf32, #tpu.memory_space<vmem>>, vector<32x1xf32>
    %194 = vector.shape_cast %193 : vector<32x1xf32> to vector<1x32x1xf32>
    %195 = vector.broadcast %194 : vector<1x32x1xf32> to vector<4x32x4xf32>
    %196 = arith.mulf %192, %195 : vector<4x32x4xf32>
    %197 = arith.addf %191, %196 : vector<4x32x4xf32>
    %198 = vector.extract_strided_slice %179 {offsets = [3, 0, 0], sizes = [4, 32, 4], strides = [1, 1, 1]} : vector<8x32x4xf32> to vector<4x32x4xf32>
    %c0_39 = arith.constant 0 : index
    %c19 = arith.constant 19 : index
    %199 = vector.load %arg7[%c0_39, %c19] : memref<32x25xf32, #tpu.memory_space<vmem>>, vector<32x1xf32>
    %200 = vector.shape_cast %199 : vector<32x1xf32> to vector<1x32x1xf32>
    %201 = vector.broadcast %200 : vector<1x32x1xf32> to vector<4x32x4xf32>
    %202 = arith.mulf %198, %201 : vector<4x32x4xf32>
    %203 = arith.addf %197, %202 : vector<4x32x4xf32>
    %204 = vector.extract_strided_slice %179 {offsets = [4, 0, 0], sizes = [4, 32, 4], strides = [1, 1, 1]} : vector<8x32x4xf32> to vector<4x32x4xf32>
    %c0_40 = arith.constant 0 : index
    %c24 = arith.constant 24 : index
    %205 = vector.load %arg7[%c0_40, %c24] : memref<32x25xf32, #tpu.memory_space<vmem>>, vector<32x1xf32>
    %206 = vector.shape_cast %205 : vector<32x1xf32> to vector<1x32x1xf32>
    %207 = vector.broadcast %206 : vector<1x32x1xf32> to vector<4x32x4xf32>
    %208 = arith.mulf %204, %207 : vector<4x32x4xf32>
    %209 = arith.addf %203, %208 : vector<4x32x4xf32>
    %cst_41 = arith.constant dense<0.000000e+00> : vector<4x4xf32>
    %210 = vector.multi_reduction <add>, %209, %cst_41 [1] : vector<4x32x4xf32> to vector<4x4xf32>
    %c0_42 = arith.constant 0 : index
    %c0_43 = arith.constant 0 : index
    %211 = vector.load %arg8[%c0_42, %c0_43] : memref<1x1xf32, #tpu.memory_space<vmem>>, vector<1x1xf32>
    %212 = vector.broadcast %211 : vector<1x1xf32> to vector<4x4xf32>
    %213 = arith.addf %210, %212 : vector<4x4xf32>
    %c0_44 = arith.constant 0 : index
    %c0_45 = arith.constant 0 : index
    %c0_46 = arith.constant 0 : index
    %214 = vector.load %arg9[%c0_44, %c0_45, %c0_46] : memref<1x4x4xf32, #tpu.memory_space<vmem>>, vector<1x4x4xf32>
    %215 = vector.shape_cast %214 : vector<1x4x4xf32> to vector<4x4xf32>
    %216 = vector.shape_cast %213 : vector<4x4xf32> to vector<1x4x4xf32>
    tpu.vector_store %arg9[%c0_44, %c0_45, %c0_46], %216 {strides = array<i32>} : memref<1x4x4xf32, #tpu.memory_space<vmem>>, vector<1x4x4xf32>,
    return
  }
  func.func @transform_0(%arg0: i32, %arg1: i32) -> (i32, i32, i32, i32) {
    %c0_i32 = arith.constant 0 : i32
    %c0_i32_0 = arith.constant 0 : i32
    %c0_i32_1 = arith.constant 0 : i32
    return %arg0, %arg1, %c0_i32, %c0_i32_0 : i32, i32, i32, i32
  }
  func.func @transform_1(%arg0: i32, %arg1: i32) -> (i32, i32) {
    %c0_i32 = arith.constant 0 : i32
    %c0_i32_0 = arith.constant 0 : i32
    %c0_i32_1 = arith.constant 0 : i32
    return %c0_i32, %c0_i32_0 : i32, i32
  }
  func.func @transform_2(%arg0: i32, %arg1: i32) -> (i32, i32) {
    %c0_i32 = arith.constant 0 : i32
    %c0_i32_0 = arith.constant 0 : i32
    %c0_i32_1 = arith.constant 0 : i32
    return %c0_i32, %c0_i32_0 : i32, i32
  }
  func.func @transform_3(%arg0: i32, %arg1: i32) -> (i32, i32) {
    %c0_i32 = arith.constant 0 : i32
    %c0_i32_0 = arith.constant 0 : i32
    %c0_i32_1 = arith.constant 0 : i32
    return %c0_i32, %c0_i32_0 : i32, i32
  }
  func.func @transform_4(%arg0: i32, %arg1: i32) -> (i32, i32) {
    %c0_i32 = arith.constant 0 : i32
    %c0_i32_0 = arith.constant 0 : i32
    %c0_i32_1 = arith.constant 0 : i32
    return %c0_i32, %c0_i32_0 : i32, i32
  }
  func.func @transform_5(%arg0: i32, %arg1: i32) -> (i32, i32) {
    %c0_i32 = arith.constant 0 : i32
    %c0_i32_0 = arith.constant 0 : i32
    %c0_i32_1 = arith.constant 0 : i32
    return %c0_i32, %c0_i32_0 : i32, i32
  }
  func.func @transform_6(%arg0: i32, %arg1: i32) -> (i32, i32) {
    %c0_i32 = arith.constant 0 : i32
    %c0_i32_0 = arith.constant 0 : i32
    %c0_i32_1 = arith.constant 0 : i32
    return %c0_i32, %c0_i32_0 : i32, i32
  }
  func.func @transform_7(%arg0: i32, %arg1: i32) -> (i32, i32, i32) {
    %c0_i32 = arith.constant 0 : i32
    %c0_i32_0 = arith.constant 0 : i32
    return %arg0, %arg1, %c0_i32 : i32, i32, i32
  }
}

</mosaic_0001>

<bundles_post_ra>
// kernel: tpu_custom_call.1
= control target key start
LH: loop header
LB: loop body
LE: loop exit
PB: predicated region body
PF: predicated region fallthrough
CT: control target
= control target key end

     0   :  { %s9153_s0 = inlined_call_operand.vmem [shape: bf16[2,1,16,16], index: 0, kind: input, shape index: {}]   ;;  %s9154_s1 = inlined_call_operand.vmem [shape: bf16[64,81], index: 1, kind: input, shape index: {}]   ;;  %s9155_s2 = inlined_call_operand.vmem [shape: f32[64,1], index: 2, kind: input, shape index: {}]   ;;  %s9156_s3 = inlined_call_operand.vmem [shape: bf16[32,64], index: 3, kind: input, shape index: {}]   ;;  %s9157_s4 = inlined_call_operand.vmem [shape: f32[32,1], index: 4, kind: input, shape index: {}]   ;;  %s9158_s5 = inlined_call_operand.vmem [shape: f32[32,25], index: 5, kind: input, shape index: {}]   ;;  %s9159_s6 = inlined_call_operand.<no memory space> [shape: f32[1,1], index: 6, kind: input, shape index: {}]   ;;  %s9160_s7 = inlined_call_operand.hbm [shape: f32[2,4,4], index: 7, kind: output, shape index: {}]  }
   0x1   :  { %v12_v0 = vstv %s9159_s6 }
   0x2   :  { %13 = vst [vmem:[#allocation2] sm:$0x1] %v12_v0 }
   0x3   :  { %14 = vsyncpa [#allocation4], 0 }
   0x4   :  { %16 = vsyncpa [#allocation4 + $0x1], 0  ;;  %s5782_s26 = smov 0   ;;  %s5784_s27 = smov 0  }
   0x5   :  { %s5786_s28 = smov 0   ;;  %s5788_s29 = smov 0  }
   0x6   :  { %s5790_s30 = smov 0   ;;  %s5792_s8 = smov 0  }
   0x7 LB: > { %s4989_s6 = sadd.s32 4294967295, %s5702_s8   ;;  %s4990_s9 = sadd.s32 4294967294, %s5702_s8   ;;  %s5702_s8 = sphi %s5792_s8, %s22_s8   ;;  %s5698_s30 = sphi %s5790_s30, %s9858_s30   ;;  %s5694_s29 = sphi %s5788_s29, %s9857_s29   ;;  %s5690_s28 = sphi %s5786_s28, %s9856_s28   ;;  %s5686_s27 = sphi %s5784_s27, %s9855_s27   ;;  %s5682_s26 = sphi %s5782_s26, %s9854_s26  }
   0x8   : > { %s34_s10 = sadd.s32 1, %s5698_s30  ;;  %s197_s11 = sadd.s32 1, %s5690_s28 }
   0x9   : > { %p36_p0 = scmp.ge.s32.totalorder %s34_s10, 2  ;;  %p207_p1 = scmp.ne.s32.totalorder %s5690_s28, %s5686_s27 }
   0xa   : > { %p208_p2 = scmp.eq.s32.totalorder %s4989_s6, 1  ;;  %p213_p3 = scmp.ne.s32.totalorder %s5686_s27, %s5682_s26 }
   0xb   : > { %s9860_s10 = smov (%p36_p0, %s34_s10), 0  ;;  %p214_p5 = scmp.eq.s32.totalorder %s4990_s9, 1 }
   0xc   : > { %p5822_p4 = por %p208_p2, %p207_p1  ;;  %s192_s13 = ssub.s32 %s5698_s30, %s9860_s10 }
   0xd   : > { %p4993_p6 = scmp.ge.s32.totalorder %s5702_s8, 1  ;;  %p195_p7 = scmp.eq.s32.totalorder %s192_s13, 0 }
   0xe   : > { %p5829_p8 = por %p214_p5, %p213_p3  ;;  %p262_p9 = scmp.lt.s32.totalorder %s5702_s8, 3 }
   0xf   : > { %s5835_s15 = scalar_select %p195_p7, %s5690_s28, %s197_s11  }
  0x10   : > { %p263_p10 = pnand %p4993_p6, %p262_p9 }
  0x12   : > { %266 = sbr.rel (%p263_p10) target bundleno = 2419 (0x973), region = 48 }
  0x17   : > { %p298_p11 = scmp.lt.s32.totalorder %s5694_s29, 1  ;;  %v322_v1 = vlaneseq  ;;  %v5704_v2 = vmov 1966171168   ;;  %vm471_vm0 = vcmask 1040384   ;;  %vm472_vm1 = vsmask.f32 256 }
  0x18   : > { %v320_v3 = vunpack.c.l.s4 %v5704_v2  ;;  %vm515_vm2 = vcmask 1041408   ;;  %vm516_vm3 = vsmask.f32 1280  ;;  %vm553_vm4 = vcmask 1042432   ;;  %vm5854_vm8 = vmand %vm471_vm0, %vm472_vm1  ;;  %s5705_s21 = smov 126   ;;  %s5706_s22 = smov 127  }
  0x19   : > { %s299_s16 = scalar_select %p298_p11, %s5694_s29, 1  ;;  %v323_v4 = vshrl.u32 %v322_v1, 7  ;;  %vm554_vm5 = vsmask.f32 2304  ;;  %vm591_vm6 = vcmask 1043456   ;;  %vm5868_vm9 = vmand %vm515_vm2, %vm516_vm3  ;;  %vm1213_vm12 = vcmask 662528  }
  0x1a   : > { %v321_v5 = vunpack.c.0.s8 %v320_v3  ;;  %vm592_vm7 = vsmask.f32 3328  ;;  %vm5887_vm10 = vmand %vm553_vm4, %vm554_vm5  ;;  %s5707_s23 = smov 125   ;;  %s5708_s24 = smov 124   ;;  %vm1094_vm13 = vcmask 1047552   ;;  %vm1051_vm1 = vcmask 1046528  }
  0x1b   : > { %s5066_s17 = sshll.u32 %s299_s16, 3  ;;  %v5842_v8 = vsub.s32 0, %v323_v4  ;;  %vm5905_vm11 = vmand %vm591_vm6, %vm592_vm7  ;;  %s5709_s25 = smov 123   ;;  %vm1095_vm14 = vsmask.f32 7424  ;;  %vm1008_vm7 = vcmask 1045504  }
  0x1c   : > { %s306_s20 = scalar_lea.vmem %s9153_s0, %s5066_s17  ;;  %v324_v6 = vsub.s32 %v321_v5, %v323_v4  ;;  %s5710_s6 = smov 122   ;;  %vm6478_vm15 = vmand %vm1094_vm13, %vm1095_vm14  ;;  %vm1052_vm3 = vsmask.f32 6400  ;;  %vm4895_vm14 = vcmask 27648  }
  0x1d   : > { %v4997_v7 = vld.sshfl [vmem:[%s306_s20] sm:$0x33 pattern:$0x75316420]  ;;  %s5711_s9 = smov 121   ;;  %s5713_s11 = smov 120   ;;  %vm6494_vm5 = vmand %vm1051_vm1, %vm1052_vm3 }
  0x1e   : > { %v4998_v9 = vld.sshfl [vmem:[%s306_s20 + $0x4] sm:$0x33 pattern:$0x75316420]  ;;  %v318_v10 = vcombine.high %v4997_v7, %v4997_v7  ;;  %v325_v11 = vrot.slane %v4997_v7, %v324_v6  ;;  %s5063_s13 = sshll.u32 %s5694_s29, 6  ;;  %s5738_s29 = smov [#allocation3]  }
  0x1f   : > { %v357_v12 = vrot.slane %v4998_v9, %v324_v6  ;;  %v360_v13 = vcombine.high %v4998_v9, %v4998_v9  ;;  %s9113_s20 = scalar_lea.hbm %s9160_s7, %s5063_s13 }
  0x20   : > { %v332_v14 = vrot.slane %v318_v10, %v324_v6  ;;  %v333_v15 = vcombine.high %v325_v11, %v325_v11  ;;  %v336_v16 = vunpack.i.h.s16 %v325_v11  ;;  %v4999_v17 = vpack.i.b16 %v325_v11, %v325_v11 }
  0x21   : > { %v5003_v18 = vpack.i.b16 %v357_v12, %v357_v12  ;;  %v359_v19 = vunpack.i.h.s16 %v357_v12  ;;  %v5844_v20 = vrot.slane %v360_v13, %v324_v6  ;;  %v5846_v21 = vcombine.high %v357_v12, %v357_v12 }
  0x22   : > { %v334_v22 = vcombine.high %v332_v14, %v332_v14  ;;  %v338_v23 = vunpack.i.h.s16 %v332_v14  ;;  %v340_v24 = vunpack.i.h.s16 %v333_v15  ;;  %v377_v25 = vpack.i.b16 %v336_v16, %v336_v16 }
  0x23   : > { %v5000_v26 = vpack.i.b16 %v332_v14, %v332_v14  ;;  %v5001_v27 = vpack.i.b16 %v333_v15, %v333_v15  ;;  %v387_v28 = vrot.slane %v4999_v17, %v5842_v8  ;;  %v5850_v29 = vrot.slane %v5003_v18, %v5842_v8 }
  0x24   : > { %v342_v30 = vunpack.i.h.s16 %v334_v22  ;;  %v379_v31 = vpack.i.b16 %v338_v23, %v338_v23  ;;  %v381_v32 = vpack.i.b16 %v340_v24, %v340_v24  ;;  %v5002_v33 = vpack.i.b16 %v334_v22, %v334_v22 }
  0x25   : > { %v391_v35 = vrot.slane %v377_v25, %v5842_v8  ;;  %v395_v36 = vrot.slane %v5000_v26, %v5842_v8  ;;  %v403_v37 = vrot.slane %v5001_v27, %v5842_v8  ;;  %v430_v38 = vpack.i.b16 %v359_v19, %v359_v19 }
  0x26   : > { %v383_v39 = vpack.i.b16 %v342_v30, %v342_v30  ;;  %v399_v40 = vrot.slane %v379_v31, %v5842_v8  ;;  %v407_v41 = vrot.slane %v381_v32, %v5842_v8  ;;  %v5864_v42 = vrot.slane %v5002_v33, %v5842_v8 }
  0x27   : > { %v474_v44 = vsel %vm5854_vm8, %v387_v28, %v391_v35  ;;  %v5875_v45 = vrot.slane %v430_v38, %v5842_v8  ;;  %v475_v46 = vsel %vm5854_vm8, %v391_v35, %v395_v36  ;;  %v5004_v47 = vpack.i.b16 %v5844_v20, %v5844_v20 }
  0x28   : > { %v5882_v48 = vrot.slane %v383_v39, %v5842_v8  ;;  %v485_v49 = vsel %vm471_vm0, %v474_v44, %v395_v36  ;;  %v489_v51 = vsel %vm471_vm0, %v475_v46, %v399_v40  ;;  %v476_v52 = vsel %vm5854_vm8, %v395_v36, %v399_v40 }
  0x29   : > { %v518_v53 = vsel %vm5868_vm9, %v485_v49, %v399_v40  ;;  %v519_v54 = vsel %vm5868_vm9, %v489_v51, %v403_v37  ;;  %v5899_v55 = vrot.slane %v5004_v47, %v5842_v8  ;;  %v493_v56 = vsel %vm471_vm0, %v476_v52, %v403_v37 }
  0x2a   : > { %v528_v57 = vsel %vm515_vm2, %v518_v53, %v403_v37  ;;  %v531_v59 = vsel %vm515_vm2, %v519_v54, %v407_v41  ;;  %v520_v60 = vsel %vm5868_vm9, %v493_v56, %v407_v41  ;;  %v369_v61 = vunpack.i.h.s16 %v5844_v20 }
  0x2b   : > { %v556_v62 = vsel %vm5887_vm10, %v528_v57, %v407_v41  ;;  %v557_v63 = vsel %vm5887_vm10, %v531_v59, %v5864_v42  ;;  %v534_v0 = vsel %vm515_vm2, %v520_v60, %v5864_v42  ;;  %v477_v1 = vsel %vm5854_vm8, %v399_v40, %v403_v37 }
  0x2c   : > { %v566_v2 = vsel %vm553_vm4, %v556_v62, %v5864_v42  ;;  %v569_v3 = vsel %vm553_vm4, %v557_v63, %v5882_v48  ;;  %v558_v4 = vsel %vm5887_vm10, %v534_v0, %v5882_v48  ;;  %v442_v5 = vpack.i.b16 %v369_v61, %v369_v61 }
  0x2d   : > { %v594_v6 = vsel %vm5905_vm11, %v566_v2, %v5882_v48  ;;  %v595_v7 = vsel %vm5905_vm11, %v569_v3, %v5850_v29  ;;  %v572_v9 = vsel %vm553_vm4, %v558_v4, %v5850_v29  ;;  %v497_v10 = vsel %vm471_vm0, %v477_v1, %v407_v41 }
  0x2e   : > { %v5940_v11 = vsel %vm591_vm6, %v594_v6, %v5850_v29  ;;  %v5944_v12 = vsel %vm591_vm6, %v595_v7, %v5875_v45  ;;  %v596_v13 = vsel %vm5905_vm11, %v572_v9, %v5875_v45  ;;  %v5950_v14 = vrot.slane %v442_v5, %v5842_v8 }
  0x2f   : > { %v717_v15 = vrot.slane %v5940_v11, 7  ;;  %v718_v16 = vrot.slane %v5944_v12, 7  ;;  %v5956_v17 = vsel %vm591_vm6, %v596_v13, %v5899_v55  ;;  %v521_v18 = vsel %vm5868_vm9, %v497_v10, %v5864_v42 }
  0x30   : > { %v719_v19 = vrot.slane %v5956_v17, 7  ;;  %v537_v22 = vsel %vm515_vm2, %v521_v18, %v5882_v48  ;;  %v5005_v23 = vpack.i.b16 %v5846_v21, %v5846_v21  ;;  %v478_v24 = vsel %vm5854_vm8, %v403_v37, %v407_v41 }
  0x31   : > { %725 = vrot.lane.b32.xlu0 %v717_v15, %s5705_s21  ;;  %727 = vrot.lane.b32.xlu1 %v718_v16, %s5705_s21  ;;  %v559_v25 = vsel %vm5887_vm10, %v537_v22, %v5850_v29  ;;  %v501_v26 = vsel %vm471_vm0, %v478_v24, %v5864_v42  ;;  %v372_v27 = vunpack.i.h.s16 %v5846_v21  ;;  %v479_v28 = vsel %vm5854_vm8, %v407_v41, %v5864_v42 }
  0x32   : > { %v575_v30 = vsel %vm553_vm4, %v559_v25, %v5875_v45  ;;  %v451_v31 = vrot.slane %v5005_v23, %v5842_v8  ;;  %v522_v32 = vsel %vm5868_vm9, %v501_v26, %v5882_v48  ;;  %v505_v33 = vsel %vm471_vm0, %v479_v28, %v5882_v48 }
  0x33   : > { %v597_v21 = vsel %vm5905_vm11, %v575_v30, %v5899_v55  ;;  %v540_v35 = vsel %vm515_vm2, %v522_v32, %v5850_v29  ;;  %v454_v36 = vpack.i.b16 %v372_v27, %v372_v27  ;;  %v523_v37 = vsel %vm5868_vm9, %v505_v33, %v5850_v29 }
  0x34   : > { %v5997_v38 = vsel %vm591_vm6, %v597_v21, %v5950_v14  ;;  %v560_v39 = vsel %vm5887_vm10, %v540_v35, %v5875_v45  ;;  %v543_v40 = vsel %vm515_vm2, %v523_v37, %v5875_v45  ;;  %v6005_v41 = vshrl.u32 %v5940_v11, 16 }
  0x35   : > { %729 = vrot.lane.b32.xlu0 %v719_v19, %s5705_s21  ;;  %v720_v44 = vrot.slane %v5997_v38, 7  ;;  %v578_v46 = vsel %vm553_vm4, %v560_v39, %v5899_v55  ;;  %v458_v47 = vrot.slane %v454_v36, %v5842_v8  ;;  %v561_v49 = vsel %vm5887_vm10, %v543_v40, %v5899_v55 }
  0x36   : > { %v598_v51 = vsel %vm5905_vm11, %v578_v46, %v5950_v14  ;;  %v581_v52 = vsel %vm553_vm4, %v561_v49, %v5950_v14  ;;  %v631_v53 = vrot.slane %v6005_v41, 3  ;;  %v6022_v54 = vshll.u32 %v5940_v11, 16 }
  0x37   : > { %731 = vrot.lane.b32.xlu1 %v720_v44, %s5705_s21  ;;  %v6026_v56 = vsel %vm591_vm6, %v598_v51, %v451_v31  ;;  %v599_v57 = vsel %vm5905_vm11, %v581_v52, %v451_v31  ;;  %v373_v59 = vcombine.high %v5844_v20, %v5844_v20  ;;  %v481_v60 = vsel %vm5854_vm8, %v5882_v48, %v5850_v29 }
  0x38   : > { %9243 = vst [vmem:[#allocation6_spill] sm:$0xff] %v6026_v56  ;;  %v721_v61 = vrot.slane %v6026_v56, 7  ;;  %v6038_v62 = vsel %vm591_vm6, %v599_v57, %v458_v47  ;;  %v634_v63 = vrot.slane %v6022_v54, 4  ;;  %v513_v0 = vsel %vm471_vm0, %v481_v60, %v5875_v45 }
  0x39   : > { %9244 = vst [vmem:[#allocation7_spill] sm:$0xff] %v6038_v62  ;;  %v722_v1 = vrot.slane %v6038_v62, 7  ;;  %v375_v2 = vunpack.i.h.s16 %v373_v59  ;;  %v5006_v3 = vpack.i.b16 %v373_v59, %v373_v59  ;;  %v525_v20 = vsel %vm5868_vm9, %v513_v0, %v5899_v55 }
  0x3a   : > { %733 = vrot.lane.b32.xlu0 %v721_v61, %s5705_s21  ;;  %v635_v4 = vor.u32 %v634_v63, %v631_v53  ;;  %v551_v5 = vsel %vm515_vm2, %v525_v20, %v5950_v14  ;;  %v480_v6 = vsel %vm5854_vm8, %v5864_v42, %v5882_v48  ;;  %v6055_v7 = vshrl.u32 %v5944_v12, 16 }
  0x3b   : > { %735 = vrot.lane.b32.xlu1 %v722_v1, %s5705_s21  ;;  %v463_v9 = vrot.slane %v5006_v3, %v5842_v8  ;;  %v466_v10 = vpack.i.b16 %v375_v2, %v375_v2  ;;  %v563_v13 = vsel %vm5887_vm10, %v551_v5, %v451_v31  ;;  %v509_v15 = vsel %vm471_vm0, %v480_v6, %v5850_v29 }
  0x3c   : > { %v589_v16 = vsel %vm553_vm4, %v563_v13, %v458_v47  ;;  %v524_v34 = vsel %vm5868_vm9, %v509_v15, %v5875_v45  ;;  %v6068_v42 = vshll.u32 %v5944_v12, 16  ;;  %v744_v22 = vrot.slane %v6055_v7, 2 }
  0x3d   : > { %v470_v48 = vrot.slane %v466_v10, %v5842_v8  ;;  %v601_v18 = vsel %vm5905_vm11, %v589_v16, %v463_v9  ;;  %v547_v19 = vsel %vm515_vm2, %v524_v34, %v5899_v55  ;;  %v6082_v45 = vshrl.u32 %v5956_v17, 16 }
  0x3e   : > { %685 = vrot.lane.b32.xlu0 %v635_v4, %s5706_s22  ;;  %v562_v29 = vsel %vm5887_vm10, %v547_v19, %v5950_v14  ;;  %v745_v43 = vrot.slane %v6068_v42, 3  ;;  %v6089_v55 = vshll.u32 %v5956_v17, 16  ;;  %v741_v50 = vrot.slane %v6005_v41, 2 }
  0x3f   : > { %v6085_v8 = vsel %vm591_vm6, %v601_v18, %v470_v48  ;;  %v585_v23 = vsel %vm553_vm4, %v562_v29, %v451_v31  ;;  %v742_v14 = vrot.slane %v6022_v54, 3  ;;  %v645_v28 = vrot.slane %v6082_v45, 3 }
  0x40   : > { %9245 = vst [vmem:[#allocation8_spill] sm:$0xff] %v6085_v8  ;;  %v724_v24 = vrot.slane %v6085_v8, 7  ;;  %v600_v25 = vsel %vm5905_vm11, %v585_v23, %v458_v47  ;;  %v746_v27 = vor.u32 %v745_v43, %v744_v22  ;;  %v648_v31 = vrot.slane %v6089_v55, 4 }
  0x41   : > { %v6097_v26 = vsel %vm591_vm6, %v600_v25, %v463_v9  ;;  %v6104_v32 = vshrl.u32 %v5997_v38, 16  ;;  %v6107_v58 = vshll.u32 %v5997_v38, 16  ;;  %v638_v33 = vrot.slane %v6055_v7, 3 }
  0x42   : > { %9246 = vst [vmem:[#allocation9_spill] sm:$0xff] %v6097_v26  ;;  %739 = vrot.lane.b32.xlu1 %v724_v24, %s5705_s21  ;;  %v723_v30 = vrot.slane %v6097_v26, 7  ;;  %v641_v21 = vrot.slane %v6068_v42, 4  ;;  %v743_v35 = vor.u32 %v742_v14, %v741_v50  ;;  %v6113_v36 = vshrl.u32 %v6026_v56, 16 }
  0x43   : > { %v6116_v37 = vshll.u32 %v6026_v56, 16  ;;  %v6119_v39 = vshrl.u32 %v6038_v62, 16  ;;  %v649_v40 = vor.u32 %v648_v31, %v645_v28  ;;  %v652_v44 = vrot.slane %v6104_v32, 3 }
  0x44   : > { %737 = vrot.lane.b32.xlu0 %v723_v30, %s5705_s21  ;;  %v655_v46 = vrot.slane %v6107_v58, 4  ;;  %v6125_v47 = vshll.u32 %v6038_v62, 16  ;;  %v642_v49 = vor.u32 %v641_v21, %v638_v33  ;;  %v659_v51 = vrot.slane %v6113_v36, 3 }
  0x45   : > { %v662_v52 = vrot.slane %v6116_v37, 4  ;;  %v6131_v53 = vshrl.u32 %v6097_v26, 16  ;;  %v6134_v57 = vshll.u32 %v6097_v26, 16  ;;  %v666_v59 = vrot.slane %v6119_v39, 3 }
  0x46   : > { %767 = vrot.lane.b32.xlu1 %v746_v27, %s5707_s23  ;;  %v656_v60 = vor.u32 %v655_v46, %v652_v44  ;;  %v669_v61 = vrot.slane %v6125_v47, 4  ;;  %v6140_v63 = vshrl.u32 %v6085_v8, 16  ;;  %v6143_v0 = vshll.u32 %v6085_v8, 16 }
  0x47   : > { %v663_v1 = vor.u32 %v662_v52, %v659_v51  ;;  %v673_v2 = vrot.slane %v6131_v53, 3  ;;  %v676_v3 = vrot.slane %v6134_v57, 4  ;;  %v747_v9 = vrot.slane %v6082_v45, 2 }
  0x48   : > { %765 = vrot.lane.b32.xlu0 %v743_v35, %s5707_s23  ;;  %v670_v20 = vor.u32 %v669_v61, %v666_v59  ;;  %v680_v4 = vrot.slane %v6140_v63, 3  ;;  %v683_v5 = vrot.slane %v6143_v0, 4  ;;  %v748_v10 = vrot.slane %v6089_v55, 3 }
  0x49   : > { %v677_v6 = vor.u32 %v676_v3, %v673_v2  ;;  %v750_v13 = vrot.slane %v6104_v32, 2  ;;  %v751_v15 = vrot.slane %v6107_v58, 3  ;;  %v753_v34 = vrot.slane %v6113_v36, 2 }
  0x4a   : > { %689 = vrot.lane.b32.xlu1 %v649_v40, %s5706_s22  ;;  %v684_v16 = vor.u32 %v683_v5, %v680_v4  ;;  %v754_v48 = vrot.slane %v6116_v37, 3  ;;  %v756_v18 = vrot.slane %v6119_v39, 2  ;;  %v757_v19 = vrot.slane %v6125_v47, 3 }
  0x4b   : > { %v749_v22 = vor.u32 %v748_v10, %v747_v9  ;;  %v752_v29 = vor.u32 %v751_v15, %v750_v13  ;;  %v759_v23 = vrot.slane %v6131_v53, 2  ;;  %v760_v24 = vrot.slane %v6134_v57, 3 }
  0x4c   : > { %687 = vrot.lane.b32.xlu0 %v642_v49, %s5706_s22  ;;  %v755_v43 = vor.u32 %v754_v48, %v753_v34  ;;  %v762_v25 = vrot.slane %v6140_v63, 2  ;;  %v758_v50 = vor.u32 %v757_v19, %v756_v18  ;;  %v763_v14 = vrot.slane %v6143_v0, 3 }
  0x4d   : > { %v885_v27 = vrot.slane %v6022_v54, 1  ;;  %v887_v28 = vrot.slane %v6068_v42, 1  ;;  %v889_v30 = vrot.slane %v6089_v55, 1  ;;  %v891_v31 = vrot.slane %v6107_v58, 1 }
  0x4e   : > { %691 = vrot.lane.b32.xlu1 %v656_v60, %s5706_s22  ;;  %v893_v33 = vrot.slane %v6116_v37, 1  ;;  %v895_v21 = vrot.slane %v6125_v47, 1  ;;  %v897_v46 = vrot.slane %v6134_v57, 1  ;;  %v761_v3 = vor.u32 %v760_v24, %v759_v23 }
  0x4f   : > { %v6174_v35 = vpack.i.bf16 %v887_v28, %v885_v27  ;;  %v6177_v40 = vor.u32 %v885_v27, %v6005_v41  ;;  %v6180_v44 = vor.u32 %v887_v28, %v6055_v7  ;;  %v6184_v49 = vpack.i.bf16 %v891_v31, %v889_v30 }
  0x50   : > { %693 = vrot.lane.b32.xlu0 %v663_v1, %s5706_s22  ;;  %v6187_v51 = vor.u32 %v889_v30, %v6082_v45  ;;  %v6190_v52 = vor.u32 %v891_v31, %v6104_v32  ;;  %v6192_v59 = vpack.i.bf16 %v895_v21, %v893_v33  ;;  %v6195_v60 = vor.u32 %v893_v33, %v6113_v36 }
  0x51   : > { %v6198_v61 = vor.u32 %v895_v21, %v6119_v39  ;;  %v899_v1 = vrot.slane %v6143_v0, 1  ;;  %v6202_v2 = vor.u32 %v897_v46, %v6131_v53  ;;  %v764_v5 = vor.u32 %v763_v14, %v762_v25 }
  0x52   : > { %695 = vrot.lane.b32.xlu1 %v670_v20, %s5706_s22  ;;  %v790_v9 = vrot.slane %v5944_v12, 6  ;;  %v791_v10 = vrot.slane %v5956_v17, 6  ;;  %v792_v13 = vrot.slane %v5997_v38, 6  ;;  %v793_v15 = vrot.slane %v6026_v56, 6 }
  0x53   : > { %v6205_v20 = vpack.i.bf16 %v899_v1, %v897_v46  ;;  %v6208_v4 = vor.u32 %v899_v1, %v6140_v63  ;;  %v795_v34 = vrot.slane %v6097_v26, 6  ;;  %v813_v48 = vrot.slane %v6005_v41, 1 }
  0x54   : > { %697 = vrot.lane.b32.xlu0 %v677_v6, %s5706_s22  ;;  %v789_v6 = vrot.slane %v5940_v11, 6  ;;  %v814_v18 = vrot.slane %v6022_v54, 2  ;;  %v796_v19 = vrot.slane %v6085_v8, 6  ;;  %v819_v23 = vrot.slane %v6082_v45, 1 }
  0x55   : > { %v820_v24 = vrot.slane %v6089_v55, 2  ;;  %v822_v54 = vrot.slane %v6104_v32, 1  ;;  %v823_v25 = vrot.slane %v6107_v58, 2  ;;  %v828_v45 = vrot.slane %v6119_v39, 1 }
  0x56   : > { %699 = vrot.lane.b32.xlu1 %v684_v16, %s5706_s22  ;;  %v794_v16 = vrot.slane %v6038_v62, 6  ;;  %v829_v55 = vrot.slane %v6125_v47, 2  ;;  %v831_v28 = vrot.slane %v6131_v53, 1  ;;  %v832_v32 = vrot.slane %v6134_v57, 2 }
  0x57   : > { %v824_v14 = vor.u32 %v823_v25, %v822_v54  ;;  %v834_v30 = vrot.slane %v6140_v63, 1  ;;  %v861_v39 = vrot.slane %v5940_v11, 5  ;;  %v862_v47 = vrot.slane %v5944_v12, 5 }
  0x58   : > { %769 = vrot.lane.b32.xlu0 %v749_v22, %s5707_s23  ;;  %v816_v22 = vrot.slane %v6055_v7, 1  ;;  %v825_v7 = vrot.slane %v6113_v36, 1  ;;  %v830_v58 = vor.u32 %v829_v55, %v828_v45  ;;  %v835_v36 = vrot.slane %v6143_v0, 2 }
  0x59   : > { %v863_v53 = vrot.slane %v5956_v17, 5  ;;  %v864_v57 = vrot.slane %v5997_v38, 5  ;;  %v865_v63 = vrot.slane %v6026_v56, 5  ;;  %v866_v0 = vrot.slane %v6038_v62, 5 }
  0x5a   : > { %771 = vrot.lane.b32.xlu1 %v752_v29, %s5707_s23  ;;  %v817_v29 = vrot.slane %v6068_v42, 2  ;;  %v826_v42 = vrot.slane %v6116_v37, 2  ;;  %v833_v37 = vor.u32 %v832_v32, %v831_v28  ;;  %v836_v31 = vor.u32 %v835_v36, %v834_v30  ;;  %v1145_v28 = vld [vmem:[%s9155_s2] sm:$0xff]  ;;  %v1147_v30 = vld [vmem:[%s9155_s2 + $0x10] sm:$0xff]  ;;  %v1148_v36 = vld [vmem:[%s9155_s2 + $0x18] sm:$0xff] }
  0x5b   : > { %v867_v33 = vrot.slane %v6097_v26, 5  ;;  %v868_v21 = vrot.slane %v6085_v8, 5  ;;  %v9161_v46 = vmov 0   ;;  %v944_v1 = vrot.slane %v5997_v38, 4 }
  0x5c   : > { %773 = vrot.lane.b32.xlu0 %v755_v43, %s5707_s23  ;;  %v815_v43 = vor.u32 %v814_v18, %v813_v48  ;;  %v818_v41 = vor.u32 %v817_v29, %v816_v22  ;;  %v827_v27 = vor.u32 %v826_v42, %v825_v7  ;;  %5561 = vset.pattern.permute.xlu1 %v9161_v46  ;;  %vm1009_vm8 = vsmask.f32 5376 }
  0x5d   : > { %5560 = vset.pattern.permute.xlu0 %v9161_v46  ;;  %vm6511_vm9 = vmand %vm1008_vm7, %vm1009_vm8  ;;  %vm965_vm10 = vcmask 1044480   ;;  %vm966_vm11 = vsmask.f32 4352 }
  0x5e   : > { %775 = vrot.lane.b32.xlu1 %v758_v50, %s5707_s23  ;;  %v821_v50 = vor.u32 %v820_v24, %v819_v23  ;;  %vm6528_vm13 = vmand %vm965_vm10, %vm966_vm11 }
  0x60   : > { %777 = vrot.lane.b32.xlu0 %v761_v3, %s5707_s23  ;;  %v945_v3 = vrot.slane %v6026_v56, 4 }
  0x62   : > { %779 = vrot.lane.b32.xlu1 %v764_v5, %s5707_s23  ;;  %v947_v5 = vrot.slane %v6097_v26, 4  ;;  %v5714_v26 = vmov 5  }
  0x64   : > { %797 = vrot.lane.b32.xlu0 %v789_v6, %s5708_s24 }
  0x66   : > { %799 = vrot.lane.b32.xlu1 %v790_v9, %s5708_s24  ;;  %v948_v9 = vrot.slane %v6085_v8, 4 }
  0x68   : > { %801 = vrot.lane.b32.xlu0 %v791_v10, %s5708_s24  ;;  %v6296_v10 = vld [vmem:[%s9154_s1] sm:$0xff]  }
  0x69   : > { %5207 = vmatprep.mubr.msk.bf16.mxu0 %vm1213_vm12, %v6296_v10  ;;  %5227 = vmatprep.mubr.msk.bf16.mxu1 %vm1213_vm12, %v6296_v10 }
  0x6a   : > { %803 = vrot.lane.b32.xlu1 %v792_v13, %s5708_s24 }
  0x6c   : > { %805 = vrot.lane.b32.xlu0 %v793_v15, %s5708_s24 }
  0x6e   : > { %807 = vrot.lane.b32.xlu1 %v794_v16, %s5708_s24 }
  0x70   : > { %809 = vrot.lane.b32.xlu0 %v795_v34, %s5708_s24 }
  0x72   : > { %811 = vrot.lane.b32.xlu1 %v796_v19, %s5708_s24 }
  0x74   : > { %837 = vrot.lane.b32.xlu0 %v815_v43, %s5709_s25 }
  0x76   : > { %839 = vrot.lane.b32.xlu1 %v818_v41, %s5709_s25 }
  0x78   : > { %841 = vrot.lane.b32.xlu0 %v821_v50, %s5709_s25 }
  0x7a   : > { %843 = vrot.lane.b32.xlu1 %v824_v14, %s5709_s25 }
  0x7c   : > { %845 = vrot.lane.b32.xlu0 %v827_v27, %s5709_s25  ;;  %v1146_v27 = vld [vmem:[%s9155_s2 + $0x8] sm:$0xff] }
  0x7e   : > { %847 = vrot.lane.b32.xlu1 %v830_v58, %s5709_s25 }
  0x80   : > { %849 = vrot.lane.b32.xlu0 %v833_v37, %s5709_s25 }
  0x82   : > { %851 = vrot.lane.b32.xlu1 %v836_v31, %s5709_s25 }
  0x84   : > { %869 = vrot.lane.b32.xlu0 %v861_v39, %s5710_s6  ;;  %v1149_v39 = vld [vmem:[%s9155_s2 + $0x20] sm:$0xff] }
  0x86   : > { %871 = vrot.lane.b32.xlu1 %v862_v47, %s5710_s6  ;;  %v1150_v47 = vld [vmem:[%s9155_s2 + $0x28] sm:$0xff] }
  0x88   : > { %873 = vrot.lane.b32.xlu0 %v863_v53, %s5710_s6 }
  0x8a   : > { %875 = vrot.lane.b32.xlu1 %v864_v57, %s5710_s6 }
  0x8c   : > { %877 = vrot.lane.b32.xlu0 %v865_v63, %s5710_s6  ;;  %v1151_v63 = vld [vmem:[%s9155_s2 + $0x30] sm:$0xff] }
  0x8e   : > { %879 = vrot.lane.b32.xlu1 %v866_v0, %s5710_s6  ;;  %v1152_v0 = vld [vmem:[%s9155_s2 + $0x38] sm:$0xff] }
  0x90   : > { %881 = vrot.lane.b32.xlu0 %v867_v33, %s5710_s6 }
  0x92   : > { %883 = vrot.lane.b32.xlu1 %v868_v21, %s5710_s6 }
  0x94   : > { %5541 = vrot.lane.b32.xlu0 %v6174_v35, %s5711_s9 }
  0x96   : > { %903 = vrot.lane.b32.xlu1 %v6177_v40, %s5711_s9 }
  0x98   : > { %907 = vrot.lane.b32.xlu0 %v6180_v44, %s5711_s9 }
  0x9a   : > { %5546 = vrot.lane.b32.xlu1 %v6184_v49, %s5711_s9  ;;  %v941_v49 = vrot.slane %v5940_v11, 4 }
  0x9c   : > { %911 = vrot.lane.b32.xlu0 %v6187_v51, %s5711_s9 }
  0x9e   : > { %915 = vrot.lane.b32.xlu1 %v6190_v52, %s5711_s9  ;;  %v942_v52 = vrot.slane %v5944_v12, 4 }
  0xa0   : > { %5551 = vrot.lane.b32.xlu0 %v6192_v59, %s5711_s9 }
  0xa2   : > { %919 = vrot.lane.b32.xlu1 %v6195_v60, %s5711_s9  ;;  %v943_v60 = vrot.slane %v5956_v17, 4 }
  0xa3   : > { %v6263_v35 = vpop.permute.xlu0 %725  ;;  %v6265_v40 = vpop.permute.xlu1 %727 }
  0xa4   : > { %923 = vrot.lane.b32.xlu0 %v6198_v61, %s5711_s9 }
  0xa6   : > { %5556 = vrot.lane.b32.xlu1 %v6205_v20, %s5711_s9  ;;  %v946_v20 = vrot.slane %v6038_v62, 4 }
  0xa7   : > { %v6269_v44 = vpop.permute.xlu0 %729 }
  0xa8   : > { %927 = vrot.lane.b32.xlu0 %v6202_v2, %s5711_s9 }
  0xa9   : > { %v6273_v51 = vpop.permute.xlu1 %731 }
  0xaa   : > { %931 = vrot.lane.b32.xlu1 %v6208_v4, %s5711_s9 }
  0xac   : > { %949 = vrot.lane.b32.xlu0 %v941_v49, %s5713_s11  ;;  %v6277_v59 = vpop.permute.xlu0 %733  ;;  %v1864_v49 = vld [vmem:[%s9157_s4] sm:$0xff] }
  0xad   : > { %v6280_v61 = vpop.permute.xlu1 %735 }
  0xae   : > { %951 = vrot.lane.b32.xlu1 %v942_v52, %s5713_s11  ;;  %9247 = vst [vmem:[#allocation10_spill] sm:$0xff] %v6280_v61  ;;  %v1865_v52 = vld [vmem:[%s9157_s4 + $0x8] sm:$0xff] }
  0xb0   : > { %953 = vrot.lane.b32.xlu0 %v943_v60, %s5713_s11  ;;  %v6283_v2 = vpop.permute.xlu0 %685 }
  0xb2   : > { %955 = vrot.lane.b32.xlu1 %v944_v1, %s5713_s11 }
  0xb4   : > { %v6287_v4 = vpop.permute.xlu1 %739  ;;  %957 = vrot.lane.b32.xlu0 %v945_v3, %s5713_s11  ;;  %v1866_v3 = vld [vmem:[%s9157_s4 + $0x10] sm:$0xff] }
  0xb5   : > { %9248 = vst [vmem:[#allocation11_spill] sm:$0xff] %v6287_v4 }
  0xb6   : > { %959 = vrot.lane.b32.xlu1 %v946_v20, %s5713_s11  ;;  %v6290_v6 = vpop.permute.xlu0 %737  ;;  %v1867_v20 = vld [vmem:[%s9157_s4 + $0x18] sm:$0xff] }
  0xb7   : > { %9249 = vst [vmem:[#allocation12_spill] sm:$0xff] %v6290_v6 }
  0xb8   : > { %v6298_v13 = vpop.permute.xlu1 %767  ;;  %961 = vrot.lane.b32.xlu0 %v947_v5, %s5713_s11 }
  0xba   : > { %963 = vrot.lane.b32.xlu1 %v948_v9, %s5713_s11  ;;  %v6304_v15 = vpop.permute.xlu0 %765 }
  0xbc   : > { %v6306_v16 = vpop.permute.xlu1 %689  ;;  %1155 = vperm.xlu0 %5560, %v1145_v28   ;;  %v6412_v28 = vld [vmem:[%s9158_s5 + $0x8] sm:$0xff] }
  0xbe   : > { %v6308_v34 = vpop.permute.xlu0 %687  ;;  %1160 = vperm.xlu1 %5561, %v1146_v27   ;;  %v6407_v27 = vld [vmem:[%s9158_s5] sm:$0xff] }
  0xc0   : > { %v6310_v48 = vpop.permute.xlu1 %691  ;;  %1170 = vperm.xlu0 %5560, %v1148_v36  }
  0xc2   : > { %v6312_v18 = vpop.permute.xlu0 %693  ;;  %1165 = vperm.xlu1 %5561, %v1147_v30  }
  0xc4   : > { %v6314_v19 = vpop.permute.xlu1 %695  ;;  %1180 = vperm.xlu0 %5560, %v1150_v47   ;;  %v6428_v47 = vld [vmem:[%s9158_s5 + $0x18] sm:$0xff] }
  0xc5   : > { %9250 = vst [vmem:[#allocation13_spill] sm:$0xff] %v6314_v19 }
  0xc6   : > { %v6316_v22 = vpop.permute.xlu0 %697  ;;  %1175 = vperm.xlu1 %5561, %v1149_v39   ;;  %v6423_v39 = vld [vmem:[%s9158_s5 + $0x10] sm:$0xff] }
  0xc7   : > { %9251 = vst [vmem:[#allocation14_spill] sm:$0xff] %v6316_v22  ;;  %v5715_v22 = vmov 10  }
  0xc8   : > { %v6318_v29 = vpop.permute.xlu1 %699  ;;  %1190 = vperm.xlu0 %5560, %v1152_v0  }
  0xc9   : > { %9252 = vst [vmem:[#allocation15_spill] sm:$0xff] %v6318_v29 }
  0xca   : > { %v6320_v43 = vpop.permute.xlu0 %769  ;;  %1185 = vperm.xlu1 %5561, %v1151_v63  }
  0xcc   : > { %v6322_v23 = vpop.permute.xlu1 %771  ;;  %1875 = vperm.xlu0 %5560, %v1865_v52  }
  0xce   : > { %v6324_v24 = vpop.permute.xlu0 %773  ;;  %1870 = vperm.xlu1 %5561, %v1864_v49  }
  0xd0   : > { %v6326_v41 = vpop.permute.xlu1 %775  ;;  %1885 = vperm.xlu0 %5560, %v1867_v20  }
  0xd2   : > { %v6328_v54 = vpop.permute.xlu0 %777  ;;  %1880 = vperm.xlu1 %5561, %v1866_v3  }
  0xd3   : > { %9253 = vst [vmem:[#allocation16_spill] sm:$0xff] %v6328_v54 }
  0xd4   : > { %v6330_v25 = vpop.permute.xlu1 %779  ;;  %2340 = vperm.xlu0 %5560, %v6412_v28  }
  0xd5   : > { %9254 = vst [vmem:[#allocation17_spill] sm:$0xff] %v6330_v25 }
  0xd6   : > { %v6332_v50 = vpop.permute.xlu0 %797  ;;  %2335 = vperm.xlu1 %5561, %v6407_v27  }
  0xd8   : > { %v6334_v7 = vpop.permute.xlu1 %799  ;;  %2350 = vperm.xlu0 %5560, %v6428_v47  }
  0xda   : > { %v6336_v42 = vpop.permute.xlu0 %801  ;;  %2345 = vperm.xlu1 %5561, %v6423_v39  }
  0xdc   : > { %v6338_v14 = vpop.permute.xlu1 %803  ;;  %5563 = vset.pattern.permute.xlu0 %v5714_v26 }
  0xdd   : > { %2390 = vperm.xlu0 %5563, %v6412_v28  }
  0xde   : > { %v6340_v45 = vpop.permute.xlu0 %805  ;;  %5562 = vset.pattern.permute.xlu1 %v5714_v26 }
  0xdf   : > { %2386 = vperm.xlu1 %5562, %v6407_v27  }
  0xe0   : > { %v6342_v55 = vpop.permute.xlu1 %807 }
  0xe1   : > { %5564 = vset.pattern.permute.xlu0 %v5715_v22 }
  0xe2   : > { %v6350_v32 = vpop.permute.xlu0 %809  ;;  %2434 = vperm.xlu0 %5564, %v6407_v27  }
  0xe3   : > { %9255 = vst [vmem:[#allocation18_spill] sm:$0xff] %v6350_v32  ;;  %2394 = vperm.xlu1 %5562, %v6423_v39   ;;  %v5716_v32 = vmov 15  }
  0xe4   : > { %v6352_v58 = vpop.permute.xlu1 %811 }
  0xe5   : > { %9256 = vst [vmem:[#allocation19_spill] sm:$0xff] %v6352_v58 }
  0xe6   : > { %v6360_v37 = vpop.permute.xlu0 %837  ;;  %2446 = vperm.xlu0 %5564, %v6428_v47  }
  0xe7   : > { %2398 = vperm.xlu1 %5562, %v6428_v47  }
  0xe8   : > { %v6362_v31 = vpop.permute.xlu1 %839 }
  0xea   : > { %v6370_v53 = vpop.permute.xlu0 %841  ;;  %5567 = vset.pattern.permute.xlu0 %v5716_v32 }
  0xeb   : > { %5565 = vset.pattern.permute.xlu1 %v5715_v22  ;;  %2486 = vperm.xlu0 %5567, %v6412_v28   ;;  %v5717_v22 = vmov 20  }
  0xec   : > { %v6372_v57 = vpop.permute.xlu1 %843  ;;  %2438 = vperm.xlu1 %5565, %v6412_v28  }
  0xee   : > { %v6380_v33 = vpop.permute.xlu0 %845 }
  0xef   : > { %5568 = vset.pattern.permute.xlu0 %v5717_v22 }
  0xf0   : > { %v6382_v21 = vpop.permute.xlu1 %847  ;;  %2442 = vperm.xlu1 %5565, %v6423_v39   ;;  %2530 = vperm.xlu0 %5568, %v6407_v27  }
  0xf2   : > { %v6390_v60 = vpop.permute.xlu0 %849 }
  0xf3   : > { %9257 = vst [vmem:[#allocation20_spill] sm:$0xff] %v6390_v60 }
  0xf4   : > { %v6392_v1 = vpop.permute.xlu1 %851  ;;  %5566 = vset.pattern.permute.xlu1 %v5716_v32  ;;  %2542 = vperm.xlu0 %5568, %v6428_v47  }
  0xf5   : > { %9258 = vst [vmem:[#allocation21_spill] sm:$0xff] %v6392_v1  ;;  %2482 = vperm.xlu1 %5566, %v6407_v27  }
  0xf6   : > { %v6400_v5 = vpop.permute.xlu0 %869 }
  0xf8   : > { %v6402_v9 = vpop.permute.xlu1 %871 }
  0xf9   : > { %2490 = vperm.xlu1 %5566, %v6423_v39  }
  0xfa   : > { %v6414_v30 = vpop.permute.xlu0 %873 }
  0xfc   : > { %v6418_v36 = vpop.permute.xlu1 %875 }
  0xfd   : > { %2494 = vperm.xlu1 %5566, %v6428_v47  }
  0xfe   : > { %v6430_v63 = vpop.permute.xlu0 %877 }
 0x100   : > { %v6434_v0 = vpop.permute.xlu1 %879 }
 0x101   : > { %5569 = vset.pattern.permute.xlu1 %v5717_v22  ;;  %v6549_v22 = vld [vmem:[%s9154_s1 + $0x8] sm:$0xff]  }
 0x102   : > { %v6436_v49 = vpop.permute.xlu0 %881  ;;  %2534 = vperm.xlu1 %5569, %v6412_v28  }
 0x103   : > { %9259 = vst [vmem:[#allocation22_spill] sm:$0xff] %v6436_v49 }
 0x104   : > { %v6438_v52 = vpop.permute.xlu1 %883 }
 0x105   : > { %9260 = vst [vmem:[#allocation23_spill] sm:$0xff] %v6438_v52  ;;  %v9264_v52 = vmov 0  }
 0x106   : > { %v6440_v3 = vpop.permute.xlu0 %5541  ;;  %v6470_v60 = vsel %vm471_vm0, 65535, %v9264_v52  ;;  %2538 = vperm.xlu1 %5569, %v6423_v39  }
 0x107   : > { %v5544_v19 = vunpack.i.h.bf16 %v6440_v3 }
 0x108   : > { %v904_v20 = vpop.permute.xlu1 %903 }
 0x10a   : > { %v908_v46 = vpop.permute.xlu0 %907 }
 0x10c   : > { %v6442_v8 = vpop.permute.xlu1 %5546 }
 0x10e   : > { %v6446_v29 = vpop.permute.xlu0 %911 }
 0x110   : > { %v6448_v4 = vpop.permute.xlu1 %915 }
 0x112   : > { %v6451_v6 = vpop.permute.xlu0 %5551 }
 0x114   : > { %v6454_v25 = vpop.permute.xlu1 %919 }
 0x116   : > { %v6457_v26 = vpop.permute.xlu0 %923 }
 0x118   : > { %v6460_v58 = vpop.permute.xlu1 %5556 }
 0x119   : > { %9261 = vst [vmem:[#allocation24_spill] sm:$0xff] %v6460_v58 }
 0x11a   : > { %v6462_v54 = vpop.permute.xlu0 %927 }
 0x11b   : > { %9262 = vst [vmem:[#allocation25_spill] sm:$0xff] %v6462_v54 }
 0x11c   : > { %v6466_v1 = vpop.permute.xlu1 %931 }
 0x11d   : > { %9263 = vst [vmem:[#allocation26_spill] sm:$0xff] %v6466_v1  ;;  %v5543_v1 = vunpack.i.l.bf16 %v6440_v3 }
 0x11e   : > { %v950_v49 = vpop.permute.xlu0 %949 }
 0x11f   : > { %v1228_v58 = vand.u32 %v6470_v60, %v950_v49  ;;  %v1107_v52 = vsel %vm591_vm6, %v904_v20, %v950_v49 }
 0x120   : > { %v952_v54 = vpop.permute.xlu1 %951 }
 0x121   : > { %5195 = vmatprep.subr.bf16.mxu0 %v1228_v58  ;;  %v1295_v62 = vand.u32 %v6470_v60, %v952_v54  ;;  %v1111_v61 = vsel %vm591_vm6, %v908_v46, %v952_v54  ;;  %v9292_v46 = vld [vmem:[#allocation9_spill] sm:$0xff] }
 0x122   : > { %5196 = vmatpush3.bf16.msra.mxu0 %v1228_v58  ;;  %v1064_v58 = vsel %vm553_vm4, %v6360_v37, %v6400_v5  ;;  %v5718_v5 = vmov 1  }
 0x123   : > { %5215 = vmatprep.subr.bf16.mxu1 %v1295_v62  ;;  %5197 = vmatprep.subr.bf16.mxu0 %v1107_v52  ;;  %v1097_v32 = vsel %vm6478_vm15, %v1064_v58, %v5543_v1  ;;  %v1021_v1 = vsel %vm515_vm2, %v6304_v15, %v6332_v50 }
 0x124   : > { %5216 = vmatpush3.bf16.msra.mxu1 %v1295_v62  ;;  %v1068_v62 = vsel %vm553_vm4, %v6362_v31, %v6402_v9  ;;  %5571 = vset.pattern.permute.xlu0 %v5718_v5  ;;  %v1054_v9 = vsel %vm6494_vm5, %v1021_v1, %v6360_v37  ;;  %v978_v37 = vsel %vm471_vm0, %v6283_v2, %v6263_v35  ;;  %v956_v3 = vpop.permute.xlu1 %955 }
 0x125   : > { %5217 = vmatprep.subr.bf16.mxu1 %v1111_v61  ;;  %v1098_v54 = vsel %vm6478_vm15, %v1068_v62, %v5544_v19  ;;  %2582 = vperm.xlu0 %5571, %v6412_v28   ;;  %v1011_v49 = vsel %vm6511_vm9, %v978_v37, %v6304_v15  ;;  %v968_v15 = vsel %vm6528_vm13, %v5940_v11, %v6283_v2  ;;  %v6555_v11 = vld [vmem:[%s9154_s1 + $0x10] sm:$0xff]   ;;  %v5720_v19 = vmov 11  }
 0x126   : > { %5198 = vmatpush3.bf16.msra.mxu0 %v1107_v52  ;;  %v1429_v20 = vand.u32 %v6470_v60, %v956_v3  ;;  %v1119_v58 = vsel %vm591_vm6, %v6448_v4, %v956_v3  ;;  %5570 = vset.pattern.permute.xlu1 %v5718_v5  ;;  %v1076_v4 = vsel %vm553_vm4, %v6372_v57, %v6418_v36  ;;  %v9273_v37 = vld [vmem:[#allocation10_spill] sm:$0xff] }
 0x127   : > { %5199 = vmatprep.subr.bf16.mxu0 %v1097_v32  ;;  %2578 = vperm.xlu1 %5570, %v6407_v27   ;;  %v1029_v62 = vsel %vm515_vm2, %v6320_v43, %v6336_v42  ;;  %v1033_v36 = vsel %vm515_vm2, %v6322_v23, %v6338_v14  ;;  %v990_v1 = vsel %vm471_vm0, %v6310_v48, %v6273_v51 }
 0x128   : > { %5218 = vmatpush3.bf16.msra.mxu1 %v1111_v61  ;;  %v1025_v61 = vsel %vm515_vm2, %v6298_v13, %v6334_v7  ;;  %v982_v7 = vsel %vm471_vm0, %v6308_v34, %v6265_v40  ;;  %v954_v40 = vpop.permute.xlu0 %953  ;;  %v1057_v42 = vsel %vm6494_vm5, %v1033_v36, %v6372_v57  ;;  %v1014_v57 = vsel %vm6511_vm9, %v990_v1, %v6322_v23  ;;  %v960_v51 = vpop.permute.xlu1 %959 }
 0x129   : > { %5219 = vmatprep.subr.bf16.mxu1 %v1098_v54  ;;  %v1055_v50 = vsel %vm6494_vm5, %v1025_v61, %v6362_v31  ;;  %v1012_v35 = vsel %vm6511_vm9, %v982_v7, %v6298_v13  ;;  %v1362_v52 = vand.u32 %v6470_v60, %v954_v40  ;;  %v969_v13 = vsel %vm6528_vm13, %v5944_v12, %v6308_v34  ;;  %v9274_v7 = vld [vmem:[#allocation13_spill] sm:$0xff] }
 0x12a   : > { %5200 = vmatpush3.bf16.msra.mxu0 %v1097_v32  ;;  %v5548_v12 = vunpack.i.l.bf16 %v6442_v8  ;;  %v1115_v2 = vsel %vm591_vm6, %v6446_v29, %v954_v40  ;;  %v5549_v34 = vunpack.i.h.bf16 %v6442_v8  ;;  %v1072_v29 = vsel %vm553_vm4, %v6370_v53, %v6414_v30  ;;  %v6577_v32 = vld [vmem:[%s9154_s1 + $0x18] sm:$0xff]  }
 0x12b   : > { %5201 = vmatprep.subr.bf16.mxu0 %v1054_v9  ;;  %2586 = vperm.xlu1 %5570, %v6423_v39   ;;  %v971_v23 = vsel %vm6528_vm13, %v5997_v38, %v6310_v48  ;;  %v5554_v38 = vunpack.i.h.bf16 %v6451_v6  ;;  %v1127_v48 = vsel %vm591_vm6, %v6457_v26, %v960_v51  ;;  %v5721_v31 = vmov 16  }
 0x12c   : > { %5220 = vmatpush3.bf16.msra.mxu1 %v1098_v54  ;;  %v1099_v8 = vsel %vm6478_vm15, %v1072_v29, %v5548_v12  ;;  %v1100_v30 = vsel %vm6478_vm15, %v1076_v4, %v5549_v34  ;;  %v1056_v54 = vsel %vm6494_vm5, %v1029_v62, %v6370_v53  ;;  %v986_v53 = vsel %vm471_vm0, %v6306_v16, %v6269_v44  ;;  %v958_v44 = vpop.permute.xlu0 %957  ;;  %v9281_v29 = vld [vmem:[#allocation20_spill] sm:$0xff]  ;;  %v9283_v62 = vld [vmem:[#allocation21_spill] sm:$0xff] }
 0x12d   : > { %5221 = vmatprep.subr.bf16.mxu1 %v1055_v50  ;;  %v1013_v14 = vsel %vm6511_vm9, %v986_v53, %v6320_v43  ;;  %v970_v43 = vsel %vm6528_vm13, %v5956_v17, %v6306_v16  ;;  %v1496_v5 = vand.u32 %v6470_v60, %v958_v44  ;;  %v5553_v17 = vunpack.i.l.bf16 %v6451_v6  ;;  %v9285_v53 = vld [vmem:[#allocation16_spill] sm:$0xff] }
 0x12e   : > { %5202 = vmatpush3.bf16.msra.mxu0 %v1054_v9  ;;  %v1563_v9 = vand.u32 %v6470_v60, %v960_v51  ;;  %v1123_v16 = vsel %vm591_vm6, %v6454_v25, %v958_v44  ;;  %v1080_v25 = vsel %vm553_vm4, %v6380_v33, %v6430_v63  ;;  %v1084_v6 = vsel %vm553_vm4, %v6382_v21, %v6434_v0  ;;  %v9287_v44 = vld [vmem:[#allocation17_spill] sm:$0xff]  ;;  %v9289_v51 = vld [vmem:[#allocation14_spill] sm:$0xff] }
 0x12f   : > { %5203 = vmatprep.subr.bf16.mxu0 %v1011_v49  ;;  %2590 = vperm.xlu1 %5570, %v6428_v47   ;;  %v1101_v61 = vsel %vm6478_vm15, %v1080_v25, %v5553_v17  ;;  %v1102_v26 = vsel %vm6478_vm15, %v1084_v6, %v5554_v38  ;;  %v1041_v0 = vsel %vm515_vm2, %v6326_v41, %v6342_v55  ;;  %v9290_v17 = vld [vmem:[#allocation11_spill] sm:$0xff]  ;;  %v9293_v25 = vld [vmem:[#allocation8_spill] sm:$0xff]  ;;  %v5719_v6 = vmov 6  }
 0x130   : > { %5222 = vmatpush3.bf16.msra.mxu1 %v1055_v50  ;;  %v1037_v50 = vsel %vm515_vm2, %v6324_v24, %v6340_v45  ;;  %v1059_v45 = vsel %vm6494_vm5, %v1041_v0, %v6382_v21  ;;  %5572 = vset.pattern.permute.xlu0 %v5719_v6  ;;  %v5727_v0 = vmov 22  }
 0x131   : > { %5223 = vmatprep.subr.bf16.mxu1 %v1012_v35  ;;  %v1058_v63 = vsel %vm6494_vm5, %v1037_v50, %v6380_v33  ;;  %v994_v33 = vsel %vm471_vm0, %v6312_v18, %v6277_v59  ;;  %v9275_v59 = vld [vmem:[#allocation6_spill] sm:$0xff]  ;;  %2690 = vperm.xlu0 %5572, %v6407_v27   ;;  %v5725_v50 = vmov 12  }
 0x132   : > { %5204 = vmatpush3.bf16.msra.mxu0 %v1011_v49  ;;  %v1015_v55 = vsel %vm6511_vm9, %v994_v33, %v6324_v24  ;;  %v998_v49 = vsel %vm471_vm0, %v9274_v7, %v9273_v37  ;;  %v972_v40 = vsel %vm6528_vm13, %v9275_v59, %v6312_v18  ;;  %v9277_v18 = vld [vmem:[#allocation24_spill] sm:$0xff] }
 0x133   : > { %5205 = vmatprep.subr.bf16.mxu0 %v968_v15  ;;  %v1016_v21 = vsel %vm6511_vm9, %v998_v49, %v6326_v41  ;;  %5573 = vset.pattern.permute.xlu1 %v5719_v6 }
 0x134   : > { %5224 = vmatpush3.bf16.msra.mxu1 %v1012_v35  ;;  %v962_v35 = vpop.permute.xlu0 %961  ;;  %2694 = vperm.xlu1 %5573, %v6412_v28  }
 0x135   : > { %5225 = vmatprep.subr.bf16.mxu1 %v969_v13  ;;  %v1630_v24 = vand.u32 %v6470_v60, %v962_v35  ;;  %2702 = vperm.xlu0 %5572, %v6428_v47  }
 0x136   : > { %5206 = vmatpush3.bf16.msra.mxu0 %v968_v15  ;;  %v964_v15 = vpop.permute.xlu1 %963 }
 0x137   : > { %5235 = vmatprep.subr.bf16.mxu0 %v1362_v52  ;;  %v1697_v41 = vand.u32 %v6470_v60, %v964_v15  ;;  %v5559_v60 = vunpack.i.h.bf16 %v9277_v18 }
 0x138   : > { %5226 = vmatpush3.bf16.msra.mxu1 %v969_v13  ;;  %v5558_v13 = vunpack.i.l.bf16 %v9277_v18  ;;  %2698 = vperm.xlu1 %5573, %v6423_v39  }
 0x139   : > { %5208 = vmatmul.mubr.msk.bf16.vlgmr.msra.gmra.mxu0 %vm1213_vm12, %v6549_v22  ;;  %5255 = vmatprep.subr.bf16.mxu1 %v1429_v20 }
 0x13a   : > { %5236 = vmatpush3.bf16.msra.mxu0 %v1362_v52  ;;  %5211 = vmatprep.mubr.msk.bf16.mxu0 %vm1213_vm12, %v6555_v11  ;;  %v9276_v52 = vld [vmem:[#allocation7_spill] sm:$0xff]  ;;  %v6822_v33 = vpop.permute.xlu1 %1160 }
 0x13b   : > { %5228 = vmatmul.mubr.msk.bf16.vlgmr.msra.gmra.mxu1 %vm1213_vm12, %v6549_v22  ;;  %5237 = vmatprep.subr.bf16.mxu0 %v1115_v2  ;;  %v973_v3 = vsel %vm6528_vm13, %v9276_v52, %v9274_v7 }
 0x13c   : > { %5256 = vmatpush3.bf16.msra.mxu1 %v1429_v20  ;;  %5231 = vmatprep.mubr.msk.bf16.mxu1 %vm1213_vm12, %v6555_v11  ;;  %v9278_v20 = vld [vmem:[#allocation25_spill] sm:$0xff] }
 0x13d   : > { %5257 = vmatprep.subr.bf16.mxu1 %v1119_v58  ;;  %v1131_v12 = vsel %vm591_vm6, %v9278_v20, %v962_v35  ;;  %5574 = vset.pattern.permute.xlu1 %v5720_v19 }
 0x13e   : > { %5238 = vmatpush3.bf16.msra.mxu0 %v1115_v2  ;;  %v9279_v2 = vld [vmem:[#allocation26_spill] sm:$0xff]  ;;  %2802 = vperm.xlu1 %5574, %v6407_v27   ;;  %v6826_v37 = vpop.permute.xlu1 %1165 }
 0x13f   : > { %5239 = vmatprep.subr.bf16.mxu0 %v1099_v8  ;;  %v1135_v34 = vsel %vm591_vm6, %v9279_v2, %v964_v15  ;;  %5575 = vset.pattern.permute.xlu0 %v5720_v19  ;;  %vm4890_vm6 = vcmask 1042434  }
 0x140   : > { %5258 = vmatpush3.bf16.msra.mxu1 %v1119_v58  ;;  %v9280_v58 = vld [vmem:[#allocation22_spill] sm:$0xff]  ;;  %2806 = vperm.xlu0 %5575, %v6412_v28  }
 0x141   : > { %5259 = vmatprep.subr.bf16.mxu1 %v1100_v30  ;;  %5212 = vmatmul.mubr.msk.bf16.gmra.mxu0 %vm1213_vm12, %v6577_v32 }
 0x142   : > { %5240 = vmatpush3.bf16.msra.mxu0 %v1099_v8  ;;  %5247 = vmatprep.mubr.msk.bf16.mxu0 %vm1213_vm12, %v6296_v10  ;;  %v1088_v8 = vsel %vm553_vm4, %v9281_v29, %v9280_v58  ;;  %v6830_v49 = vpop.permute.xlu1 %1175 }
 0x143   : > { %5232 = vmatmul.mubr.msk.bf16.gmra.mxu1 %vm1213_vm12, %v6577_v32  ;;  %5241 = vmatprep.subr.bf16.mxu0 %v1056_v54  ;;  %v1103_v4 = vsel %vm6478_vm15, %v1088_v8, %v5558_v13 }
 0x144   : > { %5260 = vmatpush3.bf16.msra.mxu1 %v1100_v30  ;;  %5267 = vmatprep.mubr.msk.bf16.mxu1 %vm1213_vm12, %v6296_v10  ;;  %v9282_v30 = vld [vmem:[#allocation23_spill] sm:$0xff] }
 0x145   : > { %5261 = vmatprep.subr.bf16.mxu1 %v1057_v42  ;;  %2810 = vperm.xlu1 %5574, %v6423_v39  }
 0x146   : > { %5242 = vmatpush3.bf16.msra.mxu0 %v1056_v54  ;;  %v1092_v54 = vsel %vm553_vm4, %v9283_v62, %v9282_v30  ;;  %5576 = vset.pattern.permute.xlu0 %v5721_v31  ;;  %vm4888_vm4 = vcmask 1041409  }
 0x147   : > { %5243 = vmatprep.subr.bf16.mxu0 %v1013_v14  ;;  %v1104_v36 = vsel %vm6478_vm15, %v1092_v54, %v5559_v60  ;;  %2914 = vperm.xlu0 %5576, %v6407_v27  }
 0x148   : > { %5262 = vmatpush3.bf16.msra.mxu1 %v1057_v42  ;;  %v9284_v42 = vld [vmem:[#allocation18_spill] sm:$0xff] }
 0x149   : > { %5263 = vmatprep.subr.bf16.mxu1 %v1014_v57  ;;  %2814 = vperm.xlu1 %5574, %v6428_v47  }
 0x14a   : > { %5244 = vmatpush3.bf16.msra.mxu0 %v1013_v14  ;;  %v1045_v14 = vsel %vm515_vm2, %v9285_v53, %v9284_v42 }
 0x14b   : > { %5245 = vmatprep.subr.bf16.mxu0 %v970_v43  ;;  %v1060_v1 = vsel %vm6494_vm5, %v1045_v14, %v9281_v29  ;;  %2926 = vperm.xlu0 %5576, %v6428_v47  }
 0x14c   : > { %5264 = vmatpush3.bf16.msra.mxu1 %v1014_v57  ;;  %v9286_v57 = vld [vmem:[#allocation19_spill] sm:$0xff] }
 0x14d   : > { %5265 = vmatprep.subr.bf16.mxu1 %v971_v23  ;;  %v1049_v56 = vsel %vm515_vm2, %v9287_v44, %v9286_v57  ;;  %5577 = vset.pattern.permute.xlu1 %v5721_v31  ;;  %vm4817_vm2 = vcmask 31744  }
 0x14e   : > { %5246 = vmatpush3.bf16.msra.mxu0 %v970_v43  ;;  %v1061_v43 = vsel %vm6494_vm5, %v1049_v56, %v9283_v62  ;;  %2918 = vperm.xlu1 %5577, %v6412_v28  }
 0x14f   : > { %5275 = vmatprep.subr.bf16.mxu0 %v1496_v5 }
 0x150   : > { %5266 = vmatpush3.bf16.msra.mxu1 %v971_v23 }
 0x151   : > { %5248 = vmatmul.mubr.msk.bf16.vlgmr.msra.gmra.mxu0 %vm1213_vm12, %v6549_v22  ;;  %5295 = vmatprep.subr.bf16.mxu1 %v1563_v9 }
 0x152   : > { %5276 = vmatpush3.bf16.msra.mxu0 %v1496_v5  ;;  %5251 = vmatprep.mubr.msk.bf16.mxu0 %vm1213_vm12, %v6555_v11  ;;  %v9288_v5 = vld [vmem:[#allocation12_spill] sm:$0xff] }
 0x153   : > { %5268 = vmatmul.mubr.msk.bf16.vlgmr.msra.gmra.mxu1 %vm1213_vm12, %v6549_v22  ;;  %5277 = vmatprep.subr.bf16.mxu0 %v1123_v16  ;;  %v1002_v23 = vsel %vm471_vm0, %v9289_v51, %v9288_v5 }
 0x154   : > { %5296 = vmatpush3.bf16.msra.mxu1 %v1563_v9  ;;  %5271 = vmatprep.mubr.msk.bf16.mxu1 %vm1213_vm12, %v6555_v11  ;;  %v1017_v9 = vsel %vm6511_vm9, %v1002_v23, %v9285_v53 }
 0x155   : > { %5297 = vmatprep.subr.bf16.mxu1 %v1127_v48  ;;  %2922 = vperm.xlu1 %5577, %v6423_v39  }
 0x156   : > { %5278 = vmatpush3.bf16.msra.mxu0 %v1123_v16  ;;  %v9291_v16 = vld [vmem:[#allocation15_spill] sm:$0xff] }
 0x157   : > { %5279 = vmatprep.subr.bf16.mxu0 %v1101_v61  ;;  %v1006_v38 = vsel %vm471_vm0, %v9291_v16, %v9290_v17  ;;  %vm1898_vm0 = vcmask 523264  }
 0x158   : > { %5298 = vmatpush3.bf16.msra.mxu1 %v1127_v48  ;;  %v974_v48 = vsel %vm6528_vm13, %v9292_v46, %v9289_v51 }
 0x159   : > { %5299 = vmatprep.subr.bf16.mxu1 %v1102_v26  ;;  %5252 = vmatmul.mubr.msk.bf16.gmra.mxu0 %vm1213_vm12, %v6577_v32 }
 0x15a   : > { %5280 = vmatpush3.bf16.msra.mxu0 %v1101_v61  ;;  %5287 = vmatprep.mubr.msk.bf16.mxu0 %vm1213_vm12, %v6296_v10  ;;  %v975_v61 = vsel %vm6528_vm13, %v9293_v25, %v9291_v16 }
 0x15b   : > { %5272 = vmatmul.mubr.msk.bf16.gmra.mxu1 %vm1213_vm12, %v6577_v32  ;;  %5281 = vmatprep.subr.bf16.mxu0 %v1058_v63 }
 0x15c   : > { %5300 = vmatpush3.bf16.msra.mxu1 %v1102_v26  ;;  %5307 = vmatprep.mubr.msk.bf16.mxu1 %vm1213_vm12, %v6296_v10  ;;  %v5724_v26 = vmov 7  }
 0x15d   : > { %5301 = vmatprep.subr.bf16.mxu1 %v1059_v45 }
 0x15e   : > { %5282 = vmatpush3.bf16.msra.mxu0 %v1058_v63  ;;  %v5726_v63 = vmov 17  }
 0x15f   : > { %5283 = vmatprep.subr.bf16.mxu0 %v1015_v55 }
 0x160   : > { %5302 = vmatpush3.bf16.msra.mxu1 %v1059_v45  ;;  %v5728_v45 = vmov 3  }
 0x161   : > { %5303 = vmatprep.subr.bf16.mxu1 %v1016_v21 }
 0x162   : > { %5284 = vmatpush3.bf16.msra.mxu0 %v1015_v55  ;;  %v6824_v55 = vpop.permute.xlu0 %1155 }
 0x163   : > { %5285 = vmatprep.subr.bf16.mxu0 %v972_v40 }
 0x164   : > { %5304 = vmatpush3.bf16.msra.mxu1 %v1016_v21 }
 0x165   : > { %5305 = vmatprep.subr.bf16.mxu1 %v973_v3 }
 0x166   : > { %5286 = vmatpush3.bf16.msra.mxu0 %v972_v40  ;;  %v6828_v7 = vpop.permute.xlu0 %1170 }
 0x167   : > { %5315 = vmatprep.subr.bf16.mxu0 %v1630_v24 }
 0x168   : > { %5306 = vmatpush3.bf16.msra.mxu1 %v973_v3 }
 0x169   : > { %5288 = vmatmul.mubr.msk.bf16.vlgmr.msra.gmra.mxu0 %vm1213_vm12, %v6549_v22  ;;  %5335 = vmatprep.subr.bf16.mxu1 %v1697_v41 }
 0x16a   : > { %5316 = vmatpush3.bf16.msra.mxu0 %v1630_v24  ;;  %5291 = vmatprep.mubr.msk.bf16.mxu0 %vm1213_vm12, %v6555_v11 }
 0x16b   : > { %5308 = vmatmul.mubr.msk.bf16.vlgmr.msra.gmra.mxu1 %vm1213_vm12, %v6549_v22  ;;  %5317 = vmatprep.subr.bf16.mxu0 %v1131_v12 }
 0x16c   : > { %5336 = vmatpush3.bf16.msra.mxu1 %v1697_v41  ;;  %5311 = vmatprep.mubr.msk.bf16.mxu1 %vm1213_vm12, %v6555_v11 }
 0x16d   : > { %5337 = vmatprep.subr.bf16.mxu1 %v1135_v34 }
 0x16e   : > { %5318 = vmatpush3.bf16.msra.mxu0 %v1131_v12 }
 0x16f   : > { %5319 = vmatprep.subr.bf16.mxu0 %v1103_v4 }
 0x170   : > { %5338 = vmatpush3.bf16.msra.mxu1 %v1135_v34 }
 0x171   : > { %5339 = vmatprep.subr.bf16.mxu1 %v1104_v36  ;;  %5292 = vmatmul.mubr.msk.bf16.gmra.mxu0 %vm1213_vm12, %v6577_v32 }
 0x172   : > { %5320 = vmatpush3.bf16.msra.mxu0 %v1103_v4  ;;  %5327 = vmatprep.mubr.msk.bf16.mxu0 %vm1213_vm12, %v6296_v10 }
 0x173   : > { %5312 = vmatmul.mubr.msk.bf16.gmra.mxu1 %vm1213_vm12, %v6577_v32  ;;  %5321 = vmatprep.subr.bf16.mxu0 %v1060_v1 }
 0x174   : > { %5340 = vmatpush3.bf16.msra.mxu1 %v1104_v36  ;;  %5347 = vmatprep.mubr.msk.bf16.mxu1 %vm1213_vm12, %v6296_v10  ;;  %v1018_v10 = vsel %vm6511_vm9, %v1006_v38, %v9287_v44 }
 0x175   : > { %5341 = vmatprep.subr.bf16.mxu1 %v1061_v43 }
 0x176   : > { %5322 = vmatpush3.bf16.msra.mxu0 %v1060_v1 }
 0x177   : > { %5323 = vmatprep.subr.bf16.mxu0 %v1017_v9 }
 0x178   : > { %5342 = vmatpush3.bf16.msra.mxu1 %v1061_v43 }
 0x179   : > { %5343 = vmatprep.subr.bf16.mxu1 %v1018_v10 }
 0x17a   : > { %5324 = vmatpush3.bf16.msra.mxu0 %v1017_v9 }
 0x17b   : > { %5325 = vmatprep.subr.bf16.mxu0 %v974_v48 }
 0x17c   : > { %5344 = vmatpush3.bf16.msra.mxu1 %v1018_v10 }
 0x17d   : > { %5345 = vmatprep.subr.bf16.mxu1 %v975_v61 }
 0x17e   : > { %5326 = vmatpush3.bf16.msra.mxu0 %v974_v48 }
 0x180   : > { %5346 = vmatpush3.bf16.msra.mxu1 %v975_v61 }
 0x181   : > { %5328 = vmatmul.mubr.msk.bf16.vlgmr.msra.gmra.mxu0 %vm1213_vm12, %v6549_v22 }
 0x182   : > { %5331 = vmatprep.mubr.msk.bf16.mxu0 %vm1213_vm12, %v6555_v11 }
 0x183   : > { %5348 = vmatmul.mubr.msk.bf16.vlgmr.msra.gmra.mxu1 %vm1213_vm12, %v6549_v22  ;;  %v6788_v22 = vld [vmem:[%s9156_s3] sm:$0xff]  }
 0x184   : > { %5351 = vmatprep.mubr.msk.bf16.mxu1 %vm1213_vm12, %v6555_v11  ;;  %v5722_v11 = vmov 21  }
 0x185   : > { %5578 = vset.pattern.permute.xlu1 %v5722_v11  ;;  %5579 = vset.pattern.permute.xlu0 %v5722_v11 }
 0x186   : > { %3026 = vperm.xlu1 %5578, %v6407_v27   ;;  %3030 = vperm.xlu0 %5579, %v6412_v28  }
 0x189   : > { %5332 = vmatmul.mubr.msk.bf16.gmra.mxu0 %vm1213_vm12, %v6577_v32 }
 0x18a   : > { %5363 = vmatprep.mubr.msk.bf16.mxu0 %vm1898_vm0, %v6788_v22  ;;  %3034 = vperm.xlu1 %5578, %v6423_v39  }
 0x18b   : > { %5352 = vmatmul.mubr.msk.bf16.gmra.mxu1 %vm1213_vm12, %v6577_v32  ;;  %v5723_v32 = vmov 2   ;;  %vm4892_vm12 = vcmask 1043459  }
 0x18c   : > { %5375 = vmatprep.mubr.msk.bf16.mxu1 %vm1898_vm0, %v6788_v22  ;;  %5580 = vset.pattern.permute.xlu0 %v5723_v32 }
 0x18d   : > { %3138 = vperm.xlu0 %5580, %v6407_v27  }
 0x18e   : > { %3038 = vperm.xlu1 %5578, %v6428_v47  }
 0x191   : > { %3150 = vperm.xlu0 %5580, %v6428_v47  }
 0x192   : > { %5581 = vset.pattern.permute.xlu1 %v5723_v32 }
 0x193   : > { %3142 = vperm.xlu1 %5581, %v6412_v28  }
 0x195   : > { %5583 = vset.pattern.permute.xlu0 %v5724_v26 }
 0x196   : > { %3254 = vperm.xlu0 %5583, %v6412_v28  }
 0x197   : > { %3146 = vperm.xlu1 %5581, %v6423_v39  }
 0x19a   : > { %5584 = vset.pattern.permute.xlu0 %v5725_v50 }
 0x19b   : > { %5582 = vset.pattern.permute.xlu1 %v5724_v26  ;;  %3362 = vperm.xlu0 %5584, %v6407_v27  }
 0x19c   : > { %3250 = vperm.xlu1 %5582, %v6407_v27  }
 0x19f   : > { %3374 = vperm.xlu0 %5584, %v6428_v47  }
 0x1a0   : > { %3258 = vperm.xlu1 %5582, %v6423_v39  }
 0x1a3   : > { %5587 = vset.pattern.permute.xlu0 %v5726_v63 }
 0x1a4   : > { %3262 = vperm.xlu1 %5582, %v6428_v47   ;;  %3478 = vperm.xlu0 %5587, %v6412_v28  }
 0x1a8   : > { %5585 = vset.pattern.permute.xlu1 %v5725_v50  ;;  %5588 = vset.pattern.permute.xlu0 %v5727_v0 }
 0x1a9   : > { %3366 = vperm.xlu1 %5585, %v6412_v28   ;;  %3586 = vperm.xlu0 %5588, %v6407_v27  }
 0x1ad   : > { %3370 = vperm.xlu1 %5585, %v6423_v39   ;;  %3598 = vperm.xlu0 %5588, %v6428_v47  }
 0x1b1   : > { %5586 = vset.pattern.permute.xlu1 %v5726_v63  ;;  %5591 = vset.pattern.permute.xlu0 %v5728_v45 }
 0x1b2   : > { %3474 = vperm.xlu1 %5586, %v6407_v27   ;;  %3702 = vperm.xlu0 %5591, %v6412_v28  }
 0x1b6   : > { %3482 = vperm.xlu1 %5586, %v6423_v39  }
 0x1ba   : > { %3486 = vperm.xlu1 %5586, %v6428_v47  }
 0x1be   : > { %5589 = vset.pattern.permute.xlu1 %v5727_v0 }
 0x1bf   : > { %3590 = vperm.xlu1 %5589, %v6412_v28   ;;  %v6832_v28 = vpop.permute.xlu0 %1180 }
 0x1c3   : > { %3594 = vperm.xlu1 %5589, %v6423_v39   ;;  %v6837_v13 = vpop.permute.xlu0 %1190 }
 0x1c7   : > { %5590 = vset.pattern.permute.xlu1 %v5728_v45 }
 0x1c8   : > { %3698 = vperm.xlu1 %5590, %v6407_v27  }
 0x1cc   : > { %3706 = vperm.xlu1 %5590, %v6423_v39   ;;  %v6834_v39 = vpop.permute.xlu1 %1185 }
 0x1d0   : > { %3710 = vperm.xlu1 %5590, %v6428_v47   ;;  %v6839_v20 = vpop.permute.xlu1 %1870 }
 0x1d4   : > { %v6850_v56 = vpop.permute.xlu1 %1880 }
 0x1d8   : > { %v6857_v11 = vpop.permute.xlu1 %2335 }
 0x1d9   : > { %9294 = vst [vmem:[#allocation10_spill] sm:$0xff] %v6857_v11 }
 0x1f9   : > { %v5209_v21 = vpop.f32.mrf.mxu0 }
 0x1fa   : > { %v1273_v53 = vadd.f32 %v5209_v21, %v6826_v37 }
 0x1fb   : > { %v5229_v35 = vpop.f32.mrf.mxu1  ;;  %v1264_v59 = vpop.f32.mrf.mxu0 }
 0x1fc   : > { %v1340_v9 = vadd.f32 %v5229_v35, %v6826_v37  ;;  %v1766_v25 = vmax.f32 %v1273_v53, 0.0  ;;  %v1265_v61 = vadd.f32 %v1264_v59, %v6824_v55 }
 0x1fd   : > { %v1331_v27 = vpop.f32.mrf.mxu1  ;;  %v5210_v40 = vpop.f32.mrf.mxu0 }
 0x1fe   : > { %v1276_v29 = vadd.f32 %v5210_v40, %v6828_v7  ;;  %v1774_v32 = vmax.f32 %v1340_v9, 0.0  ;;  %v1332_v26 = vadd.f32 %v1331_v27, %v6824_v55  ;;  %v1764_v45 = vmax.f32 %v1265_v61, 0.0  ;;  %v6862_v27 = vpop.permute.xlu1 %2345 }
 0x1ff   : > { %v5230_v47 = vpop.f32.mrf.mxu1  ;;  %v1267_v24 = vpop.f32.mrf.mxu0  ;;  %9295 = vst [vmem:[#allocation13_spill] sm:$0xff] %v6862_v27 }
 0x200   : > { %v1343_v14 = vadd.f32 %v5230_v47, %v6828_v7  ;;  %v1767_v17 = vmax.f32 %v1276_v29, 0.0  ;;  %v1268_v16 = vadd.f32 %v1267_v24, %v6822_v33  ;;  %v1772_v47 = vmax.f32 %v1332_v26, 0.0 }
 0x201   : > { %v1334_v15 = vpop.f32.mrf.mxu1  ;;  %v5213_v52 = vpop.f32.mrf.mxu0 }
 0x202   : > { %v1289_v3 = vadd.f32 %v5213_v52, %v6834_v39  ;;  %v1775_v6 = vmax.f32 %v1343_v14, 0.0  ;;  %v1335_v19 = vadd.f32 %v1334_v15, %v6822_v33  ;;  %v1833_v50 = vpack.c.bf16 %v1767_v17, %v1766_v25 }
 0x203   : > { %v5233_v41 = vpop.f32.mrf.mxu1  ;;  %v1280_v18 = vpop.f32.mrf.mxu0  ;;  %v1765_v63 = vmax.f32 %v1268_v16, 0.0 }
 0x204   : > { %v1356_v12 = vadd.f32 %v5233_v41, %v6834_v39  ;;  %v1281_v60 = vadd.f32 %v1280_v18, %v6830_v49  ;;  %v1770_v8 = vmax.f32 %v1289_v3, 0.0  ;;  %v1837_v21 = vpack.c.bf16 %v1775_v6, %v1774_v32 }
 0x205   : > { %v1347_v2 = vpop.f32.mrf.mxu1  ;;  %v5214_v34 = vpop.f32.mrf.mxu0  ;;  %v1773_v35 = vmax.f32 %v1335_v19, 0.0  ;;  %v1832_v24 = vpack.c.bf16 %v1765_v63, %v1764_v45 }
 0x206   : > { %v1292_v58 = vadd.f32 %v5214_v34, %v6837_v13  ;;  %v1348_v62 = vadd.f32 %v1347_v2, %v6830_v49  ;;  %v1778_v1 = vmax.f32 %v1356_v12, 0.0  ;;  %v1768_v57 = vmax.f32 %v1281_v60, 0.0  ;;  %v6867_v12 = vld [vmem:[%s9156_s3 + $0x8] sm:$0xff]   ;;  %v6869_v34 = vpop.permute.xlu1 %2386 }
 0x207   : > { %v5234_v4 = vpop.f32.mrf.mxu1  ;;  %v1283_v30 = vpop.f32.mrf.mxu0  ;;  %v1836_v3 = vpack.c.bf16 %v1773_v35, %v1772_v47  ;;  %9296 = vst [vmem:[#allocation6_spill] sm:$0xff] %v6869_v34 }
 0x208   : > { %v1771_v54 = vmax.f32 %v1292_v58, 0.0  ;;  %v1359_v36 = vadd.f32 %v5234_v4, %v6837_v13  ;;  %v1284_v42 = vadd.f32 %v1283_v30, %v6832_v28  ;;  %v1776_v38 = vmax.f32 %v1348_v62, 0.0 }
 0x209   : > { %v1350_v44 = vpop.f32.mrf.mxu1 }
 0x20a   : > { %v1835_v43 = vpack.c.bf16 %v1771_v54, %v1770_v8  ;;  %v1779_v5 = vmax.f32 %v1359_v36, 0.0  ;;  %v1769_v51 = vmax.f32 %v1284_v42, 0.0  ;;  %v1351_v23 = vadd.f32 %v1350_v44, %v6832_v28 }
 0x20c   : > { %v1839_v10 = vpack.c.bf16 %v1779_v5, %v1778_v1  ;;  %v1834_v46 = vpack.c.bf16 %v1769_v51, %v1768_v57  ;;  %v1777_v48 = vmax.f32 %v1351_v23, 0.0  ;;  %5355 = vmatprep.subr.bf16.mxu0 %v1835_v43  ;;  %v6887_v51 = vpop.permute.xlu1 %2394 }
 0x20d   : > { %5356 = vmatpush3.bf16.msra.mxu0 %v1835_v43  ;;  %9297 = vst [vmem:[#allocation7_spill] sm:$0xff] %v6887_v51 }
 0x20e   : > { %v1838_v31 = vpack.c.bf16 %v1777_v48, %v1776_v38  ;;  %5367 = vmatprep.subr.bf16.mxu1 %v1839_v10  ;;  %5357 = vmatprep.subr.bf16.mxu0 %v1834_v46 }
 0x20f   : > { %5368 = vmatpush3.bf16.msra.mxu1 %v1839_v10 }
 0x210   : > { %5369 = vmatprep.subr.bf16.mxu1 %v1838_v31  ;;  %v6896_v47 = vpop.permute.xlu1 %2398 }
 0x211   : > { %v5249_v0 = vpop.f32.mrf.mxu0  ;;  %5358 = vmatpush3.bf16.msra.mxu0 %v1834_v46  ;;  %9298 = vst [vmem:[#allocation24_spill] sm:$0xff] %v6896_v47 }
 0x212   : > { %5359 = vmatprep.subr.bf16.mxu0 %v1833_v50  ;;  %v1407_v23 = vadd.f32 %v5249_v0, %v6826_v37 }
 0x213   : > { %v5269_v59 = vpop.f32.mrf.mxu1  ;;  %5370 = vmatpush3.bf16.msra.mxu1 %v1838_v31  ;;  %v1398_v40 = vpop.f32.mrf.mxu0 }
 0x214   : > { %5371 = vmatprep.subr.bf16.mxu1 %v1837_v21  ;;  %v1474_v61 = vadd.f32 %v5269_v59, %v6826_v37  ;;  %v1782_v63 = vmax.f32 %v1407_v23, 0.0  ;;  %v1399_v0 = vadd.f32 %v1398_v40, %v6824_v55 }
 0x215   : > { %v6860_v15 = vpop.f32.mrf.mxu1  ;;  %v5250_v52 = vpop.f32.mrf.mxu0  ;;  %5360 = vmatpush3.bf16.msra.mxu0 %v1833_v50 }
 0x216   : > { %5361 = vmatprep.subr.bf16.mxu0 %v1832_v24  ;;  %v1410_v42 = vadd.f32 %v5250_v52, %v6828_v7  ;;  %v1790_v59 = vmax.f32 %v1474_v61, 0.0 }
 0x217   : > { %v5270_v41 = vpop.f32.mrf.mxu1  ;;  %5372 = vmatpush3.bf16.msra.mxu1 %v1837_v21  ;;  %v1401_v18 = vpop.f32.mrf.mxu0 }
 0x218   : > { %5373 = vmatprep.subr.bf16.mxu1 %v1836_v3  ;;  %v1477_v9 = vadd.f32 %v5270_v41, %v6828_v7  ;;  %v1783_v6 = vmax.f32 %v1410_v42, 0.0  ;;  %v1402_v19 = vadd.f32 %v1401_v18, %v6822_v33  ;;  %v1780_v18 = vmax.f32 %v1399_v0, 0.0 }
 0x219   : > { %v1468_v60 = vpop.f32.mrf.mxu1  ;;  %v5253_v2 = vpop.f32.mrf.mxu0  ;;  %5362 = vmatpush3.bf16.msra.mxu0 %v1832_v24  ;;  %v1466_v24 = vadd.f32 %v6860_v15, %v6824_v55 }
 0x21a   : > { %v1423_v58 = vadd.f32 %v5253_v2, %v6834_v39  ;;  %v1791_v45 = vmax.f32 %v1477_v9, 0.0  ;;  %v1469_v21 = vadd.f32 %v1468_v60, %v6822_v33  ;;  %v1841_v52 = vpack.c.bf16 %v1783_v6, %v1782_v63  ;;  %v6900_v60 = vpop.permute.xlu1 %2438 }
 0x21b   : > { %v5273_v29 = vpop.f32.mrf.mxu1  ;;  %5374 = vmatpush3.bf16.msra.mxu1 %v1836_v3  ;;  %v1414_v8 = vpop.f32.mrf.mxu0  ;;  %v1781_v3 = vmax.f32 %v1402_v19, 0.0  ;;  %9299 = vst [vmem:[#allocation25_spill] sm:$0xff] %v6900_v60 }
 0x21c   : > { %5364 = vmatmul.mubr.msk.bf16.vlgmr.msra.gmra.mxu0 %vm1898_vm0, %v6867_v12  ;;  %v1490_v4 = vadd.f32 %v5273_v29, %v6834_v39  ;;  %v1415_v30 = vadd.f32 %v1414_v8, %v6830_v49  ;;  %v1786_v53 = vmax.f32 %v1423_v58, 0.0  ;;  %v1845_v40 = vpack.c.bf16 %v1791_v45, %v1790_v59 }
 0x21d   : > { %v1481_v62 = vpop.f32.mrf.mxu1  ;;  %v5254_v54 = vpop.f32.mrf.mxu0  ;;  %5387 = vmatprep.mubr.msk.bf16.mxu0 %vm1898_vm0, %v6788_v22  ;;  %v1789_v2 = vmax.f32 %v1469_v21, 0.0  ;;  %v1788_v8 = vmax.f32 %v1466_v24, 0.0 }
 0x21e   : > { %v1426_v36 = vadd.f32 %v5254_v54, %v6837_v13  ;;  %5376 = vmatmul.mubr.msk.bf16.vlgmr.msra.gmra.mxu1 %vm1898_vm0, %v6867_v12  ;;  %v1482_v57 = vadd.f32 %v1481_v62, %v6830_v49  ;;  %v1794_v17 = vmax.f32 %v1490_v4, 0.0  ;;  %v1784_v16 = vmax.f32 %v1415_v30, 0.0  ;;  %v6904_v42 = vpop.permute.xlu1 %2442 }
 0x21f   : > { %v5274_v14 = vpop.f32.mrf.mxu1  ;;  %v1417_v1 = vpop.f32.mrf.mxu0  ;;  %5399 = vmatprep.mubr.msk.bf16.mxu1 %vm1898_vm0, %v6788_v22  ;;  %v1840_v4 = vpack.c.bf16 %v1781_v3, %v1780_v18  ;;  %v1844_v62 = vpack.c.bf16 %v1789_v2, %v1788_v8  ;;  %9300 = vst [vmem:[#allocation26_spill] sm:$0xff] %v6904_v42 }
 0x220   : > { %v1787_v44 = vmax.f32 %v1426_v36, 0.0  ;;  %v1493_v43 = vadd.f32 %v5274_v14, %v6837_v13  ;;  %v1418_v5 = vadd.f32 %v1417_v1, %v6832_v28  ;;  %v1792_v31 = vmax.f32 %v1482_v57, 0.0 }
 0x221   : > { %v1484_v38 = vpop.f32.mrf.mxu1 }
 0x222   : > { %v1843_v10 = vpack.c.bf16 %v1787_v44, %v1786_v53  ;;  %v1795_v46 = vmax.f32 %v1493_v43, 0.0  ;;  %v1785_v48 = vmax.f32 %v1418_v5, 0.0  ;;  %v1485_v25 = vadd.f32 %v1484_v38, %v6832_v28 }
 0x224   : > { %v1847_v32 = vpack.c.bf16 %v1795_v46, %v1794_v17  ;;  %v1842_v26 = vpack.c.bf16 %v1785_v48, %v1784_v16  ;;  %v1793_v50 = vmax.f32 %v1485_v25, 0.0  ;;  %5379 = vmatprep.subr.bf16.mxu0 %v1843_v10  ;;  %v6916_v16 = vpop.permute.xlu1 %2482 }
 0x225   : > { %5380 = vmatpush3.bf16.msra.mxu0 %v1843_v10  ;;  %9301 = vst [vmem:[#allocation22_spill] sm:$0xff] %v6916_v16 }
 0x226   : > { %v1846_v35 = vpack.c.bf16 %v1793_v50, %v1792_v31  ;;  %5391 = vmatprep.subr.bf16.mxu1 %v1847_v32  ;;  %5381 = vmatprep.subr.bf16.mxu0 %v1842_v26 }
 0x227   : > { %5392 = vmatpush3.bf16.msra.mxu1 %v1847_v32 }
 0x228   : > { %5393 = vmatprep.subr.bf16.mxu1 %v1846_v35 }
 0x229   : > { %v5289_v41 = vpop.f32.mrf.mxu0  ;;  %5382 = vmatpush3.bf16.msra.mxu0 %v1842_v26 }
 0x22a   : > { %5383 = vmatprep.subr.bf16.mxu0 %v1841_v52  ;;  %v1541_v31 = vadd.f32 %v5289_v41, %v6826_v37  ;;  %v6929_v41 = vpop.permute.xlu1 %2490 }
 0x22b   : > { %v5309_v58 = vpop.f32.mrf.mxu1  ;;  %5394 = vmatpush3.bf16.msra.mxu1 %v1846_v35  ;;  %v1532_v29 = vpop.f32.mrf.mxu0  ;;  %9302 = vst [vmem:[#allocation20_spill] sm:$0xff] %v6929_v41 }
 0x22c   : > { %5395 = vmatprep.subr.bf16.mxu1 %v1845_v40  ;;  %v1608_v59 = vadd.f32 %v5309_v58, %v6826_v37  ;;  %v1798_v8 = vmax.f32 %v1541_v31, 0.0 }
 0x22d   : > { %v6902_v30 = vpop.f32.mrf.mxu1  ;;  %v5290_v15 = vpop.f32.mrf.mxu0  ;;  %5384 = vmatpush3.bf16.msra.mxu0 %v1841_v52 }
 0x22e   : > { %5385 = vmatprep.subr.bf16.mxu0 %v1840_v4  ;;  %v1544_v38 = vadd.f32 %v5290_v15, %v6828_v7  ;;  %v1806_v58 = vmax.f32 %v1608_v59, 0.0 }
 0x22f   : > { %v5310_v54 = vpop.f32.mrf.mxu1  ;;  %5396 = vmatpush3.bf16.msra.mxu1 %v1845_v40  ;;  %v1535_v36 = vpop.f32.mrf.mxu0 }
 0x230   : > { %5397 = vmatprep.subr.bf16.mxu1 %v1844_v62  ;;  %v1611_v32 = vadd.f32 %v5310_v54, %v6828_v7  ;;  %v1799_v24 = vmax.f32 %v1544_v38, 0.0  ;;  %v1536_v52 = vadd.f32 %v1535_v36, %v6822_v33  ;;  %v1600_v36 = vadd.f32 %v6902_v30, %v6824_v55 }
 0x231   : > { %v1602_v53 = vpop.f32.mrf.mxu1  ;;  %v5293_v14 = vpop.f32.mrf.mxu0  ;;  %5386 = vmatpush3.bf16.msra.mxu0 %v1840_v4  ;;  %v1533_v4 = vadd.f32 %v1532_v29, %v6824_v55 }
 0x232   : > { %v1557_v1 = vadd.f32 %v5293_v14, %v6834_v39  ;;  %v1807_v15 = vmax.f32 %v1611_v32, 0.0  ;;  %v1849_v14 = vpack.c.bf16 %v1799_v24, %v1798_v8  ;;  %v6935_v29 = vpop.permute.xlu1 %2494 }
 0x233   : > { %v5313_v57 = vpop.f32.mrf.mxu1  ;;  %5398 = vmatpush3.bf16.msra.mxu1 %v1844_v62  ;;  %v1548_v44 = vpop.f32.mrf.mxu0  ;;  %v1603_v62 = vadd.f32 %v1602_v53, %v6822_v33  ;;  %9303 = vst [vmem:[#allocation23_spill] sm:$0xff] %v6935_v29 }
 0x234   : > { %5388 = vmatmul.mubr.msk.bf16.vlgmr.msra.gmra.mxu0 %vm1898_vm0, %v6867_v12  ;;  %v1624_v43 = vadd.f32 %v5313_v57, %v6834_v39  ;;  %v1549_v5 = vadd.f32 %v1548_v44, %v6830_v49  ;;  %v1802_v10 = vmax.f32 %v1557_v1, 0.0  ;;  %v1797_v1 = vmax.f32 %v1536_v52, 0.0 }
 0x235   : > { %v1615_v23 = vpop.f32.mrf.mxu1  ;;  %v5294_v9 = vpop.f32.mrf.mxu0  ;;  %5411 = vmatprep.mubr.msk.bf16.mxu0 %vm1898_vm0, %v6788_v22  ;;  %v1796_v44 = vmax.f32 %v1533_v4, 0.0 }
 0x236   : > { %v1560_v17 = vadd.f32 %v5294_v9, %v6837_v13  ;;  %5400 = vmatmul.mubr.msk.bf16.vlgmr.msra.gmra.mxu1 %vm1898_vm0, %v6867_v12  ;;  %v1616_v25 = vadd.f32 %v1615_v23, %v6830_v49  ;;  %v1810_v26 = vmax.f32 %v1624_v43, 0.0  ;;  %v1800_v50 = vmax.f32 %v1549_v5, 0.0 }
 0x237   : > { %v5314_v46 = vpop.f32.mrf.mxu1  ;;  %v1551_v48 = vpop.f32.mrf.mxu0  ;;  %5423 = vmatprep.mubr.msk.bf16.mxu1 %vm1898_vm0, %v6788_v22  ;;  %v1853_v43 = vpack.c.bf16 %v1807_v15, %v1806_v58  ;;  %v1805_v5 = vmax.f32 %v1603_v62, 0.0  ;;  %v1804_v9 = vmax.f32 %v1600_v36, 0.0 }
 0x238   : > { %v1803_v61 = vmax.f32 %v1560_v17, 0.0  ;;  %v1627_v6 = vadd.f32 %v5314_v46, %v6837_v13  ;;  %v1552_v19 = vadd.f32 %v1551_v48, %v6832_v28  ;;  %v1808_v3 = vmax.f32 %v1616_v25, 0.0  ;;  %v6939_v46 = vpop.permute.xlu1 %2534 }
 0x239   : > { %v1618_v63 = vpop.f32.mrf.mxu1  ;;  %v1848_v17 = vpack.c.bf16 %v1797_v1, %v1796_v44  ;;  %9304 = vst [vmem:[#allocation21_spill] sm:$0xff] %v6939_v46 }
 0x23a   : > { %v1851_v0 = vpack.c.bf16 %v1803_v61, %v1802_v10  ;;  %v1811_v45 = vmax.f32 %v1627_v6, 0.0  ;;  %v1801_v21 = vmax.f32 %v1552_v19, 0.0  ;;  %v1619_v35 = vadd.f32 %v1618_v63, %v6832_v28 }
 0x23b   : > { %v1852_v10 = vpack.c.bf16 %v1805_v5, %v1804_v9 }
 0x23c   : > { %v1855_v18 = vpack.c.bf16 %v1811_v45, %v1810_v26  ;;  %v1850_v40 = vpack.c.bf16 %v1801_v21, %v1800_v50  ;;  %v1809_v2 = vmax.f32 %v1619_v35, 0.0  ;;  %5403 = vmatprep.subr.bf16.mxu0 %v1851_v0  ;;  %v6944_v26 = vpop.permute.xlu1 %2538 }
 0x23d   : > { %5404 = vmatpush3.bf16.msra.mxu0 %v1851_v0  ;;  %9305 = vst [vmem:[#allocation18_spill] sm:$0xff] %v6944_v26 }
 0x23e   : > { %v1854_v54 = vpack.c.bf16 %v1809_v2, %v1808_v3  ;;  %5415 = vmatprep.subr.bf16.mxu1 %v1855_v18  ;;  %5405 = vmatprep.subr.bf16.mxu0 %v1850_v40 }
 0x23f   : > { %5416 = vmatpush3.bf16.msra.mxu1 %v1855_v18 }
 0x240   : > { %5417 = vmatprep.subr.bf16.mxu1 %v1854_v54 }
 0x241   : > { %v5329_v57 = vpop.f32.mrf.mxu0  ;;  %5406 = vmatpush3.bf16.msra.mxu0 %v1850_v40 }
 0x242   : > { %5407 = vmatprep.subr.bf16.mxu0 %v1849_v14  ;;  %v1675_v2 = vadd.f32 %v5329_v57, %v6826_v37 }
 0x243   : > { %v5349_v53 = vpop.f32.mrf.mxu1  ;;  %5418 = vmatpush3.bf16.msra.mxu1 %v1854_v54  ;;  %v1666_v23 = vpop.f32.mrf.mxu0 }
 0x244   : > { %5419 = vmatprep.subr.bf16.mxu1 %v1853_v43  ;;  %v1667_v9 = vadd.f32 %v1666_v23, %v6824_v55 }
 0x245   : > { %v6937_v38 = vpop.f32.mrf.mxu1  ;;  %v5330_v30 = vpop.f32.mrf.mxu0  ;;  %5408 = vmatpush3.bf16.msra.mxu0 %v1849_v14 }
 0x246   : > { %5409 = vmatprep.subr.bf16.mxu0 %v1848_v17  ;;  %v1678_v35 = vadd.f32 %v5330_v30, %v6828_v7 }
 0x247   : > { %v5350_v48 = vpop.f32.mrf.mxu1  ;;  %5420 = vmatpush3.bf16.msra.mxu1 %v1853_v43  ;;  %v1669_v25 = vpop.f32.mrf.mxu0 }
 0x248   : > { %5421 = vmatprep.subr.bf16.mxu1 %v1852_v10  ;;  %v1745_v8 = vadd.f32 %v5350_v48, %v6828_v7  ;;  %v1670_v1 = vadd.f32 %v1669_v25, %v6822_v33  ;;  %v1814_v7 = vmax.f32 %v1675_v2, 0.0 }
 0x249   : > { %v1736_v61 = vpop.f32.mrf.mxu1  ;;  %v5333_v6 = vpop.f32.mrf.mxu0  ;;  %5410 = vmatpush3.bf16.msra.mxu0 %v1848_v17 }
 0x24a   : > { %v1691_v19 = vadd.f32 %v5333_v6, %v6834_v39  ;;  %v1823_v17 = vmax.f32 %v1745_v8, 0.0  ;;  %v1737_v30 = vadd.f32 %v1736_v61, %v6822_v33  ;;  %v1813_v48 = vmax.f32 %v1670_v1, 0.0 }
 0x24b   : > { %v5353_v31 = vpop.f32.mrf.mxu1  ;;  %5422 = vmatpush3.bf16.msra.mxu1 %v1852_v10  ;;  %v1682_v32 = vpop.f32.mrf.mxu0  ;;  %v1812_v6 = vmax.f32 %v1667_v9, 0.0 }
 0x24c   : > { %5412 = vmatmul.mubr.msk.bf16.vlgmr.msra.gmra.mxu0 %vm1898_vm0, %v6867_v12  ;;  %v1758_v50 = vadd.f32 %v5353_v31, %v6834_v39  ;;  %v1683_v63 = vadd.f32 %v1682_v32, %v6830_v49  ;;  %v1818_v59 = vmax.f32 %v1691_v19, 0.0  ;;  %v1821_v23 = vmax.f32 %v1737_v30, 0.0 }
 0x24d   : > { %v1749_v0 = vpop.f32.mrf.mxu1  ;;  %v5334_v45 = vpop.f32.mrf.mxu0  ;;  %5435 = vmatprep.mubr.msk.bf16.mxu0 %vm1898_vm0, %v6788_v22  ;;  %v1856_v61 = vpack.c.bf16 %v1813_v48, %v1812_v6 }
 0x24e   : > { %v1694_v21 = vadd.f32 %v5334_v45, %v6837_v13  ;;  %5424 = vmatmul.mubr.msk.bf16.vlgmr.msra.gmra.mxu1 %vm1898_vm0, %v6867_v12  ;;  %v1750_v39 = vadd.f32 %v1749_v0, %v6830_v49  ;;  %v1826_v4 = vmax.f32 %v1758_v50, 0.0  ;;  %v1816_v15 = vmax.f32 %v1683_v63, 0.0  ;;  %v6986_v0 = vpop.permute.xlu0 %1875 }
 0x24f   : > { %v5354_v24 = vpop.f32.mrf.mxu1  ;;  %v1685_v52 = vpop.f32.mrf.mxu0  ;;  %5447 = vmatprep.mubr.msk.bf16.mxu1 %vm1898_vm0, %v6788_v22  ;;  %v1742_v22 = vadd.f32 %v5349_v53, %v6826_v37  ;;  %v1815_v49 = vmax.f32 %v1678_v35, 0.0  ;;  %v1734_v53 = vadd.f32 %v6937_v38, %v6824_v55 }
 0x250   : > { %v1819_v3 = vmax.f32 %v1694_v21, 0.0  ;;  %v1761_v18 = vadd.f32 %v5354_v24, %v6837_v13  ;;  %v1686_v40 = vadd.f32 %v1685_v52, %v6832_v28  ;;  %v6964_v13 = vpop.permute.xlu1 %2578  ;;  %v1824_v44 = vmax.f32 %v1750_v39, 0.0 }
 0x251   : > { %v1752_v62 = vpop.f32.mrf.mxu1  ;;  %v1822_v37 = vmax.f32 %v1742_v22, 0.0  ;;  %v1857_v10 = vpack.c.bf16 %v1815_v49, %v1814_v7  ;;  %v1820_v33 = vmax.f32 %v1734_v53, 0.0 }
 0x252   : > { %v1859_v54 = vpack.c.bf16 %v1819_v3, %v1818_v59  ;;  %v1827_v58 = vmax.f32 %v1761_v18, 0.0  ;;  %v1817_v36 = vmax.f32 %v1686_v40, 0.0  ;;  %v1753_v14 = vadd.f32 %v1752_v62, %v6832_v28  ;;  %v6992_v35 = vpop.permute.xlu0 %1885 }
 0x253   : > { %v1861_v19 = vpack.c.bf16 %v1823_v17, %v1822_v37  ;;  %v1860_v31 = vpack.c.bf16 %v1821_v23, %v1820_v33 }
 0x254   : > { %v1863_v43 = vpack.c.bf16 %v1827_v58, %v1826_v4  ;;  %v1858_v57 = vpack.c.bf16 %v1817_v36, %v1816_v15  ;;  %v1825_v5 = vmax.f32 %v1753_v14, 0.0  ;;  %5427 = vmatprep.subr.bf16.mxu0 %v1859_v54  ;;  %v6970_v25 = vpop.permute.xlu1 %2586 }
 0x255   : > { %5428 = vmatpush3.bf16.msra.mxu0 %v1859_v54 }
 0x256   : > { %v1862_v28 = vpack.c.bf16 %v1825_v5, %v1824_v44  ;;  %5439 = vmatprep.subr.bf16.mxu1 %v1863_v43  ;;  %5429 = vmatprep.subr.bf16.mxu0 %v1858_v57  ;;  %v6996_v24 = vpop.permute.xlu0 %2340 }
 0x257   : > { %5440 = vmatpush3.bf16.msra.mxu1 %v1863_v43  ;;  %9306 = vst [vmem:[#allocation16_spill] sm:$0xff] %v6996_v24 }
 0x258   : > { %5441 = vmatprep.subr.bf16.mxu1 %v1862_v28  ;;  %v6972_v32 = vpop.permute.xlu1 %2590 }
 0x259   : > { %5430 = vmatpush3.bf16.msra.mxu0 %v1858_v57 }
 0x25a   : > { %5431 = vmatprep.subr.bf16.mxu0 %v1857_v10 }
 0x25b   : > { %5442 = vmatpush3.bf16.msra.mxu1 %v1862_v28 }
 0x25c   : > { %5443 = vmatprep.subr.bf16.mxu1 %v1861_v19  ;;  %v6974_v55 = vpop.permute.xlu1 %2694 }
 0x25d   : > { %5432 = vmatpush3.bf16.msra.mxu0 %v1857_v10 }
 0x25e   : > { %5433 = vmatprep.subr.bf16.mxu0 %v1856_v61 }
 0x25f   : > { %5444 = vmatpush3.bf16.msra.mxu1 %v1861_v19 }
 0x260   : > { %5445 = vmatprep.subr.bf16.mxu1 %v1860_v31  ;;  %v6980_v38 = vpop.permute.xlu1 %2698 }
 0x261   : > { %5434 = vmatpush3.bf16.msra.mxu0 %v1856_v61 }
 0x263   : > { %5446 = vmatpush3.bf16.msra.mxu1 %v1860_v31 }
 0x264   : > { %5436 = vmatmul.mubr.msk.bf16.vlgmr.msra.gmra.mxu0 %vm1898_vm0, %v6867_v12  ;;  %v6982_v50 = vpop.permute.xlu1 %2802 }
 0x266   : > { %5448 = vmatmul.mubr.msk.bf16.vlgmr.msra.gmra.mxu1 %vm1898_vm0, %v6867_v12  ;;  %v7000_v12 = vpop.permute.xlu0 %2350 }
 0x267   : > { %9307 = vst [vmem:[#allocation19_spill] sm:$0xff] %v7000_v12 }
 0x268   : > { %v6984_v63 = vpop.permute.xlu1 %2810 }
 0x26a   : > { %v7002_v39 = vpop.permute.xlu0 %2390 }
 0x26b   : > { %9308 = vst [vmem:[#allocation17_spill] sm:$0xff] %v7002_v39 }
 0x26c   : > { %v6988_v45 = vpop.permute.xlu1 %2814 }
 0x26e   : > { %v7006_v18 = vpop.permute.xlu0 %2434 }
 0x26f   : > { %9309 = vst [vmem:[#allocation12_spill] sm:$0xff] %v7006_v18 }
 0x270   : > { %v6990_v21 = vpop.permute.xlu1 %2918 }
 0x272   : > { %v7012_v8 = vpop.permute.xlu0 %2446 }
 0x273   : > { %9310 = vst [vmem:[#allocation14_spill] sm:$0xff] %v7012_v8 }
 0x274   : > { %v6994_v59 = vpop.permute.xlu1 %2922 }
 0x276   : > { %v7016_v15 = vpop.permute.xlu0 %2486 }
 0x277   : > { %9311 = vst [vmem:[#allocation11_spill] sm:$0xff] %v7016_v15 }
 0x278   : > { %v6998_v52 = vpop.permute.xlu1 %3026 }
 0x27a   : > { %v7020_v54 = vpop.permute.xlu0 %2530 }
 0x27b   : > { %9312 = vst [vmem:[#allocation15_spill] sm:$0xff] %v7020_v54 }
 0x27c   : > { %v7004_v3 = vpop.permute.xlu1 %3034 }
 0x27e   : > { %v7024_v36 = vpop.permute.xlu0 %2542 }
 0x27f   : > { %9313 = vst [vmem:[#allocation9_spill] sm:$0xff] %v7024_v36 }
 0x280   : > { %v7008_v40 = vpop.permute.xlu1 %3038 }
 0x282   : > { %v7028_v22 = vpop.permute.xlu0 %2582 }
 0x284   : > { %v7010_v2 = vpop.permute.xlu1 %3142 }
 0x286   : > { %v7032_v1 = vpop.permute.xlu0 %2690 }
 0x288   : > { %v7014_v4 = vpop.permute.xlu1 %3146 }
 0x28a   : > { %v7036_v43 = vpop.permute.xlu0 %2702 }
 0x28c   : > { %v7018_v62 = vpop.permute.xlu1 %3250 }
 0x28e   : > { %v7040_v5 = vpop.permute.xlu0 %2806 }
 0x290   : > { %v7022_v58 = vpop.permute.xlu1 %3258 }
 0x292   : > { %v7044_v9 = vpop.permute.xlu0 %2914 }
 0x294   : > { %v7026_v14 = vpop.permute.xlu1 %3262 }
 0x296   : > { %v7048_v30 = vpop.permute.xlu0 %2926 }
 0x298   : > { %v7030_v49 = vpop.permute.xlu1 %3366 }
 0x29a   : > { %v7052_v37 = vpop.permute.xlu0 %3030 }
 0x29c   : > { %v7034_v44 = vpop.permute.xlu1 %3370 }
 0x29e   : > { %v7057_v19 = vpop.permute.xlu0 %3138 }
 0x2a0   : > { %v7038_v57 = vpop.permute.xlu1 %3474 }
 0x2a4   : > { %v7042_v7 = vpop.permute.xlu1 %3482 }
 0x2a8   : > { %v7046_v17 = vpop.permute.xlu1 %3486 }
 0x2ac   : > { %v7050_v28 = vpop.permute.xlu1 %3590 }
 0x2b0   : > { %v7054_v53 = vpop.permute.xlu1 %3594 }
 0x2b4   : > { %v7059_v23 = vpop.permute.xlu1 %3698 }
 0x2b8   : > { %v7074_v36 = vpop.permute.xlu1 %3706 }
 0x2bc   : > { %v7130_v34 = vpop.permute.xlu1 %3710 }
 0x2dc   : > { %v5365_v10 = vpop.f32.mrf.mxu0 }
 0x2dd   : > { %v1948_v48 = vadd.f32 %v5365_v10, %v6850_v56  ;;  %v7072_v10 = vpop.permute.xlu0 %3150 }
 0x2de   : > { %v5377_v6 = vpop.f32.mrf.mxu1  ;;  %v1939_v16 = vpop.f32.mrf.mxu0 }
 0x2df   : > { %v7061_v33 = vmax.f32 %v1948_v48, 0.0  ;;  %v1997_v61 = vadd.f32 %v5377_v6, %v6850_v56  ;;  %v1940_v48 = vadd.f32 %v1939_v16, %v6839_v20 }
 0x2e0   : > { %v1988_v15 = vpop.f32.mrf.mxu1 }
 0x2e1   : > { %9314 = vst [vmem:[#allocation8_spill] sm:$0xff] %v7061_v33  ;;  %v7064_v31 = vmax.f32 %v1997_v61, 0.0  ;;  %v3155_v54 = vmul.f32 %v7014_v4, %v7061_v33  ;;  %v2595_v46 = vmul.f32 %v6970_v25, %v7061_v33  ;;  %v3715_v61 = vmul.f32 %v7074_v36, %v7061_v33  ;;  %v7090_v18 = vpop.permute.xlu0 %3254 }
 0x2e3   : > { %9315 = vst [vmem:[#allocation27_spill] sm:$0xff] %v7064_v31  ;;  %3189 = vrot.lane.b32.xlu1 %v3155_v54, %s5705_s21  ;;  %2629 = vrot.lane.b32.xlu0 %v2595_v46, %s5706_s22  ;;  %v2707_v6 = vmul.f32 %v6980_v38, %v7064_v31  ;;  %v7083_v54 = vmax.f32 %v1940_v48, 0.0  ;;  %v1989_v46 = vadd.f32 %v1988_v15, %v6839_v20 }
 0x2e4   : > { %v3159_v60 = vmul.f32 %v7014_v4, %v7064_v31  ;;  %v2599_v16 = vmul.f32 %v6970_v25, %v7064_v31  ;;  %v3267_v48 = vmul.f32 %v7022_v58, %v7064_v31 }
 0x2e5   : > { %9316 = vst [vmem:[#allocation28_spill] sm:$0xff] %v7083_v54  ;;  %v7094_v29 = vmax.f32 %v1989_v46, 0.0  ;;  %v3153_v15 = vmul.f32 %v7057_v19, %v7083_v54 }
 0x2e7   : > { %2741 = vrot.lane.b32.xlu1 %v2707_v6, %s5706_s22  ;;  %3749 = vrot.lane.b32.xlu0 %v3715_v61, %s5707_s23  ;;  %9317 = vst [vmem:[#allocation29_spill] sm:$0xff] %v7094_v29  ;;  %v5366_v6 = vpop.f32.mrf.mxu0  ;;  %v7102_v61 = vpop.permute.xlu0 %3362  ;;  %v2705_v46 = vmul.f32 %v7032_v1, %v7094_v29 }
 0x2e8   : > { %v1951_v39 = vadd.f32 %v5366_v6, %v6992_v35  ;;  %v5378_v6 = vpop.f32.mrf.mxu1 }
 0x2e9   : > { %v2000_v11 = vadd.f32 %v5378_v6, %v6992_v35 }
 0x2eb   : > { %3197 = vrot.lane.b32.xlu1 %v3159_v60, %s5705_s21  ;;  %2637 = vrot.lane.b32.xlu0 %v2599_v16, %s5706_s22  ;;  %v3719_v60 = vmul.f32 %v7074_v36, %v7064_v31  ;;  %v7111_v16 = vmax.f32 %v1951_v39, 0.0  ;;  %v7117_v24 = vpop.permute.xlu0 %3374  ;;  %v3713_v39 = vmul.f32 %v7059_v23, %v7083_v54  ;;  %v7132_v8 = vmax.f32 %v2000_v11, 0.0  ;;  %v1942_v11 = vpop.f32.mrf.mxu0 }
 0x2ec   : > { %v1943_v47 = vadd.f32 %v1942_v11, %v6986_v0  ;;  %v1991_v11 = vpop.f32.mrf.mxu1 }
 0x2ed   : > { %9318 = vst [vmem:[#allocation30_spill] sm:$0xff] %v7111_v16  ;;  %v2600_v6 = vmul.f32 %v6972_v32, %v7132_v8  ;;  %v1992_v41 = vadd.f32 %v1991_v11, %v6986_v0 }
 0x2ee   : > { %v7157_v26 = vmax.f32 %v1943_v47, 0.0  ;;  %v2708_v47 = vmul.f32 %v7036_v43, %v7132_v8 }
 0x2ef   : > { %3301 = vrot.lane.b32.xlu0 %v3267_v48, %s5705_s21  ;;  %3185 = vrot.lane.b32.xlu1 %v3153_v15, %s5705_s21  ;;  %v3157_v48 = vmul.f32 %v7057_v19, %v7094_v29  ;;  %v2593_v15 = vmul.f32 %v6964_v13, %v7083_v54  ;;  %v7174_v42 = vmax.f32 %v1992_v41, 0.0 }
 0x2f1   : > { %v2598_v11 = vmul.f32 %v7028_v22, %v7174_v42 }
 0x2f3   : > { %3757 = vrot.lane.b32.xlu0 %v3719_v60, %s5707_s23  ;;  %2737 = vrot.lane.b32.xlu1 %v2705_v46, %s5706_s22  ;;  %v2596_v60 = vmul.f32 %v6972_v32, %v7111_v16  ;;  %v7128_v46 = vpop.permute.xlu0 %3478 }
 0x2f4   : > { %v5389_v27 = vpop.f32.mrf.mxu0 }
 0x2f5   : > { %v2046_v41 = vadd.f32 %v5389_v27, %v6850_v56 }
 0x2f7   : > { %3193 = vrot.lane.b32.xlu1 %v3157_v48, %s5705_s21  ;;  %2625 = vrot.lane.b32.xlu0 %v2593_v15, %s5706_s22  ;;  %v3716_v48 = vmul.f32 %v7130_v34, %v7111_v16  ;;  %v2597_v15 = vmul.f32 %v6964_v13, %v7094_v29 }
 0x2fb   : > { %2631 = vrot.lane.b32.xlu1 %v2596_v60, %s5706_s22  ;;  %3745 = vrot.lane.b32.xlu0 %v3713_v39, %s5707_s23  ;;  %v3265_v60 = vmul.f32 %v7018_v62, %v7094_v29  ;;  %v7144_v39 = vpop.permute.xlu0 %3586 }
 0x2ff   : > { %3751 = vrot.lane.b32.xlu1 %v3716_v48, %s5707_s23  ;;  %2633 = vrot.lane.b32.xlu0 %v2597_v15, %s5706_s22  ;;  %v3268_v48 = vmul.f32 %v7026_v14, %v7132_v8  ;;  %v3717_v15 = vmul.f32 %v7059_v23, %v7094_v29  ;;  %v7155_v12 = vpop.permute.xlu0 %3598 }
 0x303   : > { %2639 = vrot.lane.b32.xlu1 %v2600_v6, %s5706_s22  ;;  %3297 = vrot.lane.b32.xlu0 %v3265_v60, %s5705_s21  ;;  %v3720_v6 = vmul.f32 %v7130_v34, %v7132_v8  ;;  %v3156_v60 = vmul.f32 %v7072_v10, %v7111_v16 }
 0x307   : > { %3303 = vrot.lane.b32.xlu1 %v3268_v48, %s5705_s21  ;;  %3753 = vrot.lane.b32.xlu0 %v3717_v15, %s5707_s23  ;;  %v2594_v48 = vmul.f32 %v7028_v22, %v7157_v26  ;;  %v7170_v15 = vpop.permute.xlu0 %3702 }
 0x308   : > { %v3718_v51 = vmul.f32 %v7170_v15, %v7174_v42 }
 0x30b   : > { %3759 = vrot.lane.b32.xlu1 %v3720_v6, %s5707_s23  ;;  %3191 = vrot.lane.b32.xlu0 %v3156_v60, %s5705_s21  ;;  %v3714_v6 = vmul.f32 %v7170_v15, %v7157_v26  ;;  %v3160_v60 = vmul.f32 %v7072_v10, %v7132_v8 }
 0x30f   : > { %2627 = vrot.lane.b32.xlu1 %v2594_v48, %s5706_s22  ;;  %2743 = vrot.lane.b32.xlu0 %v2708_v47, %s5706_s22  ;;  %v3154_v48 = vmul.f32 %v7010_v2, %v7157_v26  ;;  %v3266_v47 = vmul.f32 %v7090_v18, %v7174_v42 }
 0x313   : > { %3747 = vrot.lane.b32.xlu1 %v3714_v6, %s5707_s23  ;;  %3199 = vrot.lane.b32.xlu0 %v3160_v60, %s5705_s21  ;;  %v2706_v6 = vmul.f32 %v6974_v55, %v7174_v42  ;;  %v7195_v60 = vmax.f32 %v2046_v41, 0.0 }
 0x315   : > { %9319 = vst [vmem:[#allocation31_spill] sm:$0xff] %v7195_v60  ;;  %v2711_v27 = vmul.f32 %v6980_v38, %v7195_v60  ;;  %v3379_v16 = vmul.f32 %v7034_v44, %v7195_v60 }
 0x317   : > { %2635 = vrot.lane.b32.xlu1 %v2598_v11, %s5706_s22  ;;  %3187 = vrot.lane.b32.xlu0 %v3154_v48, %s5705_s21  ;;  %v3158_v11 = vmul.f32 %v7010_v2, %v7174_v42  ;;  %v2603_v48 = vmul.f32 %v6970_v25, %v7195_v60 }
 0x31b   : > { %3299 = vrot.lane.b32.xlu1 %v3266_v47, %s5705_s21  ;;  %2739 = vrot.lane.b32.xlu0 %v2706_v6, %s5706_s22  ;;  %v5401_v47 = vpop.f32.mrf.mxu1  ;;  %v3163_v6 = vmul.f32 %v7014_v4, %v7195_v60 }
 0x31c   : > { %v2095_v41 = vadd.f32 %v5401_v47, %v6850_v56  ;;  %v3723_v47 = vmul.f32 %v7074_v36, %v7195_v60 }
 0x31f   : > { %3755 = vrot.lane.b32.xlu1 %v3718_v51, %s5707_s23  ;;  %3195 = vrot.lane.b32.xlu0 %v3158_v11, %s5705_s21  ;;  %v2819_v51 = vmul.f32 %v6984_v63, %v7195_v60  ;;  %v7216_v11 = vmax.f32 %v2095_v41, 0.0 }
 0x321   : > { %9320 = vst [vmem:[#allocation32_spill] sm:$0xff] %v7216_v11  ;;  %v2931_v41 = vmul.f32 %v6994_v59, %v7216_v11 }
 0x323   : > { %2749 = vrot.lane.b32.xlu1 %v2711_v27, %s5706_s22  ;;  %2645 = vrot.lane.b32.xlu0 %v2603_v48, %s5706_s22  ;;  %v3271_v27 = vmul.f32 %v7022_v58, %v7195_v60  ;;  %v2715_v48 = vmul.f32 %v6980_v38, %v7216_v11 }
 0x327   : > { %3205 = vrot.lane.b32.xlu1 %v3163_v6, %s5705_s21  ;;  %2853 = vrot.lane.b32.xlu0 %v2819_v51, %s5706_s22  ;;  %v2607_v6 = vmul.f32 %v6970_v25, %v7216_v11  ;;  %v2037_v51 = vpop.f32.mrf.mxu0  ;;  %v3383_v25 = vmul.f32 %v7034_v44, %v7216_v11 }
 0x32b   : > { %3413 = vrot.lane.b32.xlu1 %v3379_v16, %s5705_s21  ;;  %3309 = vrot.lane.b32.xlu0 %v3271_v27, %s5705_s21  ;;  %v2038_v16 = vadd.f32 %v2037_v51, %v6839_v20  ;;  %v3167_v27 = vmul.f32 %v7014_v4, %v7216_v11  ;;  %v2086_v51 = vpop.f32.mrf.mxu1 }
 0x32f   : > { %2757 = vrot.lane.b32.xlu1 %v2715_v48, %s5706_s22  ;;  %3765 = vrot.lane.b32.xlu0 %v3723_v47, %s5707_s23  ;;  %v2823_v48 = vmul.f32 %v6984_v63, %v7216_v11  ;;  %v7243_v47 = vmax.f32 %v2038_v16, 0.0  ;;  %v2087_v16 = vadd.f32 %v2086_v51, %v6839_v20 }
 0x331   : > { %9321 = vst [vmem:[#allocation33_spill] sm:$0xff] %v7243_v47  ;;  %v2709_v4 = vmul.f32 %v7032_v1, %v7243_v47 }
 0x333   : > { %2965 = vrot.lane.b32.xlu1 %v2931_v41, %s5706_s22  ;;  %2653 = vrot.lane.b32.xlu0 %v2607_v6, %s5706_s22  ;;  %v3275_v41 = vmul.f32 %v7022_v58, %v7216_v11  ;;  %v3491_v6 = vmul.f32 %v7042_v7, %v7216_v11 }
 0x337   : > { %3213 = vrot.lane.b32.xlu1 %v3167_v27, %s5705_s21  ;;  %2861 = vrot.lane.b32.xlu0 %v2823_v48, %s5706_s22  ;;  %v3161_v27 = vmul.f32 %v7057_v19, %v7243_v47  ;;  %v3727_v48 = vmul.f32 %v7074_v36, %v7216_v11  ;;  %v2817_v36 = vmul.f32 %v6982_v50, %v7243_v47 }
 0x33b   : > { %3421 = vrot.lane.b32.xlu1 %v3383_v25, %s5705_s21  ;;  %3317 = vrot.lane.b32.xlu0 %v3275_v41, %s5705_s21  ;;  %v7264_v25 = vmax.f32 %v2087_v16, 0.0  ;;  %v3377_v41 = vmul.f32 %v7102_v61, %v7243_v47  ;;  %v3269_v16 = vmul.f32 %v7018_v62, %v7243_v47 }
 0x33d   : > { %v2929_v51 = vmul.f32 %v7044_v9, %v7264_v25 }
 0x33f   : > { %2745 = vrot.lane.b32.xlu1 %v2709_v4, %s5706_s22  ;;  %3525 = vrot.lane.b32.xlu0 %v3491_v6, %s5705_s21  ;;  %v2601_v4 = vmul.f32 %v6964_v13, %v7243_v47  ;;  %v2713_v6 = vmul.f32 %v7032_v1, %v7264_v25 }
 0x343   : > { %3201 = vrot.lane.b32.xlu1 %v3161_v27, %s5705_s21  ;;  %3773 = vrot.lane.b32.xlu0 %v3727_v48, %s5707_s23  ;;  %v5390_v27 = vpop.f32.mrf.mxu0 }
 0x344   : > { %v2049_v48 = vadd.f32 %v5390_v27, %v6992_v35 }
 0x347   : > { %3409 = vrot.lane.b32.xlu1 %v3377_v41, %s5705_s21  ;;  %2641 = vrot.lane.b32.xlu0 %v2601_v4, %s5706_s22  ;;  %v3165_v41 = vmul.f32 %v7057_v19, %v7264_v25  ;;  %v3721_v4 = vmul.f32 %v7059_v23, %v7243_v47 }
 0x34b   : > { %2753 = vrot.lane.b32.xlu1 %v2713_v6, %s5706_s22  ;;  %2849 = vrot.lane.b32.xlu0 %v2817_v36, %s5706_s22  ;;  %v7291_v6 = vmax.f32 %v2049_v48, 0.0 }
 0x34d   : > { %v2604_v48 = vmul.f32 %v6972_v32, %v7291_v6 }
 0x34f   : > { %2961 = vrot.lane.b32.xlu1 %v2929_v51, %s5706_s22  ;;  %3305 = vrot.lane.b32.xlu0 %v3269_v16, %s5705_s21  ;;  %v3381_v51 = vmul.f32 %v7102_v61, %v7264_v25  ;;  %v2605_v16 = vmul.f32 %v6964_v13, %v7264_v25 }
 0x353   : > { %3209 = vrot.lane.b32.xlu1 %v3165_v41, %s5705_s21  ;;  %3761 = vrot.lane.b32.xlu0 %v3721_v4, %s5707_s23  ;;  %v2821_v41 = vmul.f32 %v6982_v50, %v7264_v25 }
 0x355   : > { %v7293_v36 = vpop.permute.xlu1 %3189  ;;  %v7295_v33 = vpop.permute.xlu0 %2629 }
 0x356   : > { %9322 = vst [vmem:[#allocation34_spill] sm:$0xff] %v7293_v36  ;;  %9323 = vst [vmem:[#allocation35_spill] sm:$0xff] %v7295_v33  ;;  %v3489_v33 = vmul.f32 %v7038_v57, %v7264_v25 }
 0x357   : > { %3417 = vrot.lane.b32.xlu1 %v3381_v51, %s5705_s21  ;;  %2649 = vrot.lane.b32.xlu0 %v2605_v16, %s5706_s22  ;;  %v2820_v51 = vmul.f32 %v6988_v45, %v7291_v6  ;;  %v3273_v16 = vmul.f32 %v7018_v62, %v7264_v25 }
 0x359   : > { %v7303_v19 = vpop.permute.xlu1 %2741  ;;  %v7305_v27 = vpop.permute.xlu0 %3749 }
 0x35a   : > { %9324 = vst [vmem:[#allocation36_spill] sm:$0xff] %v7303_v19  ;;  %9325 = vst [vmem:[#allocation37_spill] sm:$0xff] %v7305_v27  ;;  %v5402_v27 = vpop.f32.mrf.mxu1  ;;  %v3272_v19 = vmul.f32 %v7026_v14, %v7291_v6 }
 0x35b   : > { %2647 = vrot.lane.b32.xlu1 %v2604_v48, %s5706_s22  ;;  %2857 = vrot.lane.b32.xlu0 %v2821_v41, %s5706_s22  ;;  %v2098_v36 = vadd.f32 %v5402_v27, %v6992_v35  ;;  %v3724_v27 = vmul.f32 %v7130_v34, %v7291_v6 }
 0x35d   : > { %v7313_v4 = vpop.permute.xlu1 %3197  ;;  %v7315_v13 = vpop.permute.xlu0 %2637 }
 0x35e   : > { %9326 = vst [vmem:[#allocation38_spill] sm:$0xff] %v7313_v4  ;;  %9327 = vst [vmem:[#allocation39_spill] sm:$0xff] %v7315_v13  ;;  %v7334_v4 = vmax.f32 %v2098_v36, 0.0  ;;  %v2712_v36 = vmul.f32 %v7036_v43, %v7291_v6 }
 0x35f   : > { %2855 = vrot.lane.b32.xlu1 %v2820_v51, %s5706_s22  ;;  %3313 = vrot.lane.b32.xlu0 %v3273_v16, %s5705_s21 }
 0x361   : > { %v7324_v48 = vpop.permute.xlu0 %3301  ;;  %v7326_v41 = vpop.permute.xlu1 %3185 }
 0x362   : > { %9328 = vst [vmem:[#allocation40_spill] sm:$0xff] %v7324_v48  ;;  %9329 = vst [vmem:[#allocation41_spill] sm:$0xff] %v7326_v41  ;;  %v3725_v48 = vmul.f32 %v7059_v23, %v7264_v25 }
 0x363   : > { %3311 = vrot.lane.b32.xlu1 %v3272_v19, %s5705_s21  ;;  %3521 = vrot.lane.b32.xlu0 %v3489_v33, %s5705_s21  ;;  %v2608_v33 = vmul.f32 %v6972_v32, %v7334_v4 }
 0x365   : > { %v7336_v51 = vpop.permute.xlu0 %3757  ;;  %v7338_v16 = vpop.permute.xlu1 %2737 }
 0x366   : > { %9330 = vst [vmem:[#allocation42_spill] sm:$0xff] %v7336_v51  ;;  %9331 = vst [vmem:[#allocation43_spill] sm:$0xff] %v7338_v16 }
 0x367   : > { %3767 = vrot.lane.b32.xlu1 %v3724_v27, %s5707_s23  ;;  %3769 = vrot.lane.b32.xlu0 %v3725_v48, %s5707_s23  ;;  %v2824_v48 = vmul.f32 %v6988_v45, %v7334_v4  ;;  %v3164_v27 = vmul.f32 %v7072_v10, %v7291_v6 }
 0x369   : > { %v7346_v41 = vpop.permute.xlu1 %3193  ;;  %v7348_v19 = vpop.permute.xlu0 %2625 }
 0x36a   : > { %9332 = vst [vmem:[#allocation44_spill] sm:$0xff] %v7346_v41  ;;  %9333 = vst [vmem:[#allocation45_spill] sm:$0xff] %v7348_v19  ;;  %v2716_v41 = vmul.f32 %v7036_v43, %v7334_v4 }
 0x36b   : > { %2655 = vrot.lane.b32.xlu1 %v2608_v33, %s5706_s22  ;;  %2751 = vrot.lane.b32.xlu0 %v2712_v36, %s5706_s22  ;;  %v3276_v33 = vmul.f32 %v7026_v14, %v7334_v4  ;;  %v3380_v36 = vmul.f32 %v7117_v24, %v7291_v6 }
 0x36d   : > { %v7356_v16 = vpop.permute.xlu1 %2631  ;;  %v7358_v23 = vpop.permute.xlu0 %3745 }
 0x36e   : > { %9334 = vst [vmem:[#allocation46_spill] sm:$0xff] %v7356_v16  ;;  %9335 = vst [vmem:[#allocation47_spill] sm:$0xff] %v7358_v23  ;;  %v2040_v23 = vpop.f32.mrf.mxu0 }
 0x36f   : > { %2863 = vrot.lane.b32.xlu1 %v2824_v48, %s5706_s22  ;;  %3207 = vrot.lane.b32.xlu0 %v3164_v27, %s5705_s21  ;;  %v2041_v51 = vadd.f32 %v2040_v23, %v6986_v0  ;;  %v3728_v23 = vmul.f32 %v7130_v34, %v7334_v4 }
 0x371   : > { %v7366_v32 = vpop.permute.xlu1 %3751  ;;  %v7368_v19 = vpop.permute.xlu0 %2633  ;;  %v7387_v13 = vmax.f32 %v2041_v51, 0.0  ;;  %v3168_v51 = vmul.f32 %v7072_v10, %v7334_v4 }
 0x372   : > { %9336 = vst [vmem:[#allocation48_spill] sm:$0xff] %v7366_v32  ;;  %9337 = vst [vmem:[#allocation49_spill] sm:$0xff] %v7368_v19  ;;  %v3492_v32 = vmul.f32 %v7046_v17, %v7334_v4 }
 0x373   : > { %3319 = vrot.lane.b32.xlu1 %v3276_v33, %s5705_s21  ;;  %3415 = vrot.lane.b32.xlu0 %v3380_v36, %s5705_s21 }
 0x375   : > { %v7377_v48 = vpop.permute.xlu1 %2639  ;;  %v7379_v27 = vpop.permute.xlu0 %3297 }
 0x376   : > { %9338 = vst [vmem:[#allocation50_spill] sm:$0xff] %v7377_v48  ;;  %9339 = vst [vmem:[#allocation51_spill] sm:$0xff] %v7379_v27  ;;  %v2932_v27 = vmul.f32 %v7048_v30, %v7334_v4 }
 0x377   : > { %3527 = vrot.lane.b32.xlu1 %v3492_v32, %s5705_s21  ;;  %2759 = vrot.lane.b32.xlu0 %v2716_v41, %s5706_s22  ;;  %v2602_v41 = vmul.f32 %v7028_v22, %v7387_v13 }
 0x379   : > { %v7389_v33 = vpop.permute.xlu1 %3303  ;;  %v7391_v36 = vpop.permute.xlu0 %3753 }
 0x37a   : > { %9340 = vst [vmem:[#allocation52_spill] sm:$0xff] %v7389_v33  ;;  %9341 = vst [vmem:[#allocation53_spill] sm:$0xff] %v7391_v36  ;;  %v3270_v33 = vmul.f32 %v7090_v18, %v7387_v13 }
 0x37b   : > { %3775 = vrot.lane.b32.xlu1 %v3728_v23, %s5707_s23  ;;  %2967 = vrot.lane.b32.xlu0 %v2932_v27, %s5706_s22  ;;  %v2818_v27 = vmul.f32 %v7040_v5, %v7387_v13  ;;  %v3384_v23 = vmul.f32 %v7117_v24, %v7334_v4 }
 0x37d   : > { %v7399_v48 = vpop.permute.xlu1 %3759  ;;  %v7401_v32 = vpop.permute.xlu0 %3191 }
 0x37e   : > { %9342 = vst [vmem:[#allocation54_spill] sm:$0xff] %v7399_v48  ;;  %9343 = vst [vmem:[#allocation55_spill] sm:$0xff] %v7401_v32  ;;  %v2089_v48 = vpop.f32.mrf.mxu1  ;;  %v2710_v32 = vmul.f32 %v6974_v55, %v7387_v13 }
 0x37f   : > { %2643 = vrot.lane.b32.xlu1 %v2602_v41, %s5706_s22  ;;  %3215 = vrot.lane.b32.xlu0 %v3168_v51, %s5705_s21  ;;  %v2090_v10 = vadd.f32 %v2089_v48, %v6986_v0  ;;  %v3722_v48 = vmul.f32 %v7170_v15, %v7387_v13 }
 0x381   : > { %v7409_v34 = vpop.permute.xlu1 %2627  ;;  %v7411_v36 = vpop.permute.xlu0 %2743 }
 0x382   : > { %9344 = vst [vmem:[#allocation56_spill] sm:$0xff] %v7411_v36  ;;  %v7430_v36 = vmax.f32 %v2090_v10, 0.0  ;;  %v3378_v10 = vmul.f32 %v7030_v49, %v7387_v13 }
 0x383   : > { %2851 = vrot.lane.b32.xlu1 %v2818_v27, %s5706_s22  ;;  %3423 = vrot.lane.b32.xlu0 %v3384_v23, %s5705_s21 }
 0x385   : > { %v7420_v41 = vpop.permute.xlu1 %3747  ;;  %v7422_v51 = vpop.permute.xlu0 %3199 }
 0x386   : > { %9345 = vst [vmem:[#allocation57_spill] sm:$0xff] %v7420_v41  ;;  %9346 = vst [vmem:[#allocation58_spill] sm:$0xff] %v7422_v51  ;;  %v3162_v41 = vmul.f32 %v7010_v2, %v7387_v13 }
 0x387   : > { %3307 = vrot.lane.b32.xlu1 %v3270_v33, %s5705_s21  ;;  %2747 = vrot.lane.b32.xlu0 %v2710_v32, %s5706_s22  ;;  %v2606_v32 = vmul.f32 %v7028_v22, %v7430_v36 }
 0x389   : > { %v7432_v27 = vpop.permute.xlu1 %2635  ;;  %v7434_v23 = vpop.permute.xlu0 %3187 }
 0x38a   : > { %9347 = vst [vmem:[#allocation59_spill] sm:$0xff] %v7432_v27  ;;  %9348 = vst [vmem:[#allocation60_spill] sm:$0xff] %v7434_v23 }
 0x38b   : > { %3763 = vrot.lane.b32.xlu1 %v3722_v48, %s5707_s23  ;;  %3203 = vrot.lane.b32.xlu0 %v3162_v41, %s5705_s21  ;;  %v2822_v41 = vmul.f32 %v7040_v5, %v7430_v36  ;;  %v2714_v48 = vmul.f32 %v6974_v55, %v7430_v36 }
 0x38d   : > { %v7442_v51 = vpop.permute.xlu1 %3299  ;;  %v7444_v33 = vpop.permute.xlu0 %2739 }
 0x38e   : > { %9349 = vst [vmem:[#allocation61_spill] sm:$0xff] %v7442_v51 }
 0x38f   : > { %2651 = vrot.lane.b32.xlu1 %v2606_v32, %s5706_s22  ;;  %3411 = vrot.lane.b32.xlu0 %v3378_v10, %s5705_s21  ;;  %v3274_v32 = vmul.f32 %v7090_v18, %v7430_v36  ;;  %v2930_v10 = vmul.f32 %v6990_v21, %v7430_v36 }
 0x391   : > { %v7452_v23 = vpop.permute.xlu1 %3755  ;;  %v7454_v27 = vpop.permute.xlu0 %3195 }
 0x392   : > { %9350 = vst [vmem:[#allocation62_spill] sm:$0xff] %v7452_v23  ;;  %9351 = vst [vmem:[#allocation63_spill] sm:$0xff] %v7454_v27  ;;  %v5413_v23 = vpop.f32.mrf.mxu0 }
 0x393   : > { %2859 = vrot.lane.b32.xlu1 %v2822_v41, %s5706_s22  ;;  %2755 = vrot.lane.b32.xlu0 %v2714_v48, %s5706_s22  ;;  %v2144_v27 = vadd.f32 %v5413_v23, %v6850_v56  ;;  %v3726_v23 = vmul.f32 %v7170_v15, %v7430_v36 }
 0x395   : > { %v7462_v22 = vpop.permute.xlu1 %2749  ;;  %v7464_v51 = vpop.permute.xlu0 %2645  ;;  %v7483_v19 = vmax.f32 %v2144_v27, 0.0 }
 0x396   : > { %9352 = vst [vmem:[#allocation64_spill] sm:$0xff] %v7462_v22  ;;  %9353 = vst [vmem:[#allocation65_spill] sm:$0xff] %v7464_v51  ;;  %v3490_v51 = vmul.f32 %v7128_v46, %v7430_v36  ;;  %v3166_v22 = vmul.f32 %v7010_v2, %v7430_v36 }
 0x397   : > { %3315 = vrot.lane.b32.xlu1 %v3274_v32, %s5705_s21  ;;  %2963 = vrot.lane.b32.xlu0 %v2930_v10, %s5706_s22  ;;  %9356 = vst [vmem:[#allocation68_spill] sm:$0xff] %v7483_v19  ;;  %v2719_v27 = vmul.f32 %v6980_v38, %v7483_v19 }
 0x399   : > { %v7473_v41 = vpop.permute.xlu1 %3205  ;;  %v7475_v48 = vpop.permute.xlu0 %2853 }
 0x39a   : > { %9354 = vst [vmem:[#allocation66_spill] sm:$0xff] %v7473_v41  ;;  %9355 = vst [vmem:[#allocation67_spill] sm:$0xff] %v7475_v48  ;;  %v3382_v48 = vmul.f32 %v7030_v49, %v7430_v36  ;;  %v3279_v41 = vmul.f32 %v7022_v58, %v7483_v19 }
 0x39b   : > { %3523 = vrot.lane.b32.xlu1 %v3490_v51, %s5705_s21  ;;  %3211 = vrot.lane.b32.xlu0 %v3166_v22, %s5705_s21  ;;  %v2827_v22 = vmul.f32 %v6984_v63, %v7483_v19 }
 0x39d   : > { %v7485_v32 = vpop.permute.xlu1 %3413  ;;  %v7487_v10 = vpop.permute.xlu0 %3309 }
 0x39e   : > { %9357 = vst [vmem:[#allocation69_spill] sm:$0xff] %v7485_v32  ;;  %9358 = vst [vmem:[#allocation70_spill] sm:$0xff] %v7487_v10 }
 0x39f   : > { %3771 = vrot.lane.b32.xlu1 %v3726_v23, %s5707_s23  ;;  %3419 = vrot.lane.b32.xlu0 %v3382_v48, %s5705_s21  ;;  %v2935_v48 = vmul.f32 %v6994_v59, %v7483_v19  ;;  %v3043_v23 = vmul.f32 %v7004_v3, %v7483_v19 }
 0x3a1   : > { %v7495_v2 = vpop.permute.xlu1 %2757  ;;  %v7497_v51 = vpop.permute.xlu0 %3765 }
 0x3a2   : > { %9359 = vst [vmem:[#allocation71_spill] sm:$0xff] %v7495_v2  ;;  %9360 = vst [vmem:[#allocation72_spill] sm:$0xff] %v7497_v51  ;;  %v5425_v51 = vpop.f32.mrf.mxu1  ;;  %v3495_v2 = vmul.f32 %v7042_v7, %v7483_v19 }
 0x3a3   : > { %2765 = vrot.lane.b32.xlu1 %v2719_v27, %s5706_s22  ;;  %2869 = vrot.lane.b32.xlu0 %v2827_v22, %s5706_s22  ;;  %v2193_v38 = vadd.f32 %v5425_v51, %v6850_v56  ;;  %v3603_v51 = vmul.f32 %v7054_v53, %v7483_v19 }
 0x3a5   : > { %v7505_v15 = vpop.permute.xlu1 %2965  ;;  %v7507_v32 = vpop.permute.xlu0 %2653  ;;  %v7526_v10 = vmax.f32 %v2193_v38, 0.0 }
 0x3a6   : > { %9361 = vst [vmem:[#allocation73_spill] sm:$0xff] %v7505_v15  ;;  %v3387_v15 = vmul.f32 %v7034_v44, %v7483_v19 }
 0x3a7   : > { %2973 = vrot.lane.b32.xlu1 %v2935_v48, %s5706_s22  ;;  %3077 = vrot.lane.b32.xlu0 %v3043_v23, %s5706_s22  ;;  %v2831_v38 = vmul.f32 %v6984_v63, %v7526_v10 }
 0x3a9   : > { %v7516_v27 = vpop.permute.xlu1 %3213  ;;  %v7518_v22 = vpop.permute.xlu0 %2861 }
 0x3aa   : > { %9362 = vst [vmem:[#allocation74_spill] sm:$0xff] %v7518_v22  ;;  %v3047_v22 = vmul.f32 %v7004_v3, %v7526_v10 }
 0x3ab   : > { %3429 = vrot.lane.b32.xlu1 %v3387_v15, %s5705_s21  ;;  %3325 = vrot.lane.b32.xlu0 %v3279_v41, %s5705_s21  ;;  %v2939_v41 = vmul.f32 %v6994_v59, %v7526_v10 }
 0x3ad   : > { %v7528_v48 = vpop.permute.xlu1 %3421  ;;  %v7530_v23 = vpop.permute.xlu0 %3317 }
 0x3ae   : > { %9363 = vst [vmem:[#allocation75_spill] sm:$0xff] %v7528_v48  ;;  %9364 = vst [vmem:[#allocation76_spill] sm:$0xff] %v7530_v23  ;;  %v2135_v23 = vpop.f32.mrf.mxu0 }
 0x3af   : > { %3637 = vrot.lane.b32.xlu1 %v3603_v51, %s5705_s21  ;;  %3533 = vrot.lane.b32.xlu0 %v3495_v2, %s5705_s21  ;;  %v2136_v48 = vadd.f32 %v2135_v23, %v6839_v20  ;;  %v3607_v23 = vmul.f32 %v7054_v53, %v7526_v10 }
 0x3b1   : > { %v7538_v58 = vpop.permute.xlu1 %2745  ;;  %v7540_v15 = vpop.permute.xlu0 %3525  ;;  %v7559_v63 = vmax.f32 %v2136_v48, 0.0 }
 0x3b2   : > { %9365 = vst [vmem:[#allocation77_spill] sm:$0xff] %v7538_v58  ;;  %9366 = vst [vmem:[#allocation78_spill] sm:$0xff] %v7540_v15  ;;  %v3391_v15 = vmul.f32 %v7034_v44, %v7526_v10 }
 0x3b3   : > { %2981 = vrot.lane.b32.xlu1 %v2939_v41, %s5706_s22  ;;  %2877 = vrot.lane.b32.xlu0 %v2831_v38, %s5706_s22  ;;  %v2825_v48 = vmul.f32 %v6982_v50, %v7559_v63 }
 0x3b5   : > { %v7549_v51 = vpop.permute.xlu1 %3201  ;;  %v7551_v2 = vpop.permute.xlu0 %3773 }
 0x3b6   : > { %9367 = vst [vmem:[#allocation79_spill] sm:$0xff] %v7549_v51  ;;  %v3499_v51 = vmul.f32 %v7042_v7, %v7526_v10 }
 0x3b7   : > { %3437 = vrot.lane.b32.xlu1 %v3391_v15, %s5705_s21  ;;  %3085 = vrot.lane.b32.xlu0 %v3047_v22, %s5706_s22  ;;  %v2717_v22 = vmul.f32 %v7032_v1, %v7559_v63  ;;  %v5729_v1 = vmov 8  }
 0x3b8   : > { %5593 = vset.pattern.permute.xlu1 %v5729_v1  ;;  %5592 = vset.pattern.permute.xlu0 %v5729_v1 }
 0x3b9   : > { %v7561_v41 = vpop.permute.xlu1 %3409  ;;  %v7563_v38 = vpop.permute.xlu0 %2641 }
 0x3ba   : > { %9368 = vst [vmem:[#allocation80_spill] sm:$0xff] %v7561_v41  ;;  %9369 = vst [vmem:[#allocation81_spill] sm:$0xff] %v7563_v38 }
 0x3bb   : > { %3645 = vrot.lane.b32.xlu1 %v3607_v23, %s5705_s21  ;;  %3541 = vrot.lane.b32.xlu0 %v3499_v51, %s5705_s21  ;;  %v2933_v51 = vmul.f32 %v7044_v9, %v7559_v63  ;;  %v3041_v23 = vmul.f32 %v6998_v52, %v7559_v63 }
 0x3bd   : > { %v7571_v44 = vpop.permute.xlu1 %2753  ;;  %v7573_v15 = vpop.permute.xlu0 %2849 }
 0x3be   : > { %9370 = vst [vmem:[#allocation82_spill] sm:$0xff] %v7571_v44  ;;  %9371 = vst [vmem:[#allocation83_spill] sm:$0xff] %v7573_v15  ;;  %v2184_v15 = vpop.f32.mrf.mxu1  ;;  %v3277_v44 = vmul.f32 %v7018_v62, %v7559_v63 }
 0x3bf   : > { %2761 = vrot.lane.b32.xlu1 %v2717_v22, %s5706_s22  ;;  %2865 = vrot.lane.b32.xlu0 %v2825_v48, %s5706_s22  ;;  %v2185_v22 = vadd.f32 %v2184_v15, %v6839_v20  ;;  %v3601_v15 = vmul.f32 %v7144_v39, %v7559_v63 }
 0x3c1   : > { %v7581_v41 = vpop.permute.xlu1 %2961  ;;  %v7583_v38 = vpop.permute.xlu0 %3305 }
 0x3c2   : > { %9372 = vst [vmem:[#allocation84_spill] sm:$0xff] %v7581_v41  ;;  %9373 = vst [vmem:[#allocation85_spill] sm:$0xff] %v7583_v38  ;;  %v3385_v38 = vmul.f32 %v7102_v61, %v7559_v63 }
 0x3c3   : > { %2969 = vrot.lane.b32.xlu1 %v2933_v51, %s5706_s22  ;;  %3073 = vrot.lane.b32.xlu0 %v3041_v23, %s5706_s22  ;;  %v7602_v51 = vmax.f32 %v2185_v22, 0.0 }
 0x3c5   : > { %v7592_v48 = vpop.permute.xlu1 %3209  ;;  %v7594_v41 = vpop.permute.xlu0 %3761  ;;  %v2829_v22 = vmul.f32 %v6982_v50, %v7602_v51 }
 0x3c6   : > { %9374 = vst [vmem:[#allocation86_spill] sm:$0xff] %v7592_v48  ;;  %9375 = vst [vmem:[#allocation87_spill] sm:$0xff] %v7594_v41  ;;  %v3493_v41 = vmul.f32 %v7038_v57, %v7559_v63  ;;  %v5414_v48 = vpop.f32.mrf.mxu0 }
 0x3c7   : > { %3425 = vrot.lane.b32.xlu1 %v3385_v38, %s5705_s21  ;;  %3321 = vrot.lane.b32.xlu0 %v3277_v44, %s5705_s21  ;;  %v2937_v44 = vmul.f32 %v7044_v9, %v7602_v51 }
 0x3c9   : > { %v7604_v23 = vpop.permute.xlu1 %3417  ;;  %v7606_v1 = vpop.permute.xlu0 %2649 }
 0x3ca   : > { %9376 = vst [vmem:[#allocation88_spill] sm:$0xff] %v7604_v23  ;;  %9377 = vst [vmem:[#allocation89_spill] sm:$0xff] %v7606_v1  ;;  %v2147_v23 = vadd.f32 %v5414_v48, %v6992_v35  ;;  %v3045_v1 = vmul.f32 %v6998_v52, %v7602_v51  ;;  %v3605_v48 = vmul.f32 %v7144_v39, %v7602_v51 }
 0x3cb   : > { %3633 = vrot.lane.b32.xlu1 %v3601_v15, %s5705_s21  ;;  %3529 = vrot.lane.b32.xlu0 %v3493_v41, %s5705_s21 }
 0x3cc   : > { %v7635_v50 = vmax.f32 %v2147_v23, 0.0 }
 0x3cd   : > { %v7614_v62 = vpop.permute.xlu1 %2647  ;;  %v7616_v38 = vpop.permute.xlu0 %2857 }
 0x3ce   : > { %9378 = vst [vmem:[#allocation90_spill] sm:$0xff] %v7614_v62  ;;  %9379 = vst [vmem:[#allocation91_spill] sm:$0xff] %v7616_v38  ;;  %v3389_v62 = vmul.f32 %v7102_v61, %v7602_v51  ;;  %v2828_v23 = vmul.f32 %v6988_v45, %v7635_v50 }
 0x3cf   : > { %2977 = vrot.lane.b32.xlu1 %v2937_v44, %s5706_s22  ;;  %2873 = vrot.lane.b32.xlu0 %v2829_v22, %s5706_s22 }
 0x3d1   : > { %v7625_v15 = vpop.permute.xlu1 %2855  ;;  %v7627_v41 = vpop.permute.xlu0 %3313 }
 0x3d2   : > { %9380 = vst [vmem:[#allocation92_spill] sm:$0xff] %v7625_v15  ;;  %9381 = vst [vmem:[#allocation93_spill] sm:$0xff] %v7627_v41  ;;  %v3497_v41 = vmul.f32 %v7038_v57, %v7602_v51 }
 0x3d3   : > { %3433 = vrot.lane.b32.xlu1 %v3389_v62, %s5705_s21  ;;  %3081 = vrot.lane.b32.xlu0 %v3045_v1, %s5706_s22  ;;  %v2720_v1 = vmul.f32 %v7036_v43, %v7635_v50 }
 0x3d5   : > { %v7637_v44 = vpop.permute.xlu1 %3311  ;;  %v7639_v22 = vpop.permute.xlu0 %3521 }
 0x3d6   : > { %9382 = vst [vmem:[#allocation94_spill] sm:$0xff] %v7637_v44  ;;  %9383 = vst [vmem:[#allocation95_spill] sm:$0xff] %v7639_v22 }
 0x3d7   : > { %3641 = vrot.lane.b32.xlu1 %v3605_v48, %s5705_s21  ;;  %3537 = vrot.lane.b32.xlu0 %v3497_v41, %s5705_s21  ;;  %v3044_v41 = vmul.f32 %v7008_v40, %v7635_v50  ;;  %v2936_v48 = vmul.f32 %v7048_v30, %v7635_v50 }
 0x3d9   : > { %v7647_v61 = vpop.permute.xlu1 %3767  ;;  %v7649_v62 = vpop.permute.xlu0 %3769 }
 0x3da   : > { %9384 = vst [vmem:[#allocation96_spill] sm:$0xff] %v7647_v61  ;;  %9385 = vst [vmem:[#allocation97_spill] sm:$0xff] %v7649_v62  ;;  %v5426_v62 = vpop.f32.mrf.mxu1  ;;  %v3388_v61 = vmul.f32 %v7117_v24, %v7635_v50 }
 0x3db   : > { %2871 = vrot.lane.b32.xlu1 %v2828_v23, %s5706_s22  ;;  %2767 = vrot.lane.b32.xlu0 %v2720_v1, %s5706_s22  ;;  %v2196_v43 = vadd.f32 %v5426_v62, %v6992_v35  ;;  %v3496_v62 = vmul.f32 %v7046_v17, %v7635_v50 }
 0x3dd   : > { %v7657_v22 = vpop.permute.xlu1 %2655  ;;  %v7659_v44 = vpop.permute.xlu0 %2751 }
 0x3de   : > { %9386 = vst [vmem:[#allocation98_spill] sm:$0xff] %v7657_v22  ;;  %9387 = vst [vmem:[#allocation99_spill] sm:$0xff] %v7659_v44  ;;  %v3280_v22 = vmul.f32 %v7026_v14, %v7635_v50  ;;  %v7678_v44 = vmax.f32 %v2196_v43, 0.0 }
 0x3df   : > { %3079 = vrot.lane.b32.xlu1 %v3044_v41, %s5706_s22  ;;  %2975 = vrot.lane.b32.xlu0 %v2936_v48, %s5706_s22 }
 0x3e0   : > { %v2940_v43 = vmul.f32 %v7048_v30, %v7678_v44 }
 0x3e1   : > { %v7668_v23 = vpop.permute.xlu1 %2863  ;;  %v7670_v1 = vpop.permute.xlu0 %3207 }
 0x3e2   : > { %9388 = vst [vmem:[#allocation100_spill] sm:$0xff] %v7668_v23  ;;  %9389 = vst [vmem:[#allocation101_spill] sm:$0xff] %v7670_v1  ;;  %v3604_v1 = vmul.f32 %v7155_v12, %v7635_v50 }
 0x3e3   : > { %3327 = vrot.lane.b32.xlu1 %v3280_v22, %s5705_s21  ;;  %3431 = vrot.lane.b32.xlu0 %v3388_v61, %s5705_s21  ;;  %v2832_v61 = vmul.f32 %v6988_v45, %v7678_v44  ;;  %v3392_v45 = vmul.f32 %v7117_v24, %v7678_v44 }
 0x3e5   : > { %v7680_v41 = vpop.permute.xlu1 %3319  ;;  %v7682_v48 = vpop.permute.xlu0 %3415 }
 0x3e6   : > { %9390 = vst [vmem:[#allocation102_spill] sm:$0xff] %v7680_v41  ;;  %9391 = vst [vmem:[#allocation103_spill] sm:$0xff] %v7682_v48  ;;  %v2138_v41 = vpop.f32.mrf.mxu0 }
 0x3e7   : > { %3535 = vrot.lane.b32.xlu1 %v3496_v62, %s5705_s21  ;;  %3639 = vrot.lane.b32.xlu0 %v3604_v1, %s5705_s21  ;;  %v2139_v48 = vadd.f32 %v2138_v41, %v6986_v0  ;;  %v3500_v41 = vmul.f32 %v7046_v17, %v7678_v44 }
 0x3e9   : > { %v7690_v14 = vpop.permute.xlu1 %3527  ;;  %v7692_v22 = vpop.permute.xlu0 %2759 }
 0x3ea   : > { %9392 = vst [vmem:[#allocation104_spill] sm:$0xff] %v7690_v14  ;;  %9393 = vst [vmem:[#allocation105_spill] sm:$0xff] %v7692_v22  ;;  %v3048_v14 = vmul.f32 %v7008_v40, %v7678_v44  ;;  %v7711_v22 = vmax.f32 %v2139_v48, 0.0 }
 0x3eb   : > { %2879 = vrot.lane.b32.xlu1 %v2832_v61, %s5706_s22  ;;  %2983 = vrot.lane.b32.xlu0 %v2940_v43, %s5706_s22 }
 0x3ec   : > { %v2826_v48 = vmul.f32 %v7040_v5, %v7711_v22  ;;  %v3386_v23 = vmul.f32 %v7030_v49, %v7711_v22 }
 0x3ed   : > { %v7701_v62 = vpop.permute.xlu1 %3775  ;;  %v7703_v1 = vpop.permute.xlu0 %2967 }
 0x3ee   : > { %9394 = vst [vmem:[#allocation106_spill] sm:$0xff] %v7701_v62  ;;  %9395 = vst [vmem:[#allocation107_spill] sm:$0xff] %v7703_v1  ;;  %v3608_v62 = vmul.f32 %v7155_v12, %v7678_v44 }
 0x3ef   : > { %3087 = vrot.lane.b32.xlu1 %v3048_v14, %s5706_s22  ;;  %3439 = vrot.lane.b32.xlu0 %v3392_v45, %s5705_s21  ;;  %v2718_v45 = vmul.f32 %v6974_v55, %v7711_v22 }
 0x3f1   : > { %v7713_v61 = vpop.permute.xlu1 %2643  ;;  %v7715_v43 = vpop.permute.xlu0 %3215 }
 0x3f2   : > { %9396 = vst [vmem:[#allocation108_spill] sm:$0xff] %v7713_v61  ;;  %9397 = vst [vmem:[#allocation109_spill] sm:$0xff] %v7715_v43 }
 0x3f3   : > { %3543 = vrot.lane.b32.xlu1 %v3500_v41, %s5705_s21  ;;  %3647 = vrot.lane.b32.xlu0 %v3608_v62, %s5705_s21  ;;  %v3042_v62 = vmul.f32 %v7052_v37, %v7711_v22  ;;  %v2934_v41 = vmul.f32 %v6990_v21, %v7711_v22 }
 0x3f5   : > { %v7723_v24 = vpop.permute.xlu1 %2851  ;;  %v7725_v14 = vpop.permute.xlu0 %3423 }
 0x3f6   : > { %9398 = vst [vmem:[#allocation110_spill] sm:$0xff] %v7723_v24  ;;  %9399 = vst [vmem:[#allocation111_spill] sm:$0xff] %v7725_v14  ;;  %v2187_v14 = vpop.f32.mrf.mxu1 }
 0x3f7   : > { %2867 = vrot.lane.b32.xlu1 %v2826_v48, %s5706_s22  ;;  %2763 = vrot.lane.b32.xlu0 %v2718_v45, %s5706_s22  ;;  %v2188_v55 = vadd.f32 %v2187_v14, %v6986_v0  ;;  %v3494_v14 = vmul.f32 %v7128_v46, %v7711_v22 }
 0x3f9   : > { %v7733_v43 = vpop.permute.xlu1 %3307  ;;  %v7735_v61 = vpop.permute.xlu0 %2747 }
 0x3fa   : > { %9400 = vst [vmem:[#allocation112_spill] sm:$0xff] %v7733_v43  ;;  %9401 = vst [vmem:[#allocation113_spill] sm:$0xff] %v7735_v61  ;;  %v3278_v43 = vmul.f32 %v7090_v18, %v7711_v22  ;;  %v7754_v61 = vmax.f32 %v2188_v55, 0.0 }
 0x3fb   : > { %3075 = vrot.lane.b32.xlu1 %v3042_v62, %s5706_s22  ;;  %2971 = vrot.lane.b32.xlu0 %v2934_v41, %s5706_s22 }
 0x3fc   : > { %v2938_v55 = vmul.f32 %v6990_v21, %v7754_v61 }
 0x3fd   : > { %v7744_v48 = vpop.permute.xlu1 %3763  ;;  %v7746_v45 = vpop.permute.xlu0 %3203 }
 0x3fe   : > { %9402 = vst [vmem:[#allocation114_spill] sm:$0xff] %v7744_v48  ;;  %9403 = vst [vmem:[#allocation115_spill] sm:$0xff] %v7746_v45  ;;  %v3602_v48 = vmul.f32 %v7050_v28, %v7711_v22 }
 0x3ff   : > { %3323 = vrot.lane.b32.xlu1 %v3278_v43, %s5705_s21  ;;  %3427 = vrot.lane.b32.xlu0 %v3386_v23, %s5705_s21  ;;  %v2830_v23 = vmul.f32 %v7040_v5, %v7754_v61  ;;  %v3390_v5 = vmul.f32 %v7030_v49, %v7754_v61 }
 0x401   : > { %v7756_v62 = vpop.permute.xlu1 %2651  ;;  %v7758_v41 = vpop.permute.xlu0 %3411 }
 0x402   : > { %9404 = vst [vmem:[#allocation116_spill] sm:$0xff] %v7756_v62  ;;  %9405 = vst [vmem:[#allocation117_spill] sm:$0xff] %v7758_v41  ;;  %v5437_v62 = vpop.f32.mrf.mxu0  ;;  %v3046_v41 = vmul.f32 %v7052_v37, %v7754_v61 }
 0x403   : > { %3531 = vrot.lane.b32.xlu1 %v3494_v14, %s5705_s21  ;;  %3635 = vrot.lane.b32.xlu0 %v3602_v48, %s5705_s21  ;;  %v2242_v45 = vadd.f32 %v5437_v62, %v6850_v56  ;;  %v3498_v62 = vmul.f32 %v7128_v46, %v7754_v61 }
 0x405   : > { %v7766_v18 = vpop.permute.xlu1 %2859  ;;  %v7768_v43 = vpop.permute.xlu0 %2755 }
 0x406   : > { %9406 = vst [vmem:[#allocation118_spill] sm:$0xff] %v7766_v18  ;;  %9407 = vst [vmem:[#allocation119_spill] sm:$0xff] %v7768_v43  ;;  %v7787_v43 = vmax.f32 %v2242_v45, 0.0  ;;  %v5449_v18 = vpop.f32.mrf.mxu1 }
 0x407   : > { %2875 = vrot.lane.b32.xlu1 %v2830_v23, %s5706_s22  ;;  %2979 = vrot.lane.b32.xlu0 %v2938_v55, %s5706_s22  ;;  %v2291_v49 = vadd.f32 %v5449_v18, %v6850_v56 }
 0x408   : > { %9410 = vst [vmem:[#allocation122_spill] sm:$0xff] %v7787_v43 }
 0x409   : > { %v7777_v14 = vpop.permute.xlu1 %3315  ;;  %v7779_v48 = vpop.permute.xlu0 %2963 }
 0x40a   : > { %9408 = vst [vmem:[#allocation120_spill] sm:$0xff] %v7777_v14  ;;  %9409 = vst [vmem:[#allocation121_spill] sm:$0xff] %v7779_v48  ;;  %v3606_v14 = vmul.f32 %v7050_v28, %v7754_v61 }
 0x40b   : > { %3083 = vrot.lane.b32.xlu1 %v3046_v41, %s5706_s22  ;;  %3435 = vrot.lane.b32.xlu0 %v3390_v5, %s5705_s21  ;;  %v2943_v5 = vmul.f32 %v6994_v59, %v7787_v43  ;;  %v3503_v59 = vmul.f32 %v7042_v7, %v7787_v43 }
 0x40d   : > { %v7789_v23 = vpop.permute.xlu1 %3523  ;;  %v7791_v55 = vpop.permute.xlu0 %3211 }
 0x40e   : > { %9411 = vst [vmem:[#allocation123_spill] sm:$0xff] %v7789_v23  ;;  %9412 = vst [vmem:[#allocation124_spill] sm:$0xff] %v7791_v55  ;;  %v3051_v55 = vmul.f32 %v7004_v3, %v7787_v43  ;;  %v2233_v23 = vpop.f32.mrf.mxu0 }
 0x40f   : > { %3539 = vrot.lane.b32.xlu1 %v3498_v62, %s5705_s21  ;;  %3643 = vrot.lane.b32.xlu0 %v3606_v14, %s5705_s21  ;;  %v7810_v62 = vmax.f32 %v2291_v49, 0.0  ;;  %v2234_v14 = vadd.f32 %v2233_v23, %v6839_v20 }
 0x411   : > { %v7800_v41 = vpop.permute.xlu1 %3771  ;;  %v7802_v45 = vpop.permute.xlu0 %3419  ;;  %9415 = vst [vmem:[#allocation127_spill] sm:$0xff] %v7810_v62  ;;  %v3615_v23 = vmul.f32 %v7054_v53, %v7810_v62 }
 0x412   : > { %9413 = vst [vmem:[#allocation125_spill] sm:$0xff] %v7800_v41  ;;  %9414 = vst [vmem:[#allocation126_spill] sm:$0xff] %v7802_v45  ;;  %v3611_v41 = vmul.f32 %v7054_v53, %v7787_v43  ;;  %v3055_v45 = vmul.f32 %v7004_v3, %v7810_v62 }
 0x413   : > { %2989 = vrot.lane.b32.xlu1 %v2943_v5, %s5706_s22  ;;  %3093 = vrot.lane.b32.xlu0 %v3051_v55, %s5706_s22  ;;  %v7823_v5 = vmax.f32 %v2234_v14, 0.0 }
 0x415   : > { %v7813_v56 = vpop.permute.xlu1 %2765  ;;  %v7815_v18 = vpop.permute.xlu0 %2869  ;;  %9417 = vst [vmem:[#allocation129_spill] sm:$0xff] %v7823_v5  ;;  %v3049_v53 = vmul.f32 %v6998_v52, %v7823_v5 }
 0x416   : > { %9416 = vst [vmem:[#allocation128_spill] sm:$0xff] %v7815_v18  ;;  %v2282_v18 = vpop.f32.mrf.mxu1 }
 0x417   : > { %3653 = vrot.lane.b32.xlu1 %v3611_v41, %s5705_s21  ;;  %3549 = vrot.lane.b32.xlu0 %v3503_v59, %s5705_s21  ;;  %v2283_v7 = vadd.f32 %v2282_v18, %v6839_v20  ;;  %v2941_v59 = vmul.f32 %v7044_v9, %v7823_v5  ;;  %v3501_v9 = vmul.f32 %v7038_v57, %v7823_v5 }
 0x419   : > { %v7825_v55 = vpop.permute.xlu1 %2973  ;;  %v7827_v49 = vpop.permute.xlu0 %3077  ;;  %v7846_v3 = vmax.f32 %v2283_v7, 0.0 }
 0x41a   : > { %9418 = vst [vmem:[#allocation130_spill] sm:$0xff] %v7825_v55  ;;  %9419 = vst [vmem:[#allocation131_spill] sm:$0xff] %v7827_v49  ;;  %v5438_v49 = vpop.f32.mrf.mxu0 }
 0x41b   : > { %3661 = vrot.lane.b32.xlu1 %v3615_v23, %s5705_s21  ;;  %3101 = vrot.lane.b32.xlu0 %v3055_v45, %s5706_s22  ;;  %9421 = vst [vmem:[#allocation133_spill] sm:$0xff] %v7846_v3  ;;  %v2245_v45 = vadd.f32 %v5438_v49, %v6992_v35  ;;  %v3609_v23 = vmul.f32 %v7144_v39, %v7823_v5 }
 0x41c   : > { %v3613_v49 = vmul.f32 %v7144_v39, %v7846_v3 }
 0x41d   : > { %v7836_v41 = vpop.permute.xlu1 %3429  ;;  %v7838_v14 = vpop.permute.xlu0 %3325 }
 0x41e   : > { %9420 = vst [vmem:[#allocation132_spill] sm:$0xff] %v7836_v41  ;;  %v5450_v41 = vpop.f32.mrf.mxu1 }
 0x41f   : > { %2985 = vrot.lane.b32.xlu1 %v2941_v59, %s5706_s22  ;;  %3089 = vrot.lane.b32.xlu0 %v3049_v53, %s5706_s22  ;;  %v7859_v59 = vmax.f32 %v2245_v45, 0.0  ;;  %v2294_v57 = vadd.f32 %v5450_v41, %v6992_v35 }
 0x421   : > { %v7849_v20 = vpop.permute.xlu1 %3637  ;;  %v7851_v18 = vpop.permute.xlu0 %3533  ;;  %9424 = vst [vmem:[#allocation136_spill] sm:$0xff] %v7859_v59  ;;  %v2944_v39 = vmul.f32 %v7048_v30, %v7859_v59 }
 0x422   : > { %9422 = vst [vmem:[#allocation134_spill] sm:$0xff] %v7849_v20  ;;  %9423 = vst [vmem:[#allocation135_spill] sm:$0xff] %v7851_v18  ;;  %v3053_v20 = vmul.f32 %v6998_v52, %v7846_v3  ;;  %v2236_v18 = vpop.f32.mrf.mxu0  ;;  %v7882_v52 = vmax.f32 %v2294_v57, 0.0 }
 0x423   : > { %3649 = vrot.lane.b32.xlu1 %v3609_v23, %s5705_s21  ;;  %3545 = vrot.lane.b32.xlu0 %v3501_v9, %s5705_s21  ;;  %v3052_v9 = vmul.f32 %v7008_v40, %v7859_v59 }
 0x424   : > { %9427 = vst [vmem:[#allocation139_spill] sm:$0xff] %v7882_v52 }
 0x425   : > { %v7861_v7 = vpop.permute.xlu1 %2981  ;;  %v7863_v53 = vpop.permute.xlu0 %2877 }
 0x426   : > { %9425 = vst [vmem:[#allocation137_spill] sm:$0xff] %v7861_v7  ;;  %v3612_v7 = vmul.f32 %v7155_v12, %v7859_v59 }
 0x427   : > { %3657 = vrot.lane.b32.xlu1 %v3613_v49, %s5705_s21  ;;  %3097 = vrot.lane.b32.xlu0 %v3053_v20, %s5706_s22  ;;  %v2237_v20 = vadd.f32 %v2236_v18, %v6986_v0  ;;  %v3504_v49 = vmul.f32 %v7046_v17, %v7859_v59  ;;  %v3056_v18 = vmul.f32 %v7008_v40, %v7882_v52  ;;  %v2285_v17 = vpop.f32.mrf.mxu1 }
 0x429   : > { %v7872_v23 = vpop.permute.xlu1 %3437  ;;  %v7874_v45 = vpop.permute.xlu0 %3085  ;;  %v7895_v30 = vmax.f32 %v2237_v20, 0.0 }
 0x42a   : > { %9426 = vst [vmem:[#allocation138_spill] sm:$0xff] %v7874_v45 }
 0x42b   : > { %3095 = vrot.lane.b32.xlu1 %v3052_v9, %s5706_s22  ;;  %2991 = vrot.lane.b32.xlu0 %v2944_v39, %s5706_s22  ;;  %9430 = vst [vmem:[#allocation142_spill] sm:$0xff] %v7895_v30  ;;  %v3616_v39 = vmul.f32 %v7155_v12, %v7882_v52  ;;  %v2942_v40 = vmul.f32 %v6990_v21, %v7895_v30 }
 0x42d   : > { %v7885_v35 = vpop.permute.xlu1 %3645  ;;  %v7887_v41 = vpop.permute.xlu0 %3541 }
 0x42e   : > { %9428 = vst [vmem:[#allocation140_spill] sm:$0xff] %v7885_v35  ;;  %9429 = vst [vmem:[#allocation141_spill] sm:$0xff] %v7887_v41  ;;  %v3050_v41 = vmul.f32 %v7052_v37, %v7895_v30 }
 0x42f   : > { %3551 = vrot.lane.b32.xlu1 %v3504_v49, %s5705_s21  ;;  %3655 = vrot.lane.b32.xlu0 %v3612_v7, %s5705_s21  ;;  %v2286_v49 = vadd.f32 %v2285_v17, %v6986_v0  ;;  %v3502_v0 = vmul.f32 %v7128_v46, %v7895_v30  ;;  %v3610_v17 = vmul.f32 %v7050_v28, %v7895_v30 }
 0x431   : > { %v7897_v57 = vpop.permute.xlu1 %2761  ;;  %v7899_v9 = vpop.permute.xlu0 %2865  ;;  %v7918_v12 = vmax.f32 %v2286_v49, 0.0 }
 0x432   : > { %9431 = vst [vmem:[#allocation143_spill] sm:$0xff] %v7897_v57  ;;  %9432 = vst [vmem:[#allocation144_spill] sm:$0xff] %v7899_v9 }
 0x433   : > { %3103 = vrot.lane.b32.xlu1 %v3056_v18, %s5706_s22  ;;  %3663 = vrot.lane.b32.xlu0 %v3616_v39, %s5705_s21  ;;  %9435 = vst [vmem:[#allocation147_spill] sm:$0xff] %v7918_v12  ;;  %v3054_v49 = vmul.f32 %v7052_v37, %v7918_v12  ;;  %v7953_v37 = vld [vmem:[%s9158_s5] sm:$0xff] }
 0x435   : > { %v7908_v7 = vpop.permute.xlu1 %2969  ;;  %v7910_v20 = vpop.permute.xlu0 %3073 }
 0x436   : > { %9433 = vst [vmem:[#allocation145_spill] sm:$0xff] %v7908_v7  ;;  %9434 = vst [vmem:[#allocation146_spill] sm:$0xff] %v7910_v20 }
 0x437   : > { %3091 = vrot.lane.b32.xlu1 %v3050_v41, %s5706_s22  ;;  %2987 = vrot.lane.b32.xlu0 %v2942_v40, %s5706_s22  ;;  %v3614_v40 = vmul.f32 %v7050_v28, %v7918_v12 }
 0x439   : > { %v7920_v18 = vpop.permute.xlu1 %3425  ;;  %v7922_v39 = vpop.permute.xlu0 %3321 }
 0x43a   : > { %9436 = vst [vmem:[#allocation148_spill] sm:$0xff] %v7920_v18  ;;  %9437 = vst [vmem:[#allocation149_spill] sm:$0xff] %v7922_v39 }
 0x43b   : > { %3547 = vrot.lane.b32.xlu1 %v3502_v0, %s5705_s21  ;;  %3651 = vrot.lane.b32.xlu0 %v3610_v17, %s5705_s21  ;;  %v7947_v0 = vld [vmem:[%s9158_s5 + $0x8] sm:$0xff] }
 0x43d   : > { %v7930_v21 = vpop.permute.xlu1 %3633  ;;  %v7932_v41 = vpop.permute.xlu0 %3529 }
 0x43e   : > { %9438 = vst [vmem:[#allocation150_spill] sm:$0xff] %v7930_v21  ;;  %9439 = vst [vmem:[#allocation151_spill] sm:$0xff] %v7932_v41 }
 0x43f   : > { %3099 = vrot.lane.b32.xlu1 %v3054_v49, %s5706_s22  ;;  %3659 = vrot.lane.b32.xlu0 %v3614_v40, %s5705_s21  ;;  %v7963_v49 = vld [vmem:[%s9158_s5 + $0x10] sm:$0xff]  ;;  %v7969_v40 = vld [vmem:[%s9158_s5 + $0x18] sm:$0xff]  ;;  %s5630_s21 = sshll.u32 %s5738_s29, 4  ;;  %s5631_s21 = int_to_ptr.vmem [resolvable:$false] %s5630_s21 }
 0x440   : > { %s5632_s22 = scalar_lea.vmem %s5631_s21, 128 }
 0x441   : > { %v7940_v46 = vpop.permute.xlu1 %2977  ;;  %v7942_v20 = vpop.permute.xlu0 %2873 }
 0x442   : > { %9440 = vst [vmem:[#allocation152_spill] sm:$0xff] %v7940_v46  ;;  %9441 = vst [vmem:[#allocation153_spill] sm:$0xff] %v7942_v20 }
 0x443   : > { %3814 = vperm.xlu1 %5593, %v7947_v0   ;;  %3810 = vperm.xlu0 %5592, %v7953_v37  }
 0x445   : > { %v7956_v28 = vpop.permute.xlu1 %3433  ;;  %v7958_v17 = vpop.permute.xlu0 %3081 }
 0x446   : > { %9442 = vst [vmem:[#allocation154_spill] sm:$0xff] %v7956_v28  ;;  %9443 = vst [vmem:[#allocation155_spill] sm:$0xff] %v7958_v17 }
 0x447   : > { %3818 = vperm.xlu1 %5593, %v7963_v49   ;;  %3822 = vperm.xlu0 %5592, %v7969_v40  }
 0x449   : > { %v7972_v21 = vpop.permute.xlu1 %3641  ;;  %v7974_v35 = vpop.permute.xlu0 %3537 }
 0x44a   : > { %9444 = vst [vmem:[#allocation156_spill] sm:$0xff] %v7972_v21  ;;  %9445 = vst [vmem:[#allocation157_spill] sm:$0xff] %v7974_v35  ;;  %v5730_v35 = vmov 13  }
 0x44b   : > { %5594 = vset.pattern.permute.xlu1 %v5730_v35  ;;  %5595 = vset.pattern.permute.xlu0 %v5730_v35 }
 0x44d   : > { %v7976_v28 = vpop.permute.xlu1 %2871  ;;  %v7978_v39 = vpop.permute.xlu0 %2767 }
 0x44e   : > { %9446 = vst [vmem:[#allocation158_spill] sm:$0xff] %v7976_v28  ;;  %9447 = vst [vmem:[#allocation159_spill] sm:$0xff] %v7978_v39 }
 0x451   : > { %v7980_v18 = vpop.permute.xlu1 %3079  ;;  %v7982_v41 = vpop.permute.xlu0 %2975 }
 0x452   : > { %9448 = vst [vmem:[#allocation160_spill] sm:$0xff] %v7980_v18  ;;  %9449 = vst [vmem:[#allocation161_spill] sm:$0xff] %v7982_v41 }
 0x455   : > { %v7984_v20 = vpop.permute.xlu1 %3327  ;;  %v7986_v57 = vpop.permute.xlu0 %3431 }
 0x456   : > { %9450 = vst [vmem:[#allocation162_spill] sm:$0xff] %v7984_v20  ;;  %9451 = vst [vmem:[#allocation163_spill] sm:$0xff] %v7986_v57 }
 0x459   : > { %v7988_v46 = vpop.permute.xlu1 %3535  ;;  %v7990_v9 = vpop.permute.xlu0 %3639 }
 0x45a   : > { %9452 = vst [vmem:[#allocation164_spill] sm:$0xff] %v7988_v46  ;;  %9453 = vst [vmem:[#allocation165_spill] sm:$0xff] %v7990_v9 }
 0x45d   : > { %v7992_v45 = vpop.permute.xlu1 %2879  ;;  %v7994_v21 = vpop.permute.xlu0 %2983 }
 0x45e   : > { %9454 = vst [vmem:[#allocation166_spill] sm:$0xff] %v7992_v45  ;;  %9455 = vst [vmem:[#allocation167_spill] sm:$0xff] %v7994_v21 }
 0x461   : > { %v7996_v39 = vpop.permute.xlu1 %3087  ;;  %v7998_v28 = vpop.permute.xlu0 %3439 }
 0x462   : > { %9456 = vst [vmem:[#allocation168_spill] sm:$0xff] %v7996_v39  ;;  %9457 = vst [vmem:[#allocation169_spill] sm:$0xff] %v7998_v28 }
 0x465   : > { %v8000_v41 = vpop.permute.xlu1 %3543  ;;  %v8002_v20 = vpop.permute.xlu0 %3647 }
 0x466   : > { %9458 = vst [vmem:[#allocation170_spill] sm:$0xff] %v8000_v41  ;;  %9459 = vst [vmem:[#allocation171_spill] sm:$0xff] %v8002_v20 }
 0x469   : > { %v8004_v57 = vpop.permute.xlu1 %2867  ;;  %v8006_v46 = vpop.permute.xlu0 %2763 }
 0x46a   : > { %9460 = vst [vmem:[#allocation172_spill] sm:$0xff] %v8004_v57  ;;  %9461 = vst [vmem:[#allocation173_spill] sm:$0xff] %v8006_v46 }
 0x46d   : > { %v8008_v9 = vpop.permute.xlu1 %3075  ;;  %v8010_v45 = vpop.permute.xlu0 %2971 }
 0x46e   : > { %9462 = vst [vmem:[#allocation174_spill] sm:$0xff] %v8008_v9  ;;  %9463 = vst [vmem:[#allocation175_spill] sm:$0xff] %v8010_v45  ;;  %v9560_v9 = vld [vmem:[#allocation18_spill] sm:$0xff] }
 0x471   : > { %v8012_v21 = vpop.permute.xlu1 %3323  ;;  %v8014_v55 = vpop.permute.xlu0 %3427 }
 0x472   : > { %9464 = vst [vmem:[#allocation176_spill] sm:$0xff] %v8012_v21  ;;  %9465 = vst [vmem:[#allocation177_spill] sm:$0xff] %v8014_v55 }
 0x475   : > { %v8016_v35 = vpop.permute.xlu1 %3531  ;;  %v8018_v39 = vpop.permute.xlu0 %3635 }
 0x476   : > { %9466 = vst [vmem:[#allocation178_spill] sm:$0xff] %v8016_v35  ;;  %9467 = vst [vmem:[#allocation179_spill] sm:$0xff] %v8018_v39 }
 0x479   : > { %v8020_v28 = vpop.permute.xlu1 %2875  ;;  %v8022_v41 = vpop.permute.xlu0 %2979 }
 0x47a   : > { %9468 = vst [vmem:[#allocation180_spill] sm:$0xff] %v8020_v28  ;;  %9469 = vst [vmem:[#allocation181_spill] sm:$0xff] %v8022_v41 }
 0x47d   : > { %v8024_v20 = vpop.permute.xlu1 %3083  ;;  %v8026_v57 = vpop.permute.xlu0 %3435 }
 0x47e   : > { %9470 = vst [vmem:[#allocation182_spill] sm:$0xff] %v8024_v20  ;;  %9471 = vst [vmem:[#allocation183_spill] sm:$0xff] %v8026_v57 }
 0x481   : > { %v8028_v46 = vpop.permute.xlu1 %3539  ;;  %v8030_v18 = vpop.permute.xlu0 %3643 }
 0x482   : > { %9472 = vst [vmem:[#allocation184_spill] sm:$0xff] %v8028_v46  ;;  %9473 = vst [vmem:[#allocation185_spill] sm:$0xff] %v8030_v18 }
 0x485   : > { %v8032_v45 = vpop.permute.xlu1 %2989  ;;  %v8034_v21 = vpop.permute.xlu0 %3093 }
 0x486   : > { %9474 = vst [vmem:[#allocation186_spill] sm:$0xff] %v8034_v21 }
 0x489   : > { %v8036_v55 = vpop.permute.xlu1 %3653  ;;  %v8038_v35 = vpop.permute.xlu0 %3549 }
 0x48a   : > { %9475 = vst [vmem:[#allocation187_spill] sm:$0xff] %v8036_v55 }
 0x48d   : > { %v8040_v39 = vpop.permute.xlu1 %3661  ;;  %v8042_v28 = vpop.permute.xlu0 %3101 }
 0x491   : > { %v8044_v41 = vpop.permute.xlu1 %2985  ;;  %v8046_v20 = vpop.permute.xlu0 %3089 }
 0x492   : > { %9476 = vst [vmem:[#allocation188_spill] sm:$0xff] %v8044_v41  ;;  %9477 = vst [vmem:[#allocation189_spill] sm:$0xff] %v8046_v20 }
 0x495   : > { %v8048_v57 = vpop.permute.xlu1 %3649  ;;  %v8050_v46 = vpop.permute.xlu0 %3545 }
 0x496   : > { %9478 = vst [vmem:[#allocation190_spill] sm:$0xff] %v8048_v57  ;;  %9479 = vst [vmem:[#allocation191_spill] sm:$0xff] %v8050_v46 }
 0x499   : > { %v8052_v18 = vpop.permute.xlu1 %3657  ;;  %v8054_v17 = vpop.permute.xlu0 %3097 }
 0x49a   : > { %9480 = vst [vmem:[#allocation192_spill] sm:$0xff] %v8052_v18  ;;  %9481 = vst [vmem:[#allocation193_spill] sm:$0xff] %v8054_v17 }
 0x49d   : > { %v8056_v21 = vpop.permute.xlu1 %3095  ;;  %v8058_v55 = vpop.permute.xlu0 %2991 }
 0x49e   : > { %9482 = vst [vmem:[#allocation194_spill] sm:$0xff] %v8056_v21  ;;  %9483 = vst [vmem:[#allocation195_spill] sm:$0xff] %v8058_v55 }
 0x4a1   : > { %v8060_v7 = vpop.permute.xlu1 %3551  ;;  %v8062_v1 = vpop.permute.xlu0 %3655 }
 0x4a2   : > { %9484 = vst [vmem:[#allocation196_spill] sm:$0xff] %v8060_v7  ;;  %9485 = vst [vmem:[#allocation197_spill] sm:$0xff] %v8062_v1 }
 0x4a5   : > { %v8064_v15 = vpop.permute.xlu1 %3103  ;;  %v8066_v41 = vpop.permute.xlu0 %3663 }
 0x4a6   : > { %9486 = vst [vmem:[#allocation198_spill] sm:$0xff] %v8064_v15  ;;  %9487 = vst [vmem:[#allocation199_spill] sm:$0xff] %v8066_v41 }
 0x4a9   : > { %v8068_v20 = vpop.permute.xlu1 %3091  ;;  %v8070_v57 = vpop.permute.xlu0 %2987 }
 0x4aa   : > { %9488 = vst [vmem:[#allocation200_spill] sm:$0xff] %v8068_v20  ;;  %9489 = vst [vmem:[#allocation201_spill] sm:$0xff] %v8070_v57 }
 0x4ad   : > { %v8072_v46 = vpop.permute.xlu1 %3547  ;;  %v8074_v18 = vpop.permute.xlu0 %3651 }
 0x4ae   : > { %9490 = vst [vmem:[#allocation202_spill] sm:$0xff] %v8072_v46  ;;  %9491 = vst [vmem:[#allocation203_spill] sm:$0xff] %v8074_v18 }
 0x4b1   : > { %v8076_v17 = vpop.permute.xlu1 %3099  ;;  %v8078_v21 = vpop.permute.xlu0 %3659 }
 0x4b2   : > { %9492 = vst [vmem:[#allocation204_spill] sm:$0xff] %v8076_v17  ;;  %9493 = vst [vmem:[#allocation205_spill] sm:$0xff] %v8078_v21 }
 0x4be   : > { %v3815_v55 = vpop.permute.xlu1 %3814  ;;  %v3811_v7 = vpop.permute.xlu0 %3810 }
 0x4bf   : > { %v3826_v1 = vmul.f32 %v3815_v55, %v7174_v42  ;;  %v3825_v15 = vmul.f32 %v3811_v7, %v7094_v29  ;;  %v3829_v21 = vmul.f32 %v3811_v7, %v7243_v47  ;;  %v3830_v17 = vmul.f32 %v3815_v55, %v7387_v13 }
 0x4c1   : > { %3859 = vrot.lane.b32.xlu0 %v3826_v1, %s5707_s23  ;;  %3857 = vrot.lane.b32.xlu1 %v3825_v15, %s5707_s23 }
 0x4c2   : > { %v3819_v41 = vpop.permute.xlu1 %3818  ;;  %v3823_v57 = vpop.permute.xlu0 %3822 }
 0x4c3   : > { %v3827_v46 = vmul.f32 %v3819_v41, %v7064_v31  ;;  %v3828_v18 = vmul.f32 %v3823_v57, %v7132_v8  ;;  %v3831_v15 = vmul.f32 %v3819_v41, %v7195_v60  ;;  %v3832_v1 = vmul.f32 %v3823_v57, %v7291_v6 }
 0x4c5   : > { %3861 = vrot.lane.b32.xlu1 %v3827_v46, %s5707_s23  ;;  %3863 = vrot.lane.b32.xlu0 %v3828_v18, %s5707_s23  ;;  %v3833_v46 = vmul.f32 %v3811_v7, %v7264_v25  ;;  %v3834_v18 = vmul.f32 %v3815_v55, %v7430_v36 }
 0x4c9   : > { %3865 = vrot.lane.b32.xlu1 %v3829_v21, %s5707_s23  ;;  %3867 = vrot.lane.b32.xlu0 %v3830_v17, %s5707_s23  ;;  %v3835_v21 = vmul.f32 %v3819_v41, %v7216_v11  ;;  %v3836_v17 = vmul.f32 %v3823_v57, %v7334_v4 }
 0x4cd   : > { %3869 = vrot.lane.b32.xlu1 %v3831_v15, %s5707_s23  ;;  %3871 = vrot.lane.b32.xlu0 %v3832_v1, %s5707_s23  ;;  %v3837_v15 = vmul.f32 %v3811_v7, %v7559_v63  ;;  %v3838_v1 = vmul.f32 %v3815_v55, %v7711_v22  ;;  %v5731_v55 = vmov 18  }
 0x4d1   : > { %3873 = vrot.lane.b32.xlu1 %v3833_v46, %s5707_s23  ;;  %3875 = vrot.lane.b32.xlu0 %v3834_v18, %s5707_s23  ;;  %v3839_v46 = vmul.f32 %v3819_v41, %v7483_v19  ;;  %v3840_v18 = vmul.f32 %v3823_v57, %v7635_v50 }
 0x4d5   : > { %3877 = vrot.lane.b32.xlu1 %v3835_v21, %s5707_s23  ;;  %3879 = vrot.lane.b32.xlu0 %v3836_v17, %s5707_s23 }
 0x4d9   : > { %3881 = vrot.lane.b32.xlu1 %v3837_v15, %s5707_s23  ;;  %3883 = vrot.lane.b32.xlu0 %v3838_v1, %s5707_s23 }
 0x4dd   : > { %3885 = vrot.lane.b32.xlu1 %v3839_v46, %s5707_s23  ;;  %3887 = vrot.lane.b32.xlu0 %v3840_v18, %s5707_s23 }
 0x4e1   : > { %3922 = vperm.xlu1 %5594, %v7953_v37   ;;  %3926 = vperm.xlu0 %5595, %v7947_v0  }
 0x4e5   : > { %3930 = vperm.xlu1 %5594, %v7963_v49   ;;  %5596 = vset.pattern.permute.xlu0 %v5731_v55 }
 0x4e9   : > { %3934 = vperm.xlu1 %5594, %v7969_v40  }
 0x4ed   : > { %5597 = vset.pattern.permute.xlu1 %v5731_v55 }
 0x533   : > { %v8116_v7 = vpop.permute.xlu1 %3857  ;;  %v8118_v41 = vpop.permute.xlu0 %3859 }
 0x534   : > { %9494 = vst [vmem:[#allocation206_spill] sm:$0xff] %v8116_v7  ;;  %9495 = vst [vmem:[#allocation207_spill] sm:$0xff] %v8118_v41 }
 0x537   : > { %v8120_v57 = vpop.permute.xlu1 %3861  ;;  %v8122_v21 = vpop.permute.xlu0 %3863 }
 0x538   : > { %9496 = vst [vmem:[#allocation208_spill] sm:$0xff] %v8120_v57  ;;  %9497 = vst [vmem:[#allocation209_spill] sm:$0xff] %v8122_v21 }
 0x53b   : > { %v8124_v17 = vpop.permute.xlu1 %3865  ;;  %v8126_v15 = vpop.permute.xlu0 %3867 }
 0x53c   : > { %9498 = vst [vmem:[#allocation210_spill] sm:$0xff] %v8124_v17  ;;  %9499 = vst [vmem:[#allocation211_spill] sm:$0xff] %v8126_v15 }
 0x53f   : > { %v8128_v1 = vpop.permute.xlu1 %3869  ;;  %v8130_v46 = vpop.permute.xlu0 %3871 }
 0x540   : > { %9500 = vst [vmem:[#allocation212_spill] sm:$0xff] %v8128_v1  ;;  %9501 = vst [vmem:[#allocation213_spill] sm:$0xff] %v8130_v46 }
 0x543   : > { %v8132_v18 = vpop.permute.xlu1 %3873  ;;  %v8134_v20 = vpop.permute.xlu0 %3875 }
 0x544   : > { %9502 = vst [vmem:[#allocation214_spill] sm:$0xff] %v8132_v18  ;;  %9503 = vst [vmem:[#allocation215_spill] sm:$0xff] %v8134_v20 }
 0x547   : > { %v8136_v55 = vpop.permute.xlu1 %3877  ;;  %v8138_v7 = vpop.permute.xlu0 %3879 }
 0x548   : > { %9504 = vst [vmem:[#allocation216_spill] sm:$0xff] %v8136_v55  ;;  %9505 = vst [vmem:[#allocation217_spill] sm:$0xff] %v8138_v7 }
 0x54b   : > { %v8140_v41 = vpop.permute.xlu1 %3881  ;;  %v8142_v57 = vpop.permute.xlu0 %3883 }
 0x54c   : > { %9506 = vst [vmem:[#allocation218_spill] sm:$0xff] %v8140_v41  ;;  %9507 = vst [vmem:[#allocation219_spill] sm:$0xff] %v8142_v57 }
 0x54f   : > { %v8144_v21 = vpop.permute.xlu1 %3885  ;;  %v8146_v17 = vpop.permute.xlu0 %3887 }
 0x550   : > { %9508 = vst [vmem:[#allocation220_spill] sm:$0xff] %v8146_v17 }
 0x55c   : > { %v3923_v15 = vpop.permute.xlu1 %3922  ;;  %v3927_v1 = vpop.permute.xlu0 %3926 }
 0x55d   : > { %v3937_v46 = vmul.f32 %v3923_v15, %v7243_v47  ;;  %v3938_v18 = vmul.f32 %v3927_v1, %v7387_v13  ;;  %v3941_v41 = vmul.f32 %v3923_v15, %v7264_v25 }
 0x55f   : > { %3969 = vrot.lane.b32.xlu0 %v3937_v46, %s5707_s23  ;;  %3971 = vrot.lane.b32.xlu1 %v3938_v18, %s5707_s23  ;;  %v3942_v46 = vmul.f32 %v3927_v1, %v7430_v36  ;;  %v3945_v18 = vmul.f32 %v3923_v15, %v7559_v63 }
 0x560   : > { %v3931_v55 = vpop.permute.xlu1 %3930 }
 0x561   : > { %v3939_v7 = vmul.f32 %v3931_v55, %v7195_v60  ;;  %v3943_v20 = vmul.f32 %v3931_v55, %v7216_v11 }
 0x563   : > { %3973 = vrot.lane.b32.xlu0 %v3939_v7, %s5707_s23 }
 0x564   : > { %v3935_v57 = vpop.permute.xlu1 %3934 }
 0x565   : > { %v3940_v17 = vmul.f32 %v3935_v57, %v7291_v6  ;;  %v3944_v7 = vmul.f32 %v3935_v57, %v7334_v4 }
 0x567   : > { %3977 = vrot.lane.b32.xlu0 %v3941_v41, %s5707_s23  ;;  %3975 = vrot.lane.b32.xlu1 %v3940_v17, %s5707_s23  ;;  %v3947_v41 = vmul.f32 %v3931_v55, %v7483_v19  ;;  %v3946_v17 = vmul.f32 %v3927_v1, %v7711_v22 }
 0x56b   : > { %3981 = vrot.lane.b32.xlu0 %v3943_v20, %s5707_s23  ;;  %3979 = vrot.lane.b32.xlu1 %v3942_v46, %s5707_s23  ;;  %v3949_v20 = vmul.f32 %v3923_v15, %v7602_v51  ;;  %v3948_v46 = vmul.f32 %v3935_v57, %v7635_v50  ;;  %v5732_v15 = vmov 23  }
 0x56f   : > { %3985 = vrot.lane.b32.xlu0 %v3945_v18, %s5707_s23  ;;  %3983 = vrot.lane.b32.xlu1 %v3944_v7, %s5707_s23  ;;  %v3951_v18 = vmul.f32 %v3931_v55, %v7526_v10  ;;  %v3950_v7 = vmul.f32 %v3927_v1, %v7754_v61 }
 0x573   : > { %3989 = vrot.lane.b32.xlu0 %v3947_v41, %s5707_s23  ;;  %3987 = vrot.lane.b32.xlu1 %v3946_v17, %s5707_s23  ;;  %v3952_v41 = vmul.f32 %v3935_v57, %v7678_v44 }
 0x577   : > { %3993 = vrot.lane.b32.xlu0 %v3949_v20, %s5707_s23  ;;  %3991 = vrot.lane.b32.xlu1 %v3948_v46, %s5707_s23 }
 0x57b   : > { %3997 = vrot.lane.b32.xlu0 %v3951_v18, %s5707_s23  ;;  %3995 = vrot.lane.b32.xlu1 %v3950_v7, %s5707_s23 }
 0x57f   : > { %4034 = vperm.xlu0 %5596, %v7953_v37   ;;  %3999 = vrot.lane.b32.xlu1 %v3952_v41, %s5707_s23 }
 0x583   : > { %4046 = vperm.xlu0 %5596, %v7969_v40   ;;  %4038 = vperm.xlu1 %5597, %v7947_v0  }
 0x587   : > { %4042 = vperm.xlu1 %5597, %v7963_v49   ;;  %5599 = vset.pattern.permute.xlu0 %v5732_v15 }
 0x58b   : > { %5598 = vset.pattern.permute.xlu1 %v5732_v15 }
 0x5d1   : > { %v8184_v1 = vpop.permute.xlu0 %3969  ;;  %v8186_v55 = vpop.permute.xlu1 %3971 }
 0x5d2   : > { %9509 = vst [vmem:[#allocation221_spill] sm:$0xff] %v8184_v1  ;;  %9510 = vst [vmem:[#allocation222_spill] sm:$0xff] %v8186_v55 }
 0x5d5   : > { %v8188_v17 = vpop.permute.xlu0 %3973 }
 0x5d6   : > { %9511 = vst [vmem:[#allocation223_spill] sm:$0xff] %v8188_v17 }
 0x5d9   : > { %v8190_v57 = vpop.permute.xlu1 %3975  ;;  %v8192_v20 = vpop.permute.xlu0 %3977 }
 0x5da   : > { %9512 = vst [vmem:[#allocation224_spill] sm:$0xff] %v8190_v57  ;;  %9513 = vst [vmem:[#allocation225_spill] sm:$0xff] %v8192_v20 }
 0x5dd   : > { %v8194_v46 = vpop.permute.xlu1 %3979  ;;  %v8196_v18 = vpop.permute.xlu0 %3981 }
 0x5de   : > { %9514 = vst [vmem:[#allocation226_spill] sm:$0xff] %v8194_v46  ;;  %9515 = vst [vmem:[#allocation227_spill] sm:$0xff] %v8196_v18 }
 0x5e1   : > { %v8198_v7 = vpop.permute.xlu1 %3983  ;;  %v8200_v41 = vpop.permute.xlu0 %3985 }
 0x5e2   : > { %9516 = vst [vmem:[#allocation228_spill] sm:$0xff] %v8198_v7  ;;  %9517 = vst [vmem:[#allocation229_spill] sm:$0xff] %v8200_v41 }
 0x5e5   : > { %v8202_v38 = vpop.permute.xlu1 %3987  ;;  %v8204_v15 = vpop.permute.xlu0 %3989 }
 0x5e6   : > { %9518 = vst [vmem:[#allocation230_spill] sm:$0xff] %v8202_v38  ;;  %9519 = vst [vmem:[#allocation231_spill] sm:$0xff] %v8204_v15 }
 0x5e9   : > { %v8206_v1 = vpop.permute.xlu1 %3991  ;;  %v8208_v55 = vpop.permute.xlu0 %3993 }
 0x5ea   : > { %9520 = vst [vmem:[#allocation232_spill] sm:$0xff] %v8206_v1  ;;  %9521 = vst [vmem:[#allocation233_spill] sm:$0xff] %v8208_v55 }
 0x5ed   : > { %v8210_v17 = vpop.permute.xlu1 %3995  ;;  %v8212_v57 = vpop.permute.xlu0 %3997 }
 0x5ee   : > { %9522 = vst [vmem:[#allocation234_spill] sm:$0xff] %v8210_v17 }
 0x5f1   : > { %v8214_v20 = vpop.permute.xlu1 %3999 }
 0x5f2   : > { %9523 = vst [vmem:[#allocation235_spill] sm:$0xff] %v8214_v20 }
 0x5fa   : > { %v4035_v46 = vpop.permute.xlu0 %4034 }
 0x5fb   : > { %v4049_v18 = vmul.f32 %v4035_v46, %v7264_v25  ;;  %v4053_v20 = vmul.f32 %v4035_v46, %v7559_v63 }
 0x5fd   : > { %4081 = vrot.lane.b32.xlu1 %v4049_v18, %s5707_s23 }
 0x5fe   : > { %v4039_v41 = vpop.permute.xlu1 %4038  ;;  %v4047_v7 = vpop.permute.xlu0 %4046 }
 0x5ff   : > { %v4050_v38 = vmul.f32 %v4039_v41, %v7430_v36  ;;  %v4052_v17 = vmul.f32 %v4047_v7, %v7334_v4  ;;  %v4054_v15 = vmul.f32 %v4039_v41, %v7711_v22 }
 0x601   : > { %4083 = vrot.lane.b32.xlu0 %v4050_v38, %s5707_s23  ;;  %v4056_v38 = vmul.f32 %v4047_v7, %v7635_v50 }
 0x602   : > { %v4043_v1 = vpop.permute.xlu1 %4042 }
 0x603   : > { %v4051_v55 = vmul.f32 %v4043_v1, %v7216_v11  ;;  %v4055_v18 = vmul.f32 %v4043_v1, %v7483_v19 }
 0x605   : > { %4085 = vrot.lane.b32.xlu1 %v4051_v55, %s5707_s23  ;;  %4087 = vrot.lane.b32.xlu0 %v4052_v17, %s5707_s23  ;;  %v4057_v55 = vmul.f32 %v4035_v46, %v7602_v51  ;;  %v4058_v17 = vmul.f32 %v4039_v41, %v7754_v61 }
 0x609   : > { %4089 = vrot.lane.b32.xlu1 %v4053_v20, %s5707_s23  ;;  %4091 = vrot.lane.b32.xlu0 %v4054_v15, %s5707_s23  ;;  %v4059_v20 = vmul.f32 %v4043_v1, %v7526_v10  ;;  %v4060_v15 = vmul.f32 %v4047_v7, %v7678_v44 }
 0x60d   : > { %4093 = vrot.lane.b32.xlu1 %v4055_v18, %s5707_s23  ;;  %4095 = vrot.lane.b32.xlu0 %v4056_v38, %s5707_s23  ;;  %v4061_v18 = vmul.f32 %v4035_v46, %v7823_v5  ;;  %v4062_v38 = vmul.f32 %v4039_v41, %v7895_v30  ;;  %v5733_v46 = vmov 4  }
 0x611   : > { %4097 = vrot.lane.b32.xlu1 %v4057_v55, %s5707_s23  ;;  %4099 = vrot.lane.b32.xlu0 %v4058_v17, %s5707_s23  ;;  %v4063_v55 = vmul.f32 %v4043_v1, %v7787_v43  ;;  %v4064_v17 = vmul.f32 %v4047_v7, %v7859_v59 }
 0x615   : > { %4101 = vrot.lane.b32.xlu1 %v4059_v20, %s5707_s23  ;;  %4103 = vrot.lane.b32.xlu0 %v4060_v15, %s5707_s23 }
 0x619   : > { %4105 = vrot.lane.b32.xlu1 %v4061_v18, %s5707_s23  ;;  %4107 = vrot.lane.b32.xlu0 %v4062_v38, %s5707_s23 }
 0x61d   : > { %4109 = vrot.lane.b32.xlu1 %v4063_v55, %s5707_s23  ;;  %4111 = vrot.lane.b32.xlu0 %v4064_v17, %s5707_s23 }
 0x621   : > { %4146 = vperm.xlu1 %5598, %v7953_v37   ;;  %4150 = vperm.xlu0 %5599, %v7947_v0  }
 0x625   : > { %4154 = vperm.xlu1 %5598, %v7963_v49   ;;  %5600 = vset.pattern.permute.xlu0 %v5733_v46 }
 0x629   : > { %4158 = vperm.xlu1 %5598, %v7969_v40  }
 0x62d   : > { %5601 = vset.pattern.permute.xlu1 %v5733_v46 }
 0x66f   : > { %v8252_v41 = vpop.permute.xlu1 %4081 }
 0x670   : > { %9524 = vst [vmem:[#allocation236_spill] sm:$0xff] %v8252_v41 }
 0x673   : > { %v8254_v1 = vpop.permute.xlu0 %4083 }
 0x674   : > { %9525 = vst [vmem:[#allocation237_spill] sm:$0xff] %v8254_v1 }
 0x677   : > { %v8256_v7 = vpop.permute.xlu1 %4085  ;;  %v8258_v20 = vpop.permute.xlu0 %4087 }
 0x678   : > { %9526 = vst [vmem:[#allocation238_spill] sm:$0xff] %v8256_v7  ;;  %9527 = vst [vmem:[#allocation239_spill] sm:$0xff] %v8258_v20 }
 0x67b   : > { %v8260_v15 = vpop.permute.xlu1 %4089  ;;  %v8262_v18 = vpop.permute.xlu0 %4091 }
 0x67c   : > { %9528 = vst [vmem:[#allocation240_spill] sm:$0xff] %v8260_v15  ;;  %9529 = vst [vmem:[#allocation241_spill] sm:$0xff] %v8262_v18 }
 0x67f   : > { %v8264_v38 = vpop.permute.xlu1 %4093  ;;  %v8266_v55 = vpop.permute.xlu0 %4095 }
 0x680   : > { %9530 = vst [vmem:[#allocation242_spill] sm:$0xff] %v8264_v38  ;;  %9531 = vst [vmem:[#allocation243_spill] sm:$0xff] %v8266_v55 }
 0x683   : > { %v8268_v17 = vpop.permute.xlu1 %4097  ;;  %v8270_v58 = vpop.permute.xlu0 %4099 }
 0x684   : > { %9532 = vst [vmem:[#allocation244_spill] sm:$0xff] %v8268_v17  ;;  %9533 = vst [vmem:[#allocation245_spill] sm:$0xff] %v8270_v58 }
 0x687   : > { %v8272_v46 = vpop.permute.xlu1 %4101  ;;  %v8274_v41 = vpop.permute.xlu0 %4103 }
 0x688   : > { %9534 = vst [vmem:[#allocation246_spill] sm:$0xff] %v8272_v46  ;;  %9535 = vst [vmem:[#allocation247_spill] sm:$0xff] %v8274_v41 }
 0x68b   : > { %v8276_v1 = vpop.permute.xlu1 %4105  ;;  %v8278_v7 = vpop.permute.xlu0 %4107 }
 0x68c   : > { %9536 = vst [vmem:[#allocation248_spill] sm:$0xff] %v8276_v1  ;;  %9537 = vst [vmem:[#allocation249_spill] sm:$0xff] %v8278_v7 }
 0x68f   : > { %v8280_v20 = vpop.permute.xlu1 %4109  ;;  %v8282_v15 = vpop.permute.xlu0 %4111 }
 0x690   : > { %9538 = vst [vmem:[#allocation250_spill] sm:$0xff] %v8282_v15 }
 0x69c   : > { %v4147_v18 = vpop.permute.xlu1 %4146  ;;  %v4151_v38 = vpop.permute.xlu0 %4150 }
 0x69d   : > { %v4161_v55 = vmul.f32 %v4147_v18, %v7559_v63  ;;  %v4162_v17 = vmul.f32 %v4151_v38, %v7711_v22  ;;  %v4165_v1 = vmul.f32 %v4147_v18, %v7602_v51 }
 0x69f   : > { %4193 = vrot.lane.b32.xlu0 %v4161_v55, %s5707_s23  ;;  %4195 = vrot.lane.b32.xlu1 %v4162_v17, %s5707_s23  ;;  %v4166_v55 = vmul.f32 %v4151_v38, %v7754_v61  ;;  %v4169_v17 = vmul.f32 %v4147_v18, %v7823_v5 }
 0x6a0   : > { %v4155_v46 = vpop.permute.xlu1 %4154 }
 0x6a1   : > { %v4163_v41 = vmul.f32 %v4155_v46, %v7483_v19  ;;  %v4167_v58 = vmul.f32 %v4155_v46, %v7526_v10 }
 0x6a3   : > { %4197 = vrot.lane.b32.xlu0 %v4163_v41, %s5707_s23 }
 0x6a4   : > { %v4159_v7 = vpop.permute.xlu1 %4158 }
 0x6a5   : > { %v4164_v15 = vmul.f32 %v4159_v7, %v7635_v50  ;;  %v4168_v41 = vmul.f32 %v4159_v7, %v7678_v44 }
 0x6a7   : > { %4201 = vrot.lane.b32.xlu0 %v4165_v1, %s5707_s23  ;;  %4199 = vrot.lane.b32.xlu1 %v4164_v15, %s5707_s23  ;;  %v4171_v1 = vmul.f32 %v4155_v46, %v7787_v43  ;;  %v4170_v15 = vmul.f32 %v4151_v38, %v7895_v30 }
 0x6ab   : > { %4205 = vrot.lane.b32.xlu0 %v4167_v58, %s5707_s23  ;;  %4203 = vrot.lane.b32.xlu1 %v4166_v55, %s5707_s23  ;;  %v4173_v58 = vmul.f32 %v4147_v18, %v7846_v3  ;;  %v4172_v55 = vmul.f32 %v4159_v7, %v7859_v59  ;;  %v5734_v18 = vmov 9   ;;  %v2559_v59 = vmul.f32 %v9560_v9, %v7810_v62 }
 0x6af   : > { %4209 = vrot.lane.b32.xlu0 %v4169_v17, %s5707_s23  ;;  %4207 = vrot.lane.b32.xlu1 %v4168_v41, %s5707_s23  ;;  %v4175_v17 = vmul.f32 %v4155_v46, %v7810_v62  ;;  %v4174_v41 = vmul.f32 %v4151_v38, %v7918_v12  ;;  %v9555_v12 = vld [vmem:[#allocation30_spill] sm:$0xff] }
 0x6b3   : > { %4213 = vrot.lane.b32.xlu0 %v4171_v1, %s5707_s23  ;;  %4211 = vrot.lane.b32.xlu1 %v4170_v15, %s5707_s23  ;;  %v4176_v1 = vmul.f32 %v4159_v7, %v7882_v52 }
 0x6b7   : > { %4217 = vrot.lane.b32.xlu0 %v4173_v58, %s5707_s23  ;;  %4215 = vrot.lane.b32.xlu1 %v4172_v55, %s5707_s23 }
 0x6bb   : > { %4221 = vrot.lane.b32.xlu0 %v4175_v17, %s5707_s23  ;;  %4219 = vrot.lane.b32.xlu1 %v4174_v41, %s5707_s23 }
 0x6bf   : > { %4258 = vperm.xlu0 %5600, %v7953_v37   ;;  %4223 = vrot.lane.b32.xlu1 %v4176_v1, %s5707_s23  ;;  %s295_s23 = sand.u32 1, %s5686_s27  }
 0x6c0   : > { %s4898_s25 = scalar_lea.sflag [#allocation4], %s295_s23 }
 0x6c3   : > { %4270 = vperm.xlu0 %5600, %v7969_v40   ;;  %4262 = vperm.xlu1 %5601, %v7947_v0  }
 0x6c7   : > { %4266 = vperm.xlu1 %5601, %v7963_v49   ;;  %5603 = vset.pattern.permute.xlu0 %v5734_v18 }
 0x6cb   : > { %5602 = vset.pattern.permute.xlu1 %v5734_v18 }
 0x711   : > { %v8320_v38 = vpop.permute.xlu0 %4193  ;;  %v8322_v46 = vpop.permute.xlu1 %4195 }
 0x712   : > { %9539 = vst [vmem:[#allocation251_spill] sm:$0xff] %v8320_v38  ;;  %9540 = vst [vmem:[#allocation252_spill] sm:$0xff] %v8322_v46 }
 0x715   : > { %v8324_v15 = vpop.permute.xlu0 %4197 }
 0x716   : > { %9541 = vst [vmem:[#allocation253_spill] sm:$0xff] %v8324_v15 }
 0x719   : > { %v8326_v7 = vpop.permute.xlu1 %4199  ;;  %v8328_v58 = vpop.permute.xlu0 %4201 }
 0x71a   : > { %9542 = vst [vmem:[#allocation254_spill] sm:$0xff] %v8326_v7  ;;  %9543 = vst [vmem:[#allocation255_spill] sm:$0xff] %v8328_v58 }
 0x71d   : > { %v8330_v55 = vpop.permute.xlu1 %4203  ;;  %v8332_v17 = vpop.permute.xlu0 %4205 }
 0x71e   : > { %9544 = vst [vmem:[#allocation256_spill] sm:$0xff] %v8330_v55  ;;  %9545 = vst [vmem:[#allocation257_spill] sm:$0xff] %v8332_v17 }
 0x721   : > { %v8334_v41 = vpop.permute.xlu1 %4207  ;;  %v8336_v1 = vpop.permute.xlu0 %4209 }
 0x722   : > { %9546 = vst [vmem:[#allocation258_spill] sm:$0xff] %v8334_v41  ;;  %9547 = vst [vmem:[#allocation259_spill] sm:$0xff] %v8336_v1 }
 0x725   : > { %v8338_v52 = vpop.permute.xlu1 %4211  ;;  %v8340_v18 = vpop.permute.xlu0 %4213 }
 0x726   : > { %9548 = vst [vmem:[#allocation260_spill] sm:$0xff] %v8338_v52  ;;  %9549 = vst [vmem:[#allocation261_spill] sm:$0xff] %v8340_v18  ;;  %v9554_v18 = vld [vmem:[#allocation8_spill] sm:$0xff] }
 0x729   : > { %v8342_v38 = vpop.permute.xlu1 %4215  ;;  %v8344_v46 = vpop.permute.xlu0 %4217 }
 0x72a   : > { %9550 = vst [vmem:[#allocation262_spill] sm:$0xff] %v8342_v38  ;;  %9551 = vst [vmem:[#allocation263_spill] sm:$0xff] %v8344_v46 }
 0x72d   : > { %v8346_v15 = vpop.permute.xlu1 %4219  ;;  %v8348_v7 = vpop.permute.xlu0 %4221 }
 0x72e   : > { %9552 = vst [vmem:[#allocation264_spill] sm:$0xff] %v8346_v15 }
 0x731   : > { %v8350_v58 = vpop.permute.xlu1 %4223 }
 0x732   : > { %9553 = vst [vmem:[#allocation265_spill] sm:$0xff] %v8350_v58 }
 0x73a   : > { %v4259_v55 = vpop.permute.xlu0 %4258 }
 0x73b   : > { %v4273_v17 = vmul.f32 %v4259_v55, %v7083_v54  ;;  %v4277_v58 = vmul.f32 %v4259_v55, %v7094_v29 }
 0x73d   : > { %4305 = vrot.lane.b32.xlu1 %v4273_v17, %s5708_s24 }
 0x73e   : > { %v4263_v1 = vpop.permute.xlu1 %4262  ;;  %v4271_v41 = vpop.permute.xlu0 %4270 }
 0x73f   : > { %v4274_v52 = vmul.f32 %v4263_v1, %v7157_v26  ;;  %v4276_v15 = vmul.f32 %v4271_v41, %v9555_v12  ;;  %v4278_v54 = vmul.f32 %v4263_v1, %v7174_v42 }
 0x741   : > { %4307 = vrot.lane.b32.xlu0 %v4274_v52, %s5708_s24  ;;  %v4280_v52 = vmul.f32 %v4271_v41, %v7132_v8 }
 0x742   : > { %v4267_v38 = vpop.permute.xlu1 %4266 }
 0x743   : > { %v4275_v46 = vmul.f32 %v4267_v38, %v9554_v18  ;;  %v4279_v17 = vmul.f32 %v4267_v38, %v7064_v31 }
 0x745   : > { %4309 = vrot.lane.b32.xlu1 %v4275_v46, %s5708_s24  ;;  %4311 = vrot.lane.b32.xlu0 %v4276_v15, %s5708_s24  ;;  %v4281_v46 = vmul.f32 %v4259_v55, %v7243_v47  ;;  %v4282_v15 = vmul.f32 %v4263_v1, %v7387_v13 }
 0x749   : > { %4313 = vrot.lane.b32.xlu1 %v4277_v58, %s5708_s24  ;;  %4315 = vrot.lane.b32.xlu0 %v4278_v54, %s5708_s24  ;;  %v4283_v58 = vmul.f32 %v4267_v38, %v7195_v60  ;;  %v4284_v54 = vmul.f32 %v4271_v41, %v7291_v6 }
 0x74d   : > { %4317 = vrot.lane.b32.xlu1 %v4279_v17, %s5708_s24  ;;  %4319 = vrot.lane.b32.xlu0 %v4280_v52, %s5708_s24  ;;  %v4285_v17 = vmul.f32 %v4259_v55, %v7264_v25  ;;  %v4286_v52 = vmul.f32 %v4263_v1, %v7430_v36  ;;  %v9210_v55 = vmov 14   ;;  %v9557_v1 = vld [vmem:[#allocation13_spill] sm:$0xff] }
 0x751   : > { %4321 = vrot.lane.b32.xlu1 %v4281_v46, %s5708_s24  ;;  %4323 = vrot.lane.b32.xlu0 %v4282_v15, %s5708_s24  ;;  %v4287_v46 = vmul.f32 %v4267_v38, %v7216_v11  ;;  %v4288_v15 = vmul.f32 %v4271_v41, %v7334_v4  ;;  %v9556_v38 = vld [vmem:[#allocation7_spill] sm:$0xff] }
 0x752   : > { %v2415_v41 = vmul.f32 %v9556_v38, %v7483_v19 }
 0x755   : > { %4325 = vrot.lane.b32.xlu1 %v4283_v58, %s5708_s24  ;;  %4327 = vrot.lane.b32.xlu0 %v4284_v54, %s5708_s24  ;;  %v2367_v58 = vmul.f32 %v9557_v1, %v7216_v11 }
 0x757   : > { %v2431_v54 = vadd.f32 %v2415_v41, %v2367_v58 }
 0x759   : > { %4329 = vrot.lane.b32.xlu1 %v4285_v17, %s5708_s24  ;;  %4331 = vrot.lane.b32.xlu0 %v4286_v52, %s5708_s24  ;;  %v9558_v17 = vld [vmem:[#allocation26_spill] sm:$0xff] }
 0x75a   : > { %v2463_v52 = vmul.f32 %v9558_v17, %v7526_v10 }
 0x75c   : > { %v2479_v18 = vadd.f32 %v2463_v52, %v2431_v54 }
 0x75d   : > { %4333 = vrot.lane.b32.xlu1 %v4287_v46, %s5708_s24  ;;  %4335 = vrot.lane.b32.xlu0 %v4288_v15, %s5708_s24  ;;  %v9559_v46 = vld [vmem:[#allocation20_spill] sm:$0xff] }
 0x75e   : > { %v2511_v15 = vmul.f32 %v9559_v46, %v7787_v43 }
 0x760   : > { %v2527_v30 = vadd.f32 %v2511_v15, %v2479_v18 }
 0x761   : > { %4370 = vperm.xlu1 %5602, %v7953_v37   ;;  %4374 = vperm.xlu0 %5603, %v7947_v0  }
 0x762   : > { %v2575_v3 = vadd.f32 %v2559_v59, %v2527_v30 }
 0x765   : > { %4378 = vperm.xlu1 %5602, %v7963_v49   ;;  %5605 = vset.pattern.permute.xlu0 %v9210_v55 }
 0x769   : > { %4382 = vperm.xlu1 %5602, %v7969_v40  }
 0x76d   : > { %5604 = vset.pattern.permute.xlu1 %v9210_v55  ;;  %v2687_v55 = vadd.f32 %v7507_v32, %v2575_v3 }
 0x76f   : > { %v2799_v16 = vadd.f32 %v7813_v56, %v2687_v55 }
 0x771   : > { %v2911_v48 = vadd.f32 %v7863_v53, %v2799_v16 }
 0x773   : > { %v3023_v41 = vadd.f32 %v8032_v45, %v2911_v48 }
 0x775   : > { %v3135_v58 = vadd.f32 %v8042_v28, %v3023_v41 }
 0x777   : > { %v3247_v24 = vadd.f32 %v7516_v27, %v3135_v58 }
 0x779   : > { %v3359_v18 = vadd.f32 %v7838_v14, %v3247_v24 }
 0x77b   : > { %v3471_v32 = vadd.f32 %v7872_v23, %v3359_v18 }
 0x77d   : > { %v3583_v48 = vadd.f32 %v8038_v35, %v3471_v32 }
 0x77f   : > { %v3695_v53 = vadd.f32 %v8040_v39, %v3583_v48 }
 0x781   : > { %v3807_v24 = vadd.f32 %v7551_v2, %v3695_v53 }
 0x783   : > { %v3919_v23 = vadd.f32 %v8144_v21, %v3807_v24 }
 0x785   : > { %v4031_v28 = vadd.f32 %v8212_v57, %v3919_v23 }
 0x787   : > { %v4143_v35 = vadd.f32 %v8280_v20, %v4031_v28 }
 0x789   : > { %v4255_v39 = vadd.f32 %v8348_v7, %v4143_v35 }
 0x7af   : > { %v8406_v5 = vpop.permute.xlu1 %4305 }
 0x7b0   : > { %9561 = vst [vmem:[#allocation30_spill] sm:$0xff] %v8406_v5  ;;  %v2503_v5 = vmul.f32 %v9559_v46, %v7483_v19 }
 0x7b3   : > { %v8408_v54 = vpop.permute.xlu0 %4307 }
 0x7b7   : > { %v8411_v52 = vpop.permute.xlu1 %4309  ;;  %v8413_v59 = vpop.permute.xlu0 %4311 }
 0x7b8   : > { %9562 = vst [vmem:[#allocation20_spill] sm:$0xff] %v8411_v52  ;;  %9563 = vst [vmem:[#allocation18_spill] sm:$0xff] %v8413_v59 }
 0x7bb   : > { %v8416_v56 = vpop.permute.xlu1 %4313  ;;  %v8418_v16 = vpop.permute.xlu0 %4315 }
 0x7bc   : > { %9564 = vst [vmem:[#allocation266_spill] sm:$0xff] %v8416_v56  ;;  %9565 = vst [vmem:[#allocation267_spill] sm:$0xff] %v8418_v16 }
 0x7bf   : > { %v8421_v3 = vpop.permute.xlu1 %4317  ;;  %v8423_v27 = vpop.permute.xlu0 %4319 }
 0x7c0   : > { %9566 = vst [vmem:[#allocation268_spill] sm:$0xff] %v8421_v3  ;;  %9567 = vst [vmem:[#allocation269_spill] sm:$0xff] %v8423_v27  ;;  %v9588_v3 = vld [vmem:[#allocation11_spill] sm:$0xff] }
 0x7c3   : > { %v8426_v45 = vpop.permute.xlu1 %4321  ;;  %v8429_v14 = vpop.permute.xlu0 %4323 }
 0x7c4   : > { %9568 = vst [vmem:[#allocation270_spill] sm:$0xff] %v8426_v45  ;;  %9569 = vst [vmem:[#allocation271_spill] sm:$0xff] %v8429_v14  ;;  %v9587_v14 = vld [vmem:[#allocation25_spill] sm:$0xff] }
 0x7c5   : > { %v2450_v45 = vmul.f32 %v9587_v14, %v7387_v13 }
 0x7c7   : > { %v8431_v30 = vpop.permute.xlu1 %4325  ;;  %v8438_v15 = vpop.permute.xlu0 %4327 }
 0x7c8   : > { %9570 = vst [vmem:[#allocation272_spill] sm:$0xff] %v8431_v30  ;;  %9572 = vst [vmem:[#allocation274_spill] sm:$0xff] %v8438_v15 }
 0x7cb   : > { %v8435_v55 = vpop.permute.xlu1 %4329  ;;  %v8443_v2 = vpop.permute.xlu0 %4331 }
 0x7cc   : > { %9571 = vst [vmem:[#allocation273_spill] sm:$0xff] %v8435_v55  ;;  %9574 = vst [vmem:[#allocation276_spill] sm:$0xff] %v8443_v2  ;;  %v9586_v55 = vld [vmem:[#allocation12_spill] sm:$0xff] }
 0x7cd   : > { %v2453_v15 = vmul.f32 %v9586_v55, %v7264_v25 }
 0x7cf   : > { %v4334_v41 = vpop.permute.xlu1 %4333  ;;  %v8445_v18 = vpop.permute.xlu0 %4335 }
 0x7d0   : > { %v8441_v58 = vadd.f32 %v4334_v41, %v4255_v39  ;;  %9575 = vst [vmem:[#allocation277_spill] sm:$0xff] %v8445_v18 }
 0x7d2   : > { %9573 = vst [vmem:[#allocation275_spill] sm:$0xff] %v8441_v58 }
 0x7dc   : > { %v4371_v32 = vpop.permute.xlu1 %4370  ;;  %v4375_v48 = vpop.permute.xlu0 %4374 }
 0x7dd   : > { %v4385_v21 = vmul.f32 %v4371_v32, %v7094_v29  ;;  %v4386_v57 = vmul.f32 %v4375_v48, %v7174_v42  ;;  %v4389_v24 = vmul.f32 %v4371_v32, %v7243_v47  ;;  %v4390_v28 = vmul.f32 %v4375_v48, %v7387_v13 }
 0x7de   : > { %v4393_v39 = vmul.f32 %v4371_v32, %v7264_v25 }
 0x7df   : > { %4417 = vrot.lane.b32.xlu0 %v4385_v21, %s5708_s24  ;;  %4419 = vrot.lane.b32.xlu1 %v4386_v57, %s5708_s24  ;;  %v4394_v21 = vmul.f32 %v4375_v48, %v7430_v36 }
 0x7e0   : > { %v8451_v20 = vpop.permute.xlu1 %4378 }
 0x7e1   : > { %v4387_v7 = vmul.f32 %v8451_v20, %v7064_v31  ;;  %v4391_v35 = vmul.f32 %v8451_v20, %v7195_v60  ;;  %v4395_v57 = vmul.f32 %v8451_v20, %v7216_v11 }
 0x7e3   : > { %4421 = vrot.lane.b32.xlu0 %v4387_v7, %s5708_s24  ;;  %v4397_v7 = vmul.f32 %v4371_v32, %v7559_v63  ;;  %v9576_v32 = vmov 14  }
 0x7e4   : > { %v4383_v53 = vpop.permute.xlu1 %4382 }
 0x7e5   : > { %v4388_v23 = vmul.f32 %v4383_v53, %v7132_v8  ;;  %v4392_v41 = vmul.f32 %v4383_v53, %v7291_v6 }
 0x7e7   : > { %4425 = vrot.lane.b32.xlu0 %v4389_v24, %s5708_s24  ;;  %4423 = vrot.lane.b32.xlu1 %v4388_v23, %s5708_s24  ;;  %v4396_v24 = vmul.f32 %v4383_v53, %v7334_v4  ;;  %v5736_v23 = vmov 19  }
 0x7eb   : > { %4429 = vrot.lane.b32.xlu0 %v4391_v35, %s5708_s24  ;;  %4427 = vrot.lane.b32.xlu1 %v4390_v28, %s5708_s24  ;;  %v5737_v28 = vmov 24   ;;  %v4398_v35 = vmul.f32 %v4375_v48, %v7711_v22 }
 0x7ef   : > { %4433 = vrot.lane.b32.xlu0 %v4393_v39, %s5708_s24  ;;  %4431 = vrot.lane.b32.xlu1 %v4392_v41, %s5708_s24  ;;  %v9577_v39 = vmov 0   ;;  %v4400_v41 = vmul.f32 %v4383_v53, %v7635_v50 }
 0x7f3   : > { %4437 = vrot.lane.b32.xlu0 %v4395_v57, %s5708_s24  ;;  %4435 = vrot.lane.b32.xlu1 %v4394_v21, %s5708_s24  ;;  %v9578_v21 = vld [vmem:[#allocation19_spill] sm:$0xff]  ;;  %v9579_v57 = vld [vmem:[#allocation24_spill] sm:$0xff] }
 0x7f4   : > { %v2356_v48 = vmul.f32 %v9578_v21, %v9555_v12  ;;  %v9582_v12 = vld [vmem:[#allocation10_spill] sm:$0xff]  ;;  %v2408_v52 = vmul.f32 %v9579_v57, %v7291_v6  ;;  %v2360_v62 = vmul.f32 %v9578_v21, %v7132_v8 }
 0x7f5   : > { %v2357_v58 = vmul.f32 %v9582_v12, %v7094_v29 }
 0x7f6   : > { %v2424_v27 = vadd.f32 %v2408_v52, %v2360_v62  ;;  %v2498_v62 = vmul.f32 %v9588_v3, %v7430_v36 }
 0x7f7   : > { %4441 = vrot.lane.b32.xlu0 %v4397_v7, %s5708_s24  ;;  %4439 = vrot.lane.b32.xlu1 %v4396_v24, %s5708_s24  ;;  %v2404_v7 = vmul.f32 %v9579_v57, %v7132_v8  ;;  %v9580_v24 = vld [vmem:[#allocation14_spill] sm:$0xff] }
 0x7f8   : > { %v2452_v53 = vmul.f32 %v9580_v24, %v7291_v6  ;;  %v2456_v8 = vmul.f32 %v9580_v24, %v7334_v4 }
 0x7fb   : > { %4486 = vperm.xlu0 %5605, %v7947_v0   ;;  %4482 = vperm.xlu1 %5604, %v7953_v37  }
 0x7ff   : > { %5607 = vset.pattern.permute.xlu0 %v5736_v23  ;;  %4490 = vperm.xlu1 %5604, %v7963_v49  }
 0x800   : > { %4598 = vperm.xlu0 %5607, %v7947_v0  }
 0x803   : > { %5606 = vset.pattern.permute.xlu1 %v5736_v23 }
 0x804   : > { %5610 = vset.pattern.permute.xlu0 %v5737_v28  ;;  %4594 = vperm.xlu1 %5606, %v7953_v37  }
 0x805   : > { %4706 = vperm.xlu0 %5610, %v7953_v37   ;;  %v2407_v37 = vmul.f32 %v9556_v38, %v7195_v60 }
 0x808   : > { %5608 = vset.pattern.permute.xlu1 %v9576_v32  ;;  %v9581_v32 = vld [vmem:[#allocation6_spill] sm:$0xff] }
 0x809   : > { %4714 = vperm.xlu0 %5610, %v7963_v49   ;;  %4494 = vperm.xlu1 %5608, %v7969_v40  }
 0x80d   : > { %4443 = vrot.lane.b32.xlu0 %v4398_v35, %s5708_s24  ;;  %5609 = vset.pattern.permute.xlu1 %v5736_v23  ;;  %v2405_v35 = vmul.f32 %v9581_v32, %v7243_v47 }
 0x80e   : > { %4602 = vperm.xlu1 %5609, %v7963_v49   ;;  %5615 = vset.pattern.permute.xlu0 %v9577_v39  ;;  %v2359_v49 = vmul.f32 %v9557_v1, %v7064_v31  ;;  %v9583_v31 = vld [vmem:[#allocation16_spill] sm:$0xff] }
 0x80f   : > { %v2354_v2 = vmul.f32 %v9583_v31, %v7157_v26  ;;  %v2421_v29 = vadd.f32 %v2405_v35, %v2357_v58  ;;  %v2551_v26 = vmul.f32 %v9560_v9, %v7526_v10 }
 0x810   : > { %v2423_v18 = vadd.f32 %v2407_v37, %v2359_v49 }
 0x811   : > { %4447 = vrot.lane.b32.xlu0 %v4400_v41, %s5708_s24  ;;  %v2455_v41 = vmul.f32 %v9558_v17, %v7216_v11  ;;  %v2469_v35 = vadd.f32 %v2453_v15, %v2421_v29  ;;  %v2363_v29 = vmul.f32 %v9557_v1, %v7195_v60 }
 0x812   : > { %5611 = vset.pattern.permute.xlu1 %v5737_v28 }
 0x813   : > { %4710 = vperm.xlu1 %5611, %v7947_v0   ;;  %v2420_v0 = vadd.f32 %v2404_v7, %v2356_v48  ;;  %v9585_v7 = vld [vmem:[#allocation23_spill] sm:$0xff]  ;;  %v2471_v30 = vadd.f32 %v2455_v41, %v2423_v18  ;;  %v2358_v18 = vmul.f32 %v9583_v31, %v7174_v42 }
 0x814   : > { %v2500_v49 = vmul.f32 %v9585_v7, %v7334_v4 }
 0x815   : > { %v2468_v48 = vadd.f32 %v2452_v53, %v2420_v0  ;;  %v2519_v53 = vadd.f32 %v2503_v5, %v2471_v30  ;;  %v9589_v5 = vld [vmem:[#allocation9_spill] sm:$0xff] }
 0x816   : > { %v2548_v30 = vmul.f32 %v9589_v5, %v7635_v50 }
 0x817   : > { %5612 = vset.pattern.permute.xlu1 %v5736_v23  ;;  %v9584_v23 = vld [vmem:[#allocation17_spill] sm:$0xff]  ;;  %v2516_v58 = vadd.f32 %v2500_v49, %v2468_v48 }
 0x818   : > { %4606 = vperm.xlu1 %5612, %v7969_v40   ;;  %v2402_v37 = vmul.f32 %v9584_v23, %v7174_v42  ;;  %v2406_v52 = vmul.f32 %v9584_v23, %v7387_v13  ;;  %v2411_v42 = vmul.f32 %v9556_v38, %v7216_v11 }
 0x819   : > { %v2564_v11 = vadd.f32 %v2548_v30, %v2516_v58  ;;  %v2365_v58 = vmul.f32 %v9582_v12, %v7264_v25  ;;  %v2364_v30 = vmul.f32 %v9578_v21, %v7291_v6 }
 0x81a   : > { %v2418_v0 = vadd.f32 %v2402_v37, %v2354_v2  ;;  %v2472_v2 = vadd.f32 %v2456_v8, %v2424_v27  ;;  %v2504_v37 = vmul.f32 %v9585_v7, %v7635_v50  ;;  %v9592_v27 = vld [vmem:[#allocation15_spill] sm:$0xff]  ;;  %v2459_v8 = vmul.f32 %v9558_v17, %v7483_v19 }
 0x81b   : > { %v2549_v49 = vmul.f32 %v9592_v27, %v7602_v51  ;;  %v2422_v38 = vadd.f32 %v2406_v52, %v2358_v18  ;;  %v2427_v60 = vadd.f32 %v2411_v42, %v2363_v29  ;;  %v2457_v17 = vmul.f32 %v9586_v55, %v7559_v63 }
 0x81c   : > { %5613 = vset.pattern.permute.xlu1 %v5737_v28  ;;  %v2466_v41 = vadd.f32 %v2450_v45, %v2418_v0  ;;  %v4399_v28 = vmul.f32 %v8451_v20, %v7483_v19  ;;  %v9590_v45 = vld [vmem:[#allocation22_spill] sm:$0xff]  ;;  %v9591_v20 = vld [vmem:[#allocation21_spill] sm:$0xff]  ;;  %v2552_v0 = vmul.f32 %v9589_v5, %v7678_v44  ;;  %v2413_v19 = vmul.f32 %v9581_v32, %v7559_v63 }
 0x81d   : > { %4718 = vperm.xlu1 %5613, %v7969_v40   ;;  %v8546_v40 = vadd.f32 %v2551_v26, %v2519_v53  ;;  %v2501_v15 = vmul.f32 %v9590_v45, %v7559_v63  ;;  %v2546_v48 = vmul.f32 %v9591_v20, %v7711_v22  ;;  %v2361_v26 = vmul.f32 %v9582_v12, %v7243_v47 }
 0x81e   : > { %v2409_v53 = vmul.f32 %v9581_v32, %v7264_v25  ;;  %v2514_v1 = vadd.f32 %v2498_v62, %v2466_v41  ;;  %v2520_v16 = vadd.f32 %v2504_v37, %v2472_v2  ;;  %v2475_v59 = vadd.f32 %v2459_v8, %v2427_v60 }
 0x81f   : > { %v2517_v47 = vadd.f32 %v2501_v15, %v2469_v35  ;;  %v2507_v18 = vmul.f32 %v9559_v46, %v7526_v10  ;;  %v2505_v60 = vmul.f32 %v9590_v45, %v7602_v51  ;;  %v2429_v2 = vadd.f32 %v2413_v19, %v2365_v58 }
 0x820   : > { %v2562_v56 = vadd.f32 %v2546_v48, %v2514_v1  ;;  %v2425_v41 = vadd.f32 %v2409_v53, %v2361_v26  ;;  %v2412_v1 = vmul.f32 %v9579_v57, %v7334_v4  ;;  %v2461_v29 = vmul.f32 %v9586_v55, %v7602_v51 }
 0x821   : > { %4445 = vrot.lane.b32.xlu1 %v4399_v28, %s5708_s24  ;;  %v2454_v28 = vmul.f32 %v9587_v14, %v7430_v36  ;;  %v2565_v42 = vadd.f32 %v2549_v49, %v2517_v47  ;;  %v2568_v15 = vadd.f32 %v2552_v0, %v2520_v16  ;;  %v2523_v48 = vadd.f32 %v2507_v18, %v2475_v59  ;;  %v9594_v16 = vld [vmem:[#allocation110_spill] sm:$0xff] }
 0x822   : > { %5614 = vset.pattern.permute.xlu1 %v9577_v39  ;;  %v2502_v39 = vmul.f32 %v9588_v3, %v7711_v22  ;;  %v2674_v62 = vadd.f32 %v7409_v34, %v2562_v56  ;;  %v2473_v35 = vadd.f32 %v2457_v17, %v2425_v41  ;;  %v2460_v34 = vmul.f32 %v9580_v24, %v7635_v50  ;;  %v9593_v17 = vld [vmem:[#allocation129_spill] sm:$0xff]  ;;  %v9599_v24 = vld [vmem:[#allocation136_spill] sm:$0xff] }
 0x823   : > { %v2470_v52 = vadd.f32 %v2454_v28, %v2422_v38  ;;  %v2550_v56 = vmul.f32 %v9591_v20, %v7754_v61  ;;  %v2509_v8 = vmul.f32 %v9590_v45, %v9593_v17  ;;  %v2428_v26 = vadd.f32 %v2412_v1, %v2364_v30  ;;  %v9595_v41 = vld [vmem:[#allocation121_spill] sm:$0xff] }
 0x824   : > { %v2786_v37 = vadd.f32 %v7444_v33, %v2674_v62  ;;  %v2362_v19 = vmul.f32 %v9583_v31, %v7387_v13  ;;  %v2410_v47 = vmul.f32 %v9584_v23, %v7430_v36  ;;  %v2555_v49 = vmul.f32 %v9560_v9, %v7787_v43  ;;  %v9596_v62 = vld [vmem:[#allocation46_spill] sm:$0xff]  ;;  %v9597_v30 = vld [vmem:[#allocation49_spill] sm:$0xff] }
 0x825   : > { %v2518_v38 = vadd.f32 %v2502_v39, %v2470_v52  ;;  %v2521_v53 = vadd.f32 %v2505_v60, %v2473_v35  ;;  %v2553_v0 = vmul.f32 %v9592_v27, %v9593_v17  ;;  %v2477_v59 = vadd.f32 %v2461_v29, %v2429_v2  ;;  %v9602_v43 = vld [vmem:[#allocation77_spill] sm:$0xff] }
 0x826   : > { %v2898_v33 = vadd.f32 %v9594_v16, %v2786_v37  ;;  %v2476_v28 = vadd.f32 %v2460_v34, %v2428_v26  ;;  %v2508_v39 = vmul.f32 %v9585_v7, %v7678_v44  ;;  %v2458_v18 = vmul.f32 %v9587_v14, %v7711_v22  ;;  %v9598_v16 = vld [vmem:[#allocation133_spill] sm:$0xff]  ;;  %v9600_v34 = vld [vmem:[#allocation174_spill] sm:$0xff]  ;;  %v9601_v7 = vld [vmem:[#allocation56_spill] sm:$0xff] }
 0x827   : > { %v2676_v52 = vadd.f32 %v9596_v62, %v2564_v11  ;;  %v2677_v1 = vadd.f32 %v9597_v30, %v2565_v42  ;;  %v2525_v37 = vadd.f32 %v2509_v8, %v2477_v59  ;;  %v2557_v35 = vmul.f32 %v9592_v27, %v9598_v16  ;;  %v9603_v11 = vld [vmem:[#allocation39_spill] sm:$0xff] }
 0x828   : > { %v3010_v58 = vadd.f32 %v9595_v41, %v2898_v33  ;;  %v2566_v60 = vadd.f32 %v2550_v56, %v2518_v38  ;;  %v2556_v2 = vmul.f32 %v9589_v5, %v9599_v24  ;;  %v2426_v29 = vadd.f32 %v2410_v47, %v2362_v19  ;;  %v9604_v56 = vld [vmem:[#allocation59_spill] sm:$0xff] }
 0x829   : > { %v2788_v21 = vadd.f32 %v9601_v7, %v2676_v52  ;;  %v2571_v57 = vadd.f32 %v2555_v49, %v2523_v48  ;;  %v2789_v33 = vadd.f32 %v9602_v43, %v2677_v1  ;;  %v2569_v41 = vadd.f32 %v2553_v0, %v2521_v53  ;;  %v9605_v19 = vld [vmem:[#allocation91_spill] sm:$0xff]  ;;  %v9607_v7 = vld [vmem:[#allocation64_spill] sm:$0xff]  ;;  %v9608_v43 = vld [vmem:[#allocation142_spill] sm:$0xff] }
 0x82a   : > { %v3122_v26 = vadd.f32 %v9600_v34, %v3010_v58  ;;  %v2679_v42 = vadd.f32 %v9603_v11, %v8546_v40  ;;  %v2524_v8 = vadd.f32 %v2508_v39, %v2476_v28  ;;  %v2474_v59 = vadd.f32 %v2458_v18, %v2426_v29  ;;  %v9606_v58 = vld [vmem:[#allocation92_spill] sm:$0xff]  ;;  %v9610_v28 = vld [vmem:[#allocation50_spill] sm:$0xff]  ;;  %v9611_v18 = vld [vmem:[#allocation107_spill] sm:$0xff] }
 0x82b   : > { %v2506_v38 = vmul.f32 %v9588_v3, %v7754_v61  ;;  %v2678_v62 = vadd.f32 %v9604_v56, %v2566_v60  ;;  %v2573_v30 = vadd.f32 %v2557_v35, %v2525_v37  ;;  %v2901_v47 = vadd.f32 %v9605_v19, %v2789_v33  ;;  %v9609_v0 = vld [vmem:[#allocation60_spill] sm:$0xff]  ;;  %v9612_v1 = vld [vmem:[#allocation113_spill] sm:$0xff]  ;;  %v9615_v11 = vld [vmem:[#allocation74_spill] sm:$0xff] }
 0x82c   : > { %v2900_v34 = vadd.f32 %v9606_v58, %v2788_v21  ;;  %v2791_v48 = vadd.f32 %v9607_v7, %v2679_v42  ;;  %v2572_v49 = vadd.f32 %v2556_v2, %v2524_v8  ;;  %v2554_v53 = vmul.f32 %v9591_v20, %v9608_v43  ;;  %v9613_v60 = vld [vmem:[#allocation145_spill] sm:$0xff]  ;;  %v9617_v8 = vld [vmem:[#allocation99_spill] sm:$0xff]  ;;  %v9618_v58 = vld [vmem:[#allocation118_spill] sm:$0xff] }
 0x82d   : > { %v3234_v40 = vadd.f32 %v9609_v0, %v3122_v26  ;;  %v2680_v39 = vadd.f32 %v9610_v28, %v2568_v15  ;;  %v2790_v29 = vadd.f32 %v9612_v1, %v2678_v62  ;;  %v3013_v37 = vadd.f32 %v9613_v60, %v2901_v47  ;;  %v9614_v35 = vld [vmem:[#allocation65_spill] sm:$0xff]  ;;  %v9619_v26 = vld [vmem:[#allocation155_spill] sm:$0xff]  ;;  %v9620_v15 = vld [vmem:[#allocation160_spill] sm:$0xff] }
 0x82e   : > { %v3012_v52 = vadd.f32 %v9611_v18, %v2900_v34  ;;  %v2683_v33 = vadd.f32 %v9614_v35, %v2571_v57  ;;  %v2903_v21 = vadd.f32 %v9615_v11, %v2791_v48  ;;  %v9616_v56 = vld [vmem:[#allocation81_spill] sm:$0xff]  ;;  %v2522_v2 = vadd.f32 %v2506_v38, %v2474_v59  ;;  %v9621_v34 = vld [vmem:[#allocation82_spill] sm:$0xff]  ;;  %v9624_v35 = vld [vmem:[#allocation71_spill] sm:$0xff] }
 0x82f   : > { %v2681_v42 = vadd.f32 %v9616_v56, %v2569_v41  ;;  %v2792_v19 = vadd.f32 %v9617_v8, %v2680_v39  ;;  %v2902_v7 = vadd.f32 %v9618_v58, %v2790_v29  ;;  %v3125_v0 = vadd.f32 %v9619_v26, %v3013_v37  ;;  %v9622_v1 = vld [vmem:[#allocation130_spill] sm:$0xff]  ;;  %v9623_v60 = vld [vmem:[#allocation61_spill] sm:$0xff]  ;;  %v9626_v59 = vld [vmem:[#allocation100_spill] sm:$0xff] }
 0x830   : > { %v3124_v28 = vadd.f32 %v9620_v15, %v3012_v52  ;;  %v2570_v62 = vadd.f32 %v2554_v53, %v2522_v2  ;;  %v3015_v47 = vadd.f32 %v9622_v1, %v2903_v21  ;;  %v3346_v57 = vadd.f32 %v9623_v60, %v3234_v40  ;;  %v9625_v11 = vld [vmem:[#allocation89_spill] sm:$0xff]  ;;  %v9627_v39 = vld [vmem:[#allocation175_spill] sm:$0xff]  ;;  %v9628_v29 = vld [vmem:[#allocation90_spill] sm:$0xff] }
 0x831   : > { %v2793_v18 = vadd.f32 %v9621_v34, %v2681_v42  ;;  %v2795_v48 = vadd.f32 %v9624_v35, %v2683_v33  ;;  %v2685_v41 = vadd.f32 %v9625_v11, %v2573_v30  ;;  %v2904_v38 = vadd.f32 %v9626_v59, %v2792_v19  ;;  %v9629_v37 = vld [vmem:[#allocation108_spill] sm:$0xff]  ;;  %v9630_v52 = vld [vmem:[#allocation138_spill] sm:$0xff]  ;;  %v9633_v15 = vld [vmem:[#allocation55_spill] sm:$0xff] }
 0x832   : > { %v3014_v56 = vadd.f32 %v9627_v39, %v2902_v7  ;;  %v2684_v8 = vadd.f32 %v9628_v29, %v2572_v49  ;;  %v2682_v58 = vadd.f32 %v9629_v37, %v2570_v62  ;;  %v3127_v26 = vadd.f32 %v9630_v52, %v3015_v47  ;;  %v9631_v42 = vld [vmem:[#allocation144_spill] sm:$0xff]  ;;  %v9634_v34 = vld [vmem:[#allocation161_spill] sm:$0xff]  ;;  %v9635_v1 = vld [vmem:[#allocation182_spill] sm:$0xff] }
 0x833   : > { %v2905_v53 = vadd.f32 %v9631_v42, %v2793_v18  ;;  %v9632_v2 = vld [vmem:[#allocation44_spill] sm:$0xff]  ;;  %v3236_v40 = vadd.f32 %v9633_v15, %v3124_v28  ;;  %v3016_v33 = vadd.f32 %v9634_v34, %v2904_v38  ;;  %v9636_v60 = vld [vmem:[#allocation119_spill] sm:$0xff]  ;;  %v9639_v59 = vld [vmem:[#allocation117_spill] sm:$0xff] }
 0x834   : > { %v3237_v21 = vadd.f32 %v9632_v2, %v3125_v0  ;;  %v3126_v30 = vadd.f32 %v9635_v1, %v3014_v56  ;;  %v2794_v19 = vadd.f32 %v9636_v60, %v2682_v58  ;;  %v9637_v35 = vld [vmem:[#allocation128_spill] sm:$0xff]  ;;  %v3458_v62 = vadd.f32 %v9639_v59, %v3346_v57  ;;  %v9640_v39 = vld [vmem:[#allocation105_spill] sm:$0xff]  ;;  %v9643_v52 = vld [vmem:[#allocation143_spill] sm:$0xff] }
 0x835   : > { %v2907_v7 = vadd.f32 %v9637_v35, %v2795_v48  ;;  %v9638_v11 = vld [vmem:[#allocation152_spill] sm:$0xff]  ;;  %v2796_v47 = vadd.f32 %v9640_v39, %v2684_v8  ;;  %v9642_v37 = vld [vmem:[#allocation137_spill] sm:$0xff]  ;;  %v2797_v28 = vadd.f32 %v9643_v52, %v2685_v41  ;;  %v9646_v15 = vld [vmem:[#allocation38_spill] sm:$0xff] }
 0x836   : > { %v3017_v49 = vadd.f32 %v9638_v11, %v2905_v53  ;;  %v9641_v29 = vld [vmem:[#allocation168_spill] sm:$0xff]  ;;  %v9645_v2 = vld [vmem:[#allocation189_spill] sm:$0xff]  ;;  %v3239_v58 = vadd.f32 %v9646_v15, %v3127_v26  ;;  %v9649_v60 = vld [vmem:[#allocation63_spill] sm:$0xff] }
 0x837   : > { %v3128_v18 = vadd.f32 %v9641_v29, %v3016_v33  ;;  %v3019_v0 = vadd.f32 %v9642_v37, %v2907_v7  ;;  %v9644_v42 = vld [vmem:[#allocation172_spill] sm:$0xff]  ;;  %v9647_v34 = vld [vmem:[#allocation85_spill] sm:$0xff]  ;;  %v3238_v57 = vadd.f32 %v9649_v60, %v3126_v30  ;;  %v9651_v11 = vld [vmem:[#allocation123_spill] sm:$0xff] }
 0x838   : > { %v2906_v38 = vadd.f32 %v9644_v42, %v2794_v19  ;;  %v3129_v56 = vadd.f32 %v9645_v2, %v3017_v49  ;;  %v3349_v48 = vadd.f32 %v9647_v34, %v3237_v21  ;;  %v9648_v1 = vld [vmem:[#allocation52_spill] sm:$0xff]  ;;  %v9650_v35 = vld [vmem:[#allocation153_spill] sm:$0xff]  ;;  %v3570_v33 = vadd.f32 %v9651_v11, %v3458_v62  ;;  %v9653_v39 = vld [vmem:[#allocation186_spill] sm:$0xff] }
 0x839   : > { %v3348_v53 = vadd.f32 %v9648_v1, %v3236_v40  ;;  %v2909_v8 = vadd.f32 %v9650_v35, %v2797_v28  ;;  %v9652_v59 = vld [vmem:[#allocation181_spill] sm:$0xff]  ;;  %v3131_v41 = vadd.f32 %v9653_v39, %v3019_v0  ;;  %v9654_v29 = vld [vmem:[#allocation58_spill] sm:$0xff]  ;;  %v9656_v52 = vld [vmem:[#allocation188_spill] sm:$0xff] }
 0x83a   : > { %v3018_v7 = vadd.f32 %v9652_v59, %v2906_v38  ;;  %v3240_v19 = vadd.f32 %v9654_v29, %v3128_v18  ;;  %v9655_v37 = vld [vmem:[#allocation158_spill] sm:$0xff]  ;;  %v9657_v42 = vld [vmem:[#allocation79_spill] sm:$0xff]  ;;  %v9658_v2 = vld [vmem:[#allocation200_spill] sm:$0xff] }
 0x83b   : > { %v2908_v49 = vadd.f32 %v9655_v37, %v2796_v47  ;;  %v3021_v26 = vadd.f32 %v9656_v52, %v2909_v8  ;;  %v3241_v21 = vadd.f32 %v9657_v42, %v3129_v56  ;;  %v9659_v15 = vld [vmem:[#allocation70_spill] sm:$0xff]  ;;  %v9660_v34 = vld [vmem:[#allocation88_spill] sm:$0xff]  ;;  %v9661_v1 = vld [vmem:[#allocation103_spill] sm:$0xff]  ;;  %v2414_v56 = vmul.f32 %v9584_v23, %v7711_v22 }
 0x83c   : > { %v3130_v40 = vadd.f32 %v9658_v2, %v3018_v7  ;;  %v3351_v30 = vadd.f32 %v9659_v15, %v3239_v58  ;;  %v3461_v28 = vadd.f32 %v9660_v34, %v3349_v48  ;;  %v3460_v62 = vadd.f32 %v9661_v1, %v3348_v53  ;;  %v9662_v60 = vld [vmem:[#allocation112_spill] sm:$0xff]  ;;  %v9663_v35 = vld [vmem:[#allocation167_spill] sm:$0xff]  ;;  %v9665_v59 = vld [vmem:[#allocation66_spill] sm:$0xff] }
 0x83d   : > { %v3350_v38 = vadd.f32 %v9662_v60, %v3238_v57  ;;  %v3020_v0 = vadd.f32 %v9663_v35, %v2908_v49  ;;  %v9664_v11 = vld [vmem:[#allocation179_spill] sm:$0xff]  ;;  %v3243_v47 = vadd.f32 %v9665_v59, %v3131_v41  ;;  %v9666_v39 = vld [vmem:[#allocation193_spill] sm:$0xff]  ;;  %v9667_v7 = vld [vmem:[#allocation94_spill] sm:$0xff]  ;;  %v2366_v58 = vmul.f32 %v9583_v31, %v7430_v36 }
 0x83e   : > { %v3682_v18 = vadd.f32 %v9664_v11, %v3570_v33  ;;  %v3133_v8 = vadd.f32 %v9666_v39, %v3021_v26  ;;  %v3352_v29 = vadd.f32 %v9667_v7, %v3240_v19  ;;  %v9668_v48 = vld [vmem:[#allocation93_spill] sm:$0xff]  ;;  %v9669_v37 = vld [vmem:[#allocation194_spill] sm:$0xff]  ;;  %v9670_v52 = vld [vmem:[#allocation115_spill] sm:$0xff] }
 0x83f   : > { %v3353_v53 = vadd.f32 %v9668_v48, %v3241_v21  ;;  %v3132_v57 = vadd.f32 %v9669_v37, %v3020_v0  ;;  %v3242_v49 = vadd.f32 %v9670_v52, %v3130_v40  ;;  %v9671_v42 = vld [vmem:[#allocation75_spill] sm:$0xff]  ;;  %v9673_v15 = vld [vmem:[#allocation104_spill] sm:$0xff]  ;;  %v9674_v34 = vld [vmem:[#allocation126_spill] sm:$0xff]  ;;  %v2430_v59 = vadd.f32 %v2414_v56, %v2366_v58 }
 0x840   : > { %v3463_v33 = vadd.f32 %v9671_v42, %v3351_v30  ;;  %v9672_v2 = vld [vmem:[#allocation151_spill] sm:$0xff]  ;;  %v3572_v26 = vadd.f32 %v9673_v15, %v3460_v62  ;;  %v3462_v1 = vadd.f32 %v9674_v34, %v3350_v38  ;;  %v9675_v23 = vld [vmem:[#allocation76_spill] sm:$0xff]  ;;  %v9676_v19 = vld [vmem:[#allocation86_spill] sm:$0xff]  ;;  %v2462_v21 = vmul.f32 %v9587_v14, %v7754_v61 }
 0x841   : > { %v3573_v41 = vadd.f32 %v9672_v2, %v3461_v28  ;;  %v3355_v60 = vadd.f32 %v9675_v23, %v3243_v47  ;;  %v3245_v35 = vadd.f32 %v9676_v19, %v3133_v8  ;;  %v9677_v11 = vld [vmem:[#allocation57_spill] sm:$0xff]  ;;  %v9678_v0 = vld [vmem:[#allocation111_spill] sm:$0xff]  ;;  %v9679_v39 = vld [vmem:[#allocation148_spill] sm:$0xff]  ;;  %v2510_v14 = vmul.f32 %v9588_v3, %v9608_v43 }
 0x842   : > { %v3794_v31 = vadd.f32 %v9677_v11, %v3682_v18  ;;  %v3464_v40 = vadd.f32 %v9678_v0, %v3352_v29  ;;  %v3465_v30 = vadd.f32 %v9679_v39, %v3353_v53  ;;  %v9680_v7 = vld [vmem:[#allocation101_spill] sm:$0xff]  ;;  %v9681_v48 = vld [vmem:[#allocation120_spill] sm:$0xff]  ;;  %v9682_v37 = vld [vmem:[#allocation207_spill] sm:$0xff] }
 0x843   : > { %v3244_v28 = vadd.f32 %v9680_v7, %v3132_v57  ;;  %v3354_v62 = vadd.f32 %v9681_v48, %v3242_v49  ;;  %v9683_v52 = vld [vmem:[#allocation135_spill] sm:$0xff]  ;;  %v9684_v42 = vld [vmem:[#allocation156_spill] sm:$0xff]  ;;  %v9685_v2 = vld [vmem:[#allocation165_spill] sm:$0xff]  ;;  %v2478_v49 = vadd.f32 %v2462_v21, %v2430_v59 }
 0x844   : > { %v3906_v38 = vadd.f32 %v9682_v37, %v3794_v31  ;;  %v3575_v47 = vadd.f32 %v9683_v52, %v3463_v33  ;;  %v3685_v8 = vadd.f32 %v9684_v42, %v3573_v41  ;;  %v3684_v18 = vadd.f32 %v9685_v2, %v3572_v26  ;;  %v9686_v56 = vld [vmem:[#allocation178_spill] sm:$0xff]  ;;  %v9687_v29 = vld [vmem:[#allocation132_spill] sm:$0xff]  ;;  %v9688_v53 = vld [vmem:[#allocation149_spill] sm:$0xff] }
 0x845   : > { %v3574_v58 = vadd.f32 %v9686_v56, %v3462_v1  ;;  %v3467_v15 = vadd.f32 %v9687_v29, %v3355_v60  ;;  %v3357_v34 = vadd.f32 %v9688_v53, %v3245_v35  ;;  %v9689_v57 = vld [vmem:[#allocation222_spill] sm:$0xff]  ;;  %v9690_v19 = vld [vmem:[#allocation147_spill] sm:$0xff]  ;;  %v9691_v33 = vld [vmem:[#allocation164_spill] sm:$0xff]  ;;  %v2526_v2 = vadd.f32 %v2510_v14, %v2478_v49 }
 0x846   : > { %v4018_v23 = vadd.f32 %v9689_v57, %v3906_v38  ;;  %v2558_v11 = vmul.f32 %v9591_v20, %v9690_v19  ;;  %v3576_v31 = vadd.f32 %v9691_v33, %v3464_v40  ;;  %v9692_v41 = vld [vmem:[#allocation157_spill] sm:$0xff]  ;;  %v9693_v26 = vld [vmem:[#allocation102_spill] sm:$0xff]  ;;  %v9696_v37 = vld [vmem:[#allocation140_spill] sm:$0xff] }
 0x847   : > { %v3577_v0 = vadd.f32 %v9692_v41, %v3465_v30  ;;  %v3356_v39 = vadd.f32 %v9693_v26, %v3244_v28  ;;  %v9694_v1 = vld [vmem:[#allocation177_spill] sm:$0xff]  ;;  %v3687_v60 = vadd.f32 %v9696_v37, %v3575_v47  ;;  %v9698_v42 = vld [vmem:[#allocation48_spill] sm:$0xff]  ;;  %v9701_v40 = vld [vmem:[#allocation154_spill] sm:$0xff] }
 0x848   : > { %v3466_v7 = vadd.f32 %v9694_v1, %v3354_v62  ;;  %v9695_v48 = vld [vmem:[#allocation237_spill] sm:$0xff]  ;;  %v3796_v38 = vadd.f32 %v9698_v42, %v3684_v18  ;;  %v3469_v29 = vadd.f32 %v9701_v40, %v3357_v34  ;;  %v9702_v30 = vld [vmem:[#allocation252_spill] sm:$0xff]  ;;  %v9703_v28 = vld [vmem:[#allocation171_spill] sm:$0xff] }
 0x849   : > { %v4130_v3 = vadd.f32 %v9695_v48, %v4018_v23  ;;  %v9697_v52 = vld [vmem:[#allocation185_spill] sm:$0xff]  ;;  %v3688_v57 = vadd.f32 %v9703_v28, %v3576_v31  ;;  %v9705_v23 = vld [vmem:[#allocation210_spill] sm:$0xff]  ;;  %v9708_v18 = vld [vmem:[#allocation184_spill] sm:$0xff] }
 0x84a   : > { %v3686_v35 = vadd.f32 %v9697_v52, %v3574_v58  ;;  %v9699_v59 = vld [vmem:[#allocation53_spill] sm:$0xff]  ;;  %v9706_v47 = vld [vmem:[#allocation190_spill] sm:$0xff]  ;;  %v9707_v58 = vld [vmem:[#allocation163_spill] sm:$0xff]  ;;  %v3578_v48 = vadd.f32 %v9708_v18, %v3466_v7 }
 0x84b   : > { %v3797_v21 = vadd.f32 %v9699_v59, %v3685_v8  ;;  %v9700_v20 = vld [vmem:[#allocation141_spill] sm:$0xff]  ;;  %v4242_v53 = vadd.f32 %v9702_v30, %v4130_v3  ;;  %v3689_v26 = vadd.f32 %v9706_v47, %v3577_v0  ;;  %v3468_v1 = vadd.f32 %v9707_v58, %v3356_v39  ;;  %v9710_v49 = vld [vmem:[#allocation42_spill] sm:$0xff]  ;;  %v9711_v37 = vld [vmem:[#allocation224_spill] sm:$0xff] }
 0x84c   : > { %v3579_v56 = vadd.f32 %v9700_v20, %v3467_v15  ;;  %v9704_v62 = vld [vmem:[#allocation209_spill] sm:$0xff]  ;;  %v9709_v15 = vld [vmem:[#allocation62_spill] sm:$0xff]  ;;  %v3799_v3 = vadd.f32 %v9710_v49, %v3687_v60  ;;  %v2574_v59 = vadd.f32 %v2558_v11, %v2526_v2  ;;  %v9714_v20 = vld [vmem:[#allocation191_spill] sm:$0xff] }
 0x84d   : > { %v3908_v33 = vadd.f32 %v9704_v62, %v3796_v38  ;;  %v3909_v41 = vadd.f32 %v9705_v23, %v3797_v21  ;;  %v4354_v8 = vadd.f32 %v8408_v54, %v4242_v53  ;;  %v3798_v34 = vadd.f32 %v9709_v15, %v3686_v35  ;;  %v9712_v52 = vld [vmem:[#allocation225_spill] sm:$0xff]  ;;  %v9713_v21 = vld [vmem:[#allocation187_spill] sm:$0xff]  ;;  %v9716_v30 = vld [vmem:[#allocation212_spill] sm:$0xff] }
 0x84e   : > { %v3691_v0 = vadd.f32 %v9713_v21, %v3579_v56  ;;  %v3581_v39 = vadd.f32 %v9714_v20, %v3469_v29  ;;  %v9715_v7 = vld [vmem:[#allocation211_spill] sm:$0xff]  ;;  %v3911_v53 = vadd.f32 %v9716_v30, %v3799_v3  ;;  %v9718_v62 = vld [vmem:[#allocation240_spill] sm:$0xff]  ;;  %v9719_v23 = vld [vmem:[#allocation170_spill] sm:$0xff] }
 0x84f   : > { %v4020_v31 = vadd.f32 %v9711_v37, %v3908_v33  ;;  %v4021_v42 = vadd.f32 %v9712_v52, %v3909_v41  ;;  %v3910_v54 = vadd.f32 %v9715_v7, %v3798_v34  ;;  %v9717_v28 = vld [vmem:[#allocation239_spill] sm:$0xff]  ;;  %v3580_v33 = vadd.f32 %v9719_v23, %v3468_v1  ;;  %v9721_v58 = vld [vmem:[#allocation54_spill] sm:$0xff]  ;;  %v9727_v52 = vld [vmem:[#allocation213_spill] sm:$0xff] }
 0x850   : > { %v9720_v47 = vld [vmem:[#allocation203_spill] sm:$0xff]  ;;  %v3800_v11 = vadd.f32 %v9721_v58, %v3688_v57  ;;  %v9723_v29 = vld [vmem:[#allocation226_spill] sm:$0xff]  ;;  %v9729_v21 = vld [vmem:[#allocation72_spill] sm:$0xff] }
 0x851   : > { %v8737_v14 = vpop.permute.xlu0 %4417  ;;  %v4420_v38 = vpop.permute.xlu1 %4419  ;;  %v4132_v35 = vadd.f32 %v9717_v28, %v4020_v31  ;;  %v4133_v60 = vadd.f32 %v9718_v62, %v4021_v42  ;;  %v3690_v41 = vadd.f32 %v9720_v47, %v3578_v48  ;;  %v9722_v2 = vld [vmem:[#allocation87_spill] sm:$0xff]  ;;  %v9725_v49 = vld [vmem:[#allocation254_spill] sm:$0xff]  ;;  %v3803_v48 = vadd.f32 %v9729_v21, %v3691_v0  ;;  %v9730_v20 = vld [vmem:[#allocation192_spill] sm:$0xff] }
 0x852   : > { %v8745_v40 = vadd.f32 %v4420_v38, %v4354_v8  ;;  %v3801_v56 = vadd.f32 %v9722_v2, %v3689_v26  ;;  %v4022_v8 = vadd.f32 %v9723_v29, %v3910_v54  ;;  %v9724_v15 = vld [vmem:[#allocation227_spill] sm:$0xff]  ;;  %v3912_v42 = vadd.f32 %v9727_v52, %v3800_v11  ;;  %v9728_v38 = vld [vmem:[#allocation214_spill] sm:$0xff]  ;;  %v9731_v7 = vld [vmem:[#allocation241_spill] sm:$0xff] }
 0x853   : > { %v4023_v34 = vadd.f32 %v9724_v15, %v3911_v53  ;;  %v4244_v3 = vadd.f32 %v9725_v49, %v4132_v35  ;;  %v9726_v37 = vld [vmem:[#allocation255_spill] sm:$0xff]  ;;  %v3693_v57 = vadd.f32 %v9730_v20, %v3581_v39  ;;  %v9732_v30 = vld [vmem:[#allocation242_spill] sm:$0xff]  ;;  %v9735_v47 = vld [vmem:[#allocation197_spill] sm:$0xff] }
 0x854   : > { %v4245_v31 = vadd.f32 %v9726_v37, %v4133_v60  ;;  %v3913_v1 = vadd.f32 %v9728_v38, %v3801_v56  ;;  %v4134_v26 = vadd.f32 %v9731_v7, %v4022_v8  ;;  %v9733_v62 = vld [vmem:[#allocation18_spill] sm:$0xff]  ;;  %v3692_v35 = vadd.f32 %v9735_v47, %v3580_v33  ;;  %v9737_v2 = vld [vmem:[#allocation228_spill] sm:$0xff]  ;;  %v9738_v29 = vld [vmem:[#allocation229_spill] sm:$0xff] }
 0x855   : > { %v8755_v18 = vpop.permute.xlu0 %4421  ;;  %v4135_v28 = vadd.f32 %v9732_v30, %v4023_v34  ;;  %v4356_v54 = vadd.f32 %v9733_v62, %v4244_v3  ;;  %v9734_v23 = vld [vmem:[#allocation266_spill] sm:$0xff]  ;;  %v4024_v11 = vadd.f32 %v9737_v2, %v3912_v42  ;;  %v9739_v49 = vld [vmem:[#allocation256_spill] sm:$0xff]  ;;  %v9740_v37 = vld [vmem:[#allocation257_spill] sm:$0xff] }
 0x856   : > { %v4357_v53 = vadd.f32 %v9734_v23, %v4245_v31  ;;  %v9736_v58 = vld [vmem:[#allocation114_spill] sm:$0xff]  ;;  %v4025_v56 = vadd.f32 %v9738_v29, %v3913_v1  ;;  %v4246_v39 = vadd.f32 %v9739_v49, %v4134_v26  ;;  %v9741_v3 = vld [vmem:[#allocation116_spill] sm:$0xff]  ;;  %v9742_v38 = vld [vmem:[#allocation215_spill] sm:$0xff] }
 0x857   : > { %v3802_v60 = vadd.f32 %v9736_v58, %v3690_v41  ;;  %v4247_v8 = vadd.f32 %v9740_v37, %v4135_v28  ;;  %v2686_v31 = vadd.f32 %v9741_v3, %v2574_v59  ;;  %v9743_v21 = vld [vmem:[#allocation216_spill] sm:$0xff]  ;;  %v9744_v20 = vld [vmem:[#allocation243_spill] sm:$0xff]  ;;  %v9755_v3 = vld [vmem:[#allocation217_spill] sm:$0xff] }
 0x858   : > { %v3915_v41 = vadd.f32 %v9743_v21, %v3803_v48  ;;  %v4136_v42 = vadd.f32 %v9744_v20, %v4024_v11  ;;  %v9745_v7 = vld [vmem:[#allocation244_spill] sm:$0xff]  ;;  %v9746_v30 = vld [vmem:[#allocation267_spill] sm:$0xff]  ;;  %v9757_v21 = vld [vmem:[#allocation245_spill] sm:$0xff] }
 0x859   : > { %v4424_v15 = vpop.permute.xlu1 %4423  ;;  %v4426_v0 = vpop.permute.xlu0 %4425  ;;  %v3914_v33 = vadd.f32 %v9742_v38, %v3802_v60  ;;  %v4137_v1 = vadd.f32 %v9745_v7, %v4025_v56  ;;  %v4358_v62 = vadd.f32 %v9746_v30, %v4246_v39  ;;  %v9747_v23 = vld [vmem:[#allocation268_spill] sm:$0xff]  ;;  %v9751_v29 = vld [vmem:[#allocation231_spill] sm:$0xff]  ;;  %v9754_v39 = vld [vmem:[#allocation173_spill] sm:$0xff] }
 0x85a   : > { %v8775_v52 = vadd.f32 %v4424_v15, %v4356_v54  ;;  %v8777_v34 = vadd.f32 %v4426_v0, %v4357_v53  ;;  %v4359_v26 = vadd.f32 %v9747_v23, %v4247_v8  ;;  %v9748_v47 = vld [vmem:[#allocation96_spill] sm:$0xff]  ;;  %v9749_v54 = vld [vmem:[#allocation97_spill] sm:$0xff]  ;;  %v9750_v53 = vld [vmem:[#allocation230_spill] sm:$0xff]  ;;  %v4027_v59 = vadd.f32 %v9751_v29, %v3915_v41 }
 0x85b   : > { %v3804_v28 = vadd.f32 %v9748_v47, %v3692_v35  ;;  %v3805_v58 = vadd.f32 %v9749_v54, %v3693_v57  ;;  %v4026_v2 = vadd.f32 %v9750_v53, %v3914_v33  ;;  %v9752_v0 = vld [vmem:[#allocation258_spill] sm:$0xff]  ;;  %v9753_v49 = vld [vmem:[#allocation259_spill] sm:$0xff]  ;;  %v2798_v8 = vadd.f32 %v9754_v39, %v2686_v31  ;;  %v9759_v7 = vld [vmem:[#allocation269_spill] sm:$0xff] }
 0x85c   : > { %v4248_v48 = vadd.f32 %v9752_v0, %v4136_v42  ;;  %v4249_v11 = vadd.f32 %v9753_v49, %v4137_v1  ;;  %v9756_v38 = vld [vmem:[#allocation218_spill] sm:$0xff]  ;;  %v9761_v47 = vld [vmem:[#allocation180_spill] sm:$0xff]  ;;  %v9767_v49 = vld [vmem:[#allocation247_spill] sm:$0xff] }
 0x85d   : > { %v4428_v15 = vpop.permute.xlu1 %4427  ;;  %v4430_v60 = vpop.permute.xlu0 %4429  ;;  %v3916_v35 = vadd.f32 %v9755_v3, %v3804_v28  ;;  %v3917_v57 = vadd.f32 %v9756_v38, %v3805_v58  ;;  %v4138_v33 = vadd.f32 %v9757_v21, %v4026_v2  ;;  %v9758_v20 = vld [vmem:[#allocation246_spill] sm:$0xff]  ;;  %v2910_v1 = vadd.f32 %v9761_v47, %v2798_v8  ;;  %v9768_v39 = vld [vmem:[#allocation248_spill] sm:$0xff]  ;;  %v9769_v3 = vld [vmem:[#allocation271_spill] sm:$0xff] }
 0x85e   : > { %v8792_v37 = vadd.f32 %v4428_v15, %v4358_v62  ;;  %v8794_v56 = vadd.f32 %v4430_v60, %v4359_v26  ;;  %v4139_v41 = vadd.f32 %v9758_v20, %v4027_v59  ;;  %v4360_v30 = vadd.f32 %v9759_v7, %v4248_v48  ;;  %v9760_v23 = vld [vmem:[#allocation270_spill] sm:$0xff]  ;;  %v9762_v62 = vld [vmem:[#allocation232_spill] sm:$0xff]  ;;  %v9763_v26 = vld [vmem:[#allocation233_spill] sm:$0xff] }
 0x85f   : > { %v4361_v42 = vadd.f32 %v9760_v23, %v4249_v11  ;;  %v4028_v54 = vadd.f32 %v9762_v62, %v3916_v35  ;;  %v4029_v53 = vadd.f32 %v9763_v26, %v3917_v57  ;;  %v9764_v15 = vld [vmem:[#allocation260_spill] sm:$0xff]  ;;  %v9765_v60 = vld [vmem:[#allocation261_spill] sm:$0xff]  ;;  %v9772_v23 = vld [vmem:[#allocation262_spill] sm:$0xff] }
 0x860   : > { %v4250_v28 = vadd.f32 %v9764_v15, %v4138_v33  ;;  %v4251_v58 = vadd.f32 %v9765_v60, %v4139_v41  ;;  %v9766_v59 = vld [vmem:[#allocation201_spill] sm:$0xff]  ;;  %v9770_v38 = vld [vmem:[#allocation272_spill] sm:$0xff] }
 0x861   : > { %v4432_v29 = vpop.permute.xlu1 %4431  ;;  %v4434_v31 = vpop.permute.xlu0 %4433  ;;  %v3022_v48 = vadd.f32 %v9766_v59, %v2910_v1  ;;  %v4140_v11 = vadd.f32 %v9767_v49, %v4028_v54  ;;  %v4141_v8 = vadd.f32 %v9768_v39, %v4029_v53  ;;  %v9771_v21 = vld [vmem:[#allocation204_spill] sm:$0xff]  ;;  %v9774_v1 = vld [vmem:[#allocation274_spill] sm:$0xff]  ;;  %v9775_v26 = vld [vmem:[#allocation273_spill] sm:$0xff] }
 0x862   : > { %v8808_v0 = vadd.f32 %v4432_v29, %v4360_v30  ;;  %v8810_v2 = vadd.f32 %v4434_v31, %v4361_v42  ;;  %v4362_v35 = vadd.f32 %v9769_v3, %v4250_v28  ;;  %v4363_v57 = vadd.f32 %v9770_v38, %v4251_v58  ;;  %v9773_v30 = vld [vmem:[#allocation263_spill] sm:$0xff]  ;;  %v9776_v29 = vld [vmem:[#allocation124_spill] sm:$0xff]  ;;  %v9779_v39 = vld [vmem:[#allocation202_spill] sm:$0xff] }
 0x863   : > { %v3134_v20 = vadd.f32 %v9771_v21, %v3022_v48  ;;  %v4252_v41 = vadd.f32 %v9772_v23, %v4140_v11  ;;  %v4253_v47 = vadd.f32 %v9773_v30, %v4141_v8  ;;  %v9777_v59 = vld [vmem:[#allocation176_spill] sm:$0xff]  ;;  %v9778_v49 = vld [vmem:[#allocation183_spill] sm:$0xff]  ;;  %v9780_v38 = vld [vmem:[#allocation33_spill] sm:$0xff] }
 0x864   : > { %v9782_v23 = vld [vmem:[#allocation31_spill] sm:$0xff] }
 0x865   : > { %v4436_v7 = vpop.permute.xlu1 %4435  ;;  %v4438_v33 = vpop.permute.xlu0 %4437  ;;  %v4364_v54 = vadd.f32 %v9774_v1, %v4252_v41  ;;  %v4365_v53 = vadd.f32 %v9775_v26, %v4253_v47  ;;  %v3246_v31 = vadd.f32 %v9776_v29, %v3134_v20  ;;  %v9783_v47 = vld [vmem:[#allocation125_spill] sm:$0xff] }
 0x866   : > { %v8820_v42 = vadd.f32 %v4436_v7, %v4362_v35  ;;  %v8822_v62 = vadd.f32 %v4438_v33, %v4363_v57  ;;  %v9781_v7 = vld [vmem:[#allocation205_spill] sm:$0xff] }
 0x867   : > { %v3358_v48 = vadd.f32 %v9777_v59, %v3246_v31  ;;  %v9785_v31 = vld [vmem:[#allocation234_spill] sm:$0xff] }
 0x869   : > { %v4440_v15 = vpop.permute.xlu1 %4439  ;;  %v4442_v28 = vpop.permute.xlu0 %4441  ;;  %v3470_v11 = vadd.f32 %v9778_v49, %v3358_v48 }
 0x86a   : > { %v8827_v60 = vadd.f32 %v4440_v15, %v4364_v54  ;;  %v8829_v58 = vadd.f32 %v4442_v28, %v4365_v53  ;;  %v9784_v54 = vld [vmem:[#allocation219_spill] sm:$0xff]  ;;  %v9786_v28 = vld [vmem:[#allocation249_spill] sm:$0xff] }
 0x86b   : > { %v3582_v8 = vadd.f32 %v9779_v39, %v3470_v11  ;;  %v9787_v39 = vld [vmem:[#allocation264_spill] sm:$0xff] }
 0x86d   : > { %v3694_v20 = vadd.f32 %v9781_v7, %v3582_v8 }
 0x86f   : > { %v3806_v1 = vadd.f32 %v9783_v47, %v3694_v20  ;;  %v9789_v20 = vld [vmem:[#allocation32_spill] sm:$0xff] }
 0x871   : > { %v3918_v26 = vadd.f32 %v9784_v54, %v3806_v1 }
 0x873   : > { %v4030_v15 = vadd.f32 %v9785_v31, %v3918_v26 }
 0x875   : > { %v4142_v59 = vadd.f32 %v9786_v28, %v4030_v15 }
 0x876   : > { %v4483_v3 = vpop.permute.xlu1 %4482  ;;  %v4487_v35 = vpop.permute.xlu0 %4486 }
 0x877   : > { %v4497_v57 = vmul.f32 %v4483_v3, %v9780_v38  ;;  %v4498_v21 = vmul.f32 %v4487_v35, %v7387_v13  ;;  %v4501_v53 = vmul.f32 %v4483_v3, %v7264_v25  ;;  %v4505_v48 = vmul.f32 %v4483_v3, %v7559_v63 }
 0x878   : > { %v4254_v8 = vadd.f32 %v9787_v39, %v4142_v59  ;;  %v4502_v1 = vmul.f32 %v4487_v35, %v7430_v36  ;;  %v4510_v26 = vmul.f32 %v4487_v35, %v7754_v61  ;;  %v4509_v31 = vmul.f32 %v4483_v3, %v7602_v51 }
 0x879   : > { %4529 = vrot.lane.b32.xlu1 %v4497_v57, %s5708_s24  ;;  %4531 = vrot.lane.b32.xlu0 %v4498_v21, %s5708_s24  ;;  %v9788_v21 = vld [vmem:[#allocation276_spill] sm:$0xff] }
 0x87a   : > { %v4491_v33 = vpop.permute.xlu1 %4490  ;;  %v4366_v7 = vadd.f32 %v9788_v21, %v4254_v8 }
 0x87b   : > { %v4499_v41 = vmul.f32 %v4491_v33, %v9782_v23  ;;  %v4599_v30 = vpop.permute.xlu0 %4598 }
 0x87c   : > { %v4614_v15 = vmul.f32 %v4599_v30, %v7711_v22 }
 0x87d   : > { %4533 = vrot.lane.b32.xlu1 %v4499_v41, %s5708_s24  ;;  %v4503_v41 = vmul.f32 %v4491_v33, %v9789_v20 }
 0x87f   : > { %v4595_v29 = vpop.permute.xlu1 %4594 }
 0x880   : > { %v8844_v13 = vpop.permute.xlu0 %4706  ;;  %v4609_v28 = vmul.f32 %v4595_v29, %v7264_v25  ;;  %v4621_v21 = vmul.f32 %v4595_v29, %v9593_v17 }
 0x881   : > { %4537 = vrot.lane.b32.xlu1 %v4501_v53, %s5708_s24  ;;  %v4610_v53 = vmul.f32 %v4599_v30, %v7430_v36  ;;  %v4613_v36 = vmul.f32 %v4595_v29, %v7559_v63 }
 0x884   : > { %v8850_v49 = vpop.permute.xlu1 %4494  ;;  %v8852_v11 = vpop.permute.xlu0 %4714 }
 0x885   : > { %v4500_v57 = vmul.f32 %v8850_v49, %v7291_v6  ;;  %4545 = vrot.lane.b32.xlu1 %v4505_v48, %s5708_s24  ;;  %v4506_v6 = vmul.f32 %v4487_v35, %v7711_v22  ;;  %v4617_v35 = vmul.f32 %v4595_v29, %v7602_v51  ;;  %v4504_v3 = vmul.f32 %v8850_v49, %v7334_v4  ;;  %v9790_v48 = vld [vmem:[#allocation68_spill] sm:$0xff] }
 0x886   : > { %v4507_v39 = vmul.f32 %v4491_v33, %v9790_v48  ;;  %v4622_v29 = vmul.f32 %v4599_v30, %v9608_v43 }
 0x887   : > { %4535 = vrot.lane.b32.xlu0 %v4500_v57, %s5708_s24  ;;  %v4618_v57 = vmul.f32 %v4599_v30, %v7754_v61 }
 0x888   : > { %v4444_v47 = vpop.permute.xlu0 %4443 }
 0x889   : > { %v8862_v54 = vadd.f32 %v4444_v47, %v4366_v7  ;;  %4541 = vrot.lane.b32.xlu1 %v4503_v41, %s5708_s24  ;;  %v8884_v59 = vpop.permute.xlu1 %4602  ;;  %v4511_v7 = vmul.f32 %v4491_v33, %v7526_v10  ;;  %v4721_v41 = vmul.f32 %v8844_v13, %v7559_v63  ;;  %v9791_v33 = vld [vmem:[#allocation29_spill] sm:$0xff] }
 0x88a   : > { %v4611_v8 = vmul.f32 %v8884_v59, %v9789_v20  ;;  %v4615_v47 = vmul.f32 %v8884_v59, %v9790_v48 }
 0x88b   : > { %4539 = vrot.lane.b32.xlu0 %v4502_v1, %s5708_s24  ;;  %v4725_v1 = vmul.f32 %v8844_v13, %v7602_v51  ;;  %v2449_v51 = vmul.f32 %v9586_v55, %v9780_v38  ;;  %v9797_v38 = vld [vmem:[#allocation26_spill] sm:$0xff] }
 0x88d   : > { %4555 = vrot.lane.b32.xlu1 %v4510_v26, %s5708_s24  ;;  %v2401_v26 = vmul.f32 %v9581_v32, %v9791_v33  ;;  %v4729_v32 = vmul.f32 %v8844_v13, %v9593_v17  ;;  %v2545_v17 = vmul.f32 %v9592_v27, %v7559_v63  ;;  %v2547_v27 = vmul.f32 %v9560_v9, %v9790_v48  ;;  %v9800_v9 = vld [vmem:[#allocation35_spill] sm:$0xff] }
 0x88f   : > { %4547 = vrot.lane.b32.xlu0 %v4506_v6, %s5708_s24  ;;  %v9792_v6 = vld [vmem:[#allocation28_spill] sm:$0xff] }
 0x891   : > { %4643 = vrot.lane.b32.xlu1 %v4610_v53, %s5708_s24  ;;  %v2353_v53 = vmul.f32 %v9582_v12, %v9792_v6  ;;  %v9793_v12 = vld [vmem:[#allocation27_spill] sm:$0xff]  ;;  %v4723_v6 = vmul.f32 %v8852_v11, %v9790_v48 }
 0x893   : > { %4553 = vrot.lane.b32.xlu0 %v4509_v31, %s5708_s24  ;;  %v4711_v31 = vpop.permute.xlu1 %4710  ;;  %v2417_v30 = vadd.f32 %v2401_v26, %v2353_v53 }
 0x894   : > { %v4730_v33 = vmul.f32 %v4711_v31, %v9608_v43  ;;  %v4733_v43 = vmul.f32 %v8844_v13, %v9598_v16  ;;  %v9807_v16 = vld [vmem:[#allocation73_spill] sm:$0xff] }
 0x895   : > { %4651 = vrot.lane.b32.xlu1 %v4614_v15, %s5708_s24  ;;  %v4508_v15 = vmul.f32 %v8850_v49, %v7635_v50  ;;  %v2465_v55 = vadd.f32 %v2449_v51, %v2417_v30 }
 0x897   : > { %4641 = vrot.lane.b32.xlu0 %v4609_v28, %s5708_s24  ;;  %v4722_v28 = vmul.f32 %v4711_v31, %v7711_v22  ;;  %v4726_v22 = vmul.f32 %v4711_v31, %v7754_v61  ;;  %v2499_v61 = vmul.f32 %v9559_v46, %v9789_v20  ;;  %v9799_v20 = vld [vmem:[#allocation43_spill] sm:$0xff] }
 0x899   : > { %4657 = vrot.lane.b32.xlu1 %v4617_v35, %s5708_s24  ;;  %v9794_v35 = vld [vmem:[#allocation7_spill] sm:$0xff] }
 0x89b   : > { %4649 = vrot.lane.b32.xlu0 %v4613_v36, %s5708_s24  ;;  %v2403_v36 = vmul.f32 %v9794_v35, %v9793_v12  ;;  %v9803_v12 = vld [vmem:[#allocation84_spill] sm:$0xff] }
 0x89d   : > { %4543 = vrot.lane.b32.xlu1 %v4504_v3, %s5708_s24  ;;  %v9795_v3 = vld [vmem:[#allocation8_spill] sm:$0xff] }
 0x89f   : > { %4549 = vrot.lane.b32.xlu0 %v4507_v39, %s5708_s24  ;;  %v9796_v39 = vld [vmem:[#allocation13_spill] sm:$0xff] }
 0x8a1   : > { %4645 = vrot.lane.b32.xlu1 %v4611_v8, %s5708_s24  ;;  %v2355_v8 = vmul.f32 %v9796_v39, %v9795_v3  ;;  %v9805_v39 = vld [vmem:[#allocation67_spill] sm:$0xff] }
 0x8a3   : > { %4659 = vrot.lane.b32.xlu0 %v4618_v57, %s5708_s24  ;;  %v2497_v57 = vmul.f32 %v9590_v45, %v7264_v25  ;;  %v4619_v25 = vmul.f32 %v8884_v59, %v7526_v10 }
 0x8a5   : > { %4665 = vrot.lane.b32.xlu1 %v4621_v21, %s5708_s24  ;;  %v2451_v21 = vmul.f32 %v9797_v38, %v9782_v23  ;;  %v4727_v38 = vmul.f32 %v8852_v11, %v7526_v10 }
 0x8a7   : > { %4557 = vrot.lane.b32.xlu0 %v4511_v7, %s5708_s24  ;;  %v4512_v7 = vmul.f32 %v8850_v49, %v7678_v44  ;;  %v9798_v49 = vld [vmem:[#allocation45_spill] sm:$0xff] }
 0x8a9   : > { %4753 = vrot.lane.b32.xlu1 %v4721_v41, %s5708_s24  ;;  %v2419_v41 = vadd.f32 %v2403_v36, %v2355_v8  ;;  %v9804_v36 = vld [vmem:[#allocation122_spill] sm:$0xff] }
 0x8aa   : > { %v4623_v3 = vmul.f32 %v8884_v59, %v9804_v36  ;;  %v9809_v59 = vld [vmem:[#allocation41_spill] sm:$0xff] }
 0x8ab   : > { %4653 = vrot.lane.b32.xlu0 %v4615_v47, %s5708_s24  ;;  %v2513_v47 = vadd.f32 %v2497_v57, %v2465_v55  ;;  %v2467_v45 = vadd.f32 %v2451_v21, %v2419_v41  ;;  %v9806_v57 = vld [vmem:[#allocation146_spill] sm:$0xff]  ;;  %v9808_v21 = vld [vmem:[#allocation131_spill] sm:$0xff] }
 0x8ad   : > { %4761 = vrot.lane.b32.xlu1 %v4725_v1, %s5708_s24  ;;  %v4607_v1 = vpop.permute.xlu1 %4606  ;;  %v2561_v23 = vadd.f32 %v2545_v17, %v2513_v47  ;;  %v2515_v26 = vadd.f32 %v2499_v61, %v2467_v45  ;;  %v9810_v61 = vld [vmem:[#allocation34_spill] sm:$0xff] }
 0x8ae   : > { %v4616_v63 = vmul.f32 %v4607_v1, %v7635_v50  ;;  %v4624_v41 = vmul.f32 %v4607_v1, %v9599_v24 }
 0x8af   : > { %4667 = vrot.lane.b32.xlu0 %v4622_v29, %s5708_s24  ;;  %v2673_v29 = vadd.f32 %v9798_v49, %v2561_v23  ;;  %v2563_v46 = vadd.f32 %v2547_v27, %v2515_v26  ;;  %v9811_v23 = vld [vmem:[#allocation51_spill] sm:$0xff]  ;;  %v4731_v27 = vmul.f32 %v8852_v11, %v9804_v36  ;;  %v9814_v26 = vld [vmem:[#allocation69_spill] sm:$0xff] }
 0x8b0   : > { %v9821_v36 = vld [vmem:[#allocation47_spill] sm:$0xff] }
 0x8b1   : > { %4551 = vrot.lane.b32.xlu1 %v4508_v15, %s5708_s24  ;;  %v2785_v53 = vadd.f32 %v9799_v20, %v2673_v29  ;;  %v4612_v15 = vmul.f32 %v4607_v1, %v7334_v4  ;;  %v2675_v51 = vadd.f32 %v9800_v9, %v2563_v46  ;;  %v4719_v47 = vpop.permute.xlu1 %4718  ;;  %v9813_v29 = vld [vmem:[#allocation80_spill] sm:$0xff]  ;;  %v9815_v46 = vld [vmem:[#allocation95_spill] sm:$0xff] }
 0x8b2   : > { %v4728_v10 = vmul.f32 %v4719_v47, %v7678_v44 }
 0x8b3   : > { %4755 = vrot.lane.b32.xlu0 %v4722_v28, %s5708_s24  ;;  %v9801_v28 = vld [vmem:[#allocation83_spill] sm:$0xff] }
 0x8b4   : > { %v2897_v30 = vadd.f32 %v9801_v28, %v2785_v53  ;;  %v5061_v53 = vld [vmem:[#allocation2] ss:$0 sm:$0xff] }
 0x8b5   : > { %4769 = vrot.lane.b32.xlu1 %v4729_v32, %s5708_s24  ;;  %v9802_v32 = vld [vmem:[#allocation36_spill] sm:$0xff] }
 0x8b6   : > { %v2787_v48 = vadd.f32 %v9802_v32, %v2675_v51  ;;  %v3009_v35 = vadd.f32 %v9803_v12, %v2897_v30  ;;  %v9817_v51 = vld [vmem:[#allocation78_spill] sm:$0xff]  ;;  %v9819_v32 = vld [vmem:[#allocation139_spill] sm:$0xff] }
 0x8b7   : > { %4763 = vrot.lane.b32.xlu0 %v4726_v22, %s5708_s24  ;;  %v4620_v22 = vmul.f32 %v4607_v1, %v7678_v44  ;;  %v9812_v1 = vld [vmem:[#allocation40_spill] sm:$0xff]  ;;  %v9818_v30 = vld [vmem:[#allocation150_spill] sm:$0xff] }
 0x8b8   : > { %v2899_v8 = vadd.f32 %v9805_v39, %v2787_v48  ;;  %v3121_v55 = vadd.f32 %v9806_v57, %v3009_v35  ;;  %v4736_v48 = vmul.f32 %v4719_v47, %v9819_v32  ;;  %v9820_v12 = vld [vmem:[#allocation134_spill] sm:$0xff]  ;;  %v9823_v57 = vld [vmem:[#allocation37_spill] sm:$0xff] }
 0x8b9   : > { %4559 = vrot.lane.b32.xlu1 %v4512_v7, %s5708_s24  ;;  %v9822_v39 = vld [vmem:[#allocation206_spill] sm:$0xff] }
 0x8ba   : > { %v3011_v13 = vadd.f32 %v9807_v16, %v2899_v8  ;;  %v3233_v7 = vadd.f32 %v9809_v59, %v3121_v55  ;;  %v9825_v16 = vld [vmem:[#allocation208_spill] sm:$0xff] }
 0x8bb   : > { %4661 = vrot.lane.b32.xlu0 %v4619_v25, %s5708_s24  ;;  %v4734_v25 = vmul.f32 %v4711_v31, %v9690_v19  ;;  %v4732_v19 = vmul.f32 %v4719_v47, %v9599_v24  ;;  %v4724_v31 = vmul.f32 %v4719_v47, %v7635_v50  ;;  %v9011_v47 = vpop.permute.xlu1 %4445 }
 0x8bc   : > { %v3123_v17 = vadd.f32 %v9808_v21, %v3011_v13 }
 0x8bd   : > { %4655 = vrot.lane.b32.xlu1 %v4616_v63, %s5708_s24  ;;  %v3345_v63 = vadd.f32 %v9811_v23, %v3233_v7  ;;  %v9828_v7 = vld [vmem:[#allocation251_spill] sm:$0xff] }
 0x8be   : > { %v3235_v45 = vadd.f32 %v9810_v61, %v3123_v17  ;;  %v9827_v17 = vld [vmem:[#allocation223_spill] sm:$0xff] }
 0x8bf   : > { %4771 = vrot.lane.b32.xlu0 %v4730_v33, %s5708_s24  ;;  %v3457_v33 = vadd.f32 %v9813_v29, %v3345_v63  ;;  %v9015_v63 = vpop.permute.xlu0 %4447  ;;  %v9832_v29 = vld [vmem:[#allocation20_spill] sm:$0xff] }
 0x8c0   : > { %v3347_v49 = vadd.f32 %v9812_v1, %v3235_v45  ;;  %v9830_v45 = vld [vmem:[#allocation30_spill] sm:$0xff] }
 0x8c1   : > { %4757 = vrot.lane.b32.xlu1 %v4723_v6, %s5708_s24  ;;  %v3569_v20 = vadd.f32 %v9815_v46, %v3457_v33 }
 0x8c2   : > { %v3459_v6 = vadd.f32 %v9814_v26, %v3347_v49 }
 0x8c3   : > { %4647 = vrot.lane.b32.xlu0 %v4612_v15, %s5708_s24  ;;  %v9816_v15 = vld [vmem:[#allocation127_spill] sm:$0xff] }
 0x8c4   : > { %v4735_v9 = vmul.f32 %v8852_v11, %v9816_v15  ;;  %v3571_v28 = vadd.f32 %v9817_v51, %v3459_v6  ;;  %v9824_v11 = vld [vmem:[#allocation221_spill] sm:$0xff] }
 0x8c5   : > { %4777 = vrot.lane.b32.xlu1 %v4733_v43, %s5708_s24  ;;  %v3681_v43 = vadd.f32 %v9818_v30, %v3569_v20 }
 0x8c6   : > { %v3683_v35 = vadd.f32 %v9820_v12, %v3571_v28 }
 0x8c7   : > { %4669 = vrot.lane.b32.xlu0 %v4623_v3, %s5708_s24  ;;  %v3793_v3 = vadd.f32 %v9821_v36, %v3681_v43 }
 0x8c8   : > { %v3795_v55 = vadd.f32 %v9823_v57, %v3683_v35 }
 0x8c9   : > { %4663 = vrot.lane.b32.xlu1 %v4620_v22, %s5708_s24  ;;  %v3905_v8 = vadd.f32 %v9822_v39, %v3793_v3 }
 0x8ca   : > { %v3907_v13 = vadd.f32 %v9825_v16, %v3795_v55  ;;  %v9833_v55 = vld [vmem:[#allocation24_spill] sm:$0xff] }
 0x8cb   : > { %4765 = vrot.lane.b32.xlu0 %v4727_v38, %s5708_s24  ;;  %v4017_v22 = vadd.f32 %v9824_v11, %v3905_v8  ;;  %v9826_v38 = vld [vmem:[#allocation236_spill] sm:$0xff] }
 0x8cc   : > { %v4019_v59 = vadd.f32 %v9827_v17, %v3907_v13  ;;  %v9835_v13 = vld [vmem:[#allocation14_spill] sm:$0xff] }
 0x8cd   : > { %4671 = vrot.lane.b32.xlu1 %v4624_v41, %s5708_s24  ;;  %v4129_v21 = vadd.f32 %v9826_v38, %v4017_v22 }
 0x8cf   : > { %4779 = vrot.lane.b32.xlu0 %v4734_v25, %s5708_s24  ;;  %v4241_v41 = vadd.f32 %v9828_v7, %v4129_v21  ;;  %v9829_v25 = vld [vmem:[#allocation238_spill] sm:$0xff]  ;;  %v9836_v21 = vld [vmem:[#allocation23_spill] sm:$0xff] }
 0x8d0   : > { %v4131_v61 = vadd.f32 %v9829_v25, %v4019_v59  ;;  %v2512_v17 = vmul.f32 %v9836_v21, %v9599_v24 }
 0x8d1   : > { %4767 = vrot.lane.b32.xlu1 %v4728_v10, %s5708_s24  ;;  %v4353_v23 = vadd.f32 %v9830_v45, %v4241_v41  ;;  %v9831_v10 = vld [vmem:[#allocation253_spill] sm:$0xff] }
 0x8d3   : > { %4773 = vrot.lane.b32.xlu0 %v4731_v27, %s5708_s24  ;;  %v4243_v27 = vadd.f32 %v9831_v10, %v4131_v61  ;;  %v4465_v1 = vadd.f32 %v8737_v14, %v4353_v23  ;;  %v9837_v10 = vld [vmem:[#allocation98_spill] sm:$0xff] }
 0x8d5   : > { %4775 = vrot.lane.b32.xlu1 %v4732_v19, %s5708_s24  ;;  %v4355_v33 = vadd.f32 %v9832_v29, %v4243_v27 }
 0x8d7   : > { %4759 = vrot.lane.b32.xlu0 %v4724_v31, %s5708_s24  ;;  %v4467_v6 = vadd.f32 %v8755_v18, %v4355_v33  ;;  %v9839_v33 = vld [vmem:[#allocation166_spill] sm:$0xff] }
 0x8d9   : > { %4877 = vperm.xlu1 %5614, %v5061_v53  }
 0x8db   : > { %4781 = vrot.lane.b32.xlu0 %v4735_v9, %s5708_s24 }
 0x8df   : > { %4783 = vrot.lane.b32.xlu0 %v4736_v48, %s5708_s24  ;;  %s4994_s24 = sshll.u32 %s295_s23, 2 }
 0x8e0   : > { %s297_s16 = scalar_lea.vmem [#allocation3], %s4994_s24 }
 0x8e1   : > { %s4912_s17 = sshll.u32 %s297_s16, 4  ;;  %s4913_s17 = int_to_ptr.vmem [resolvable:$true] %s4912_s17 }
 0x8e2   : > { %s5626_s6 = scalar_lea.vmem %s4913_s17, 64  ;;  %p5633_p1 = scmp.lt.s32.totalorder %s4913_s17, %s5631_s21 }
 0x8e3   : > { %p5627_p12 = scmp.ne.s32.totalorder %s4913_s17, %s5626_s6  ;;  %p5634_p2 = scmp.lt.s32.totalorder %s5632_s22, %s5626_s6 }
 0x8e5   : > { %p5628_p13 = pnand %p5627_p12, %p5822_p4  ;;  %p5635_p3 = por %p5634_p2, %p5633_p1 }
 0x8e7   : > { %p5629_p0 = pneg %p5628_p13 }
 0x8e9   : > { %p5636_p5 = pnand %p5635_p3, %p5629_p0 }
 0x8eb   : > { %v4530_v49 = vpop.permute.xlu1 %4529  ;;  %v4532_v31 = vpop.permute.xlu0 %4531 }
 0x8ec   : > { %v4577_v19 = vadd.f32 %v4530_v49, %v4465_v1  ;;  %v4578_v26 = vadd.f32 %v4532_v31, %v8745_v40 }
 0x8ef   : > { %v4534_v46 = vpop.permute.xlu1 %4533 }
 0x8f0   : > { %v9022_v20 = vadd.f32 %v4534_v46, %v4467_v6  ;;  %v9840_v46 = vld [vmem:[#allocation195_spill] sm:$0xff] }
 0x8f3   : > { %v4538_v53 = vpop.permute.xlu1 %4537 }
 0x8f4   : > { %v4581_v15 = vadd.f32 %v4538_v53, %v8777_v34 }
 0x8f7   : > { %v4546_v9 = vpop.permute.xlu1 %4545 }
 0x8f8   : > { %v9026_v51 = vadd.f32 %v4546_v9, %v8810_v2 }
 0x8f9   : > { %v4536_v14 = vpop.permute.xlu0 %4535 }
 0x8fa   : > { %v9029_v28 = vadd.f32 %v4536_v14, %v8775_v52  ;;  %v9841_v14 = vld [vmem:[#allocation198_spill] sm:$0xff] }
 0x8fb   : > { %v4542_v30 = vpop.permute.xlu1 %4541 }
 0x8fc   : > { %v9032_v43 = vadd.f32 %v4542_v30, %v8794_v56 }
 0x8fd   : > { %v4540_v40 = vpop.permute.xlu0 %4539 }
 0x8fe   : > { %v4582_v18 = vadd.f32 %v4540_v40, %v8792_v37  ;;  %v2416_v37 = vmul.f32 %v9833_v55, %v7635_v50  ;;  %v2560_v50 = vmul.f32 %v9589_v5, %v9819_v32 }
 0x8ff   : > { %v4556_v48 = vpop.permute.xlu1 %4555 }
 0x900   : > { %v9036_v12 = vadd.f32 %v4556_v48, %v8862_v54  ;;  %v9834_v54 = vld [vmem:[#allocation19_spill] sm:$0xff] }
 0x901   : > { %v4548_v34 = vpop.permute.xlu0 %4547  ;;  %v2368_v22 = vmul.f32 %v9834_v54, %v7334_v4 }
 0x902   : > { %v4586_v35 = vadd.f32 %v4548_v34, %v8820_v42 }
 0x903   : > { %v4644_v2 = vpop.permute.xlu1 %4643  ;;  %v2432_v42 = vadd.f32 %v2416_v37, %v2368_v22 }
 0x904   : > { %v4690_v31 = vadd.f32 %v4644_v2, %v4578_v26  ;;  %v9842_v26 = vld [vmem:[#allocation109_spill] sm:$0xff] }
 0x905   : > { %v4554_v36 = vpop.permute.xlu0 %4553 }
 0x906   : > { %v9040_v3 = vadd.f32 %v4554_v36, %v8829_v58  ;;  %v2464_v58 = vmul.f32 %v9835_v13, %v7678_v44  ;;  %v9838_v44 = vld [vmem:[#allocation159_spill] sm:$0xff] }
 0x907   : > { %v4652_v52 = vpop.permute.xlu1 %4651 }
 0x908   : > { %v2480_v7 = vadd.f32 %v2464_v58, %v2432_v42  ;;  %v4694_v48 = vadd.f32 %v4652_v52, %v4582_v18  ;;  %v9843_v52 = vld [vmem:[#allocation162_spill] sm:$0xff] }
 0x909   : > { %v4642_v39 = vpop.permute.xlu0 %4641 }
 0x90a   : > { %v4689_v8 = vadd.f32 %v4642_v39, %v4577_v19  ;;  %v2528_v25 = vadd.f32 %v2512_v17, %v2480_v7 }
 0x90b   : > { %v4658_v56 = vpop.permute.xlu1 %4657 }
 0x90c   : > { %v2576_v45 = vadd.f32 %v2560_v50, %v2528_v25  ;;  %v4697_v18 = vadd.f32 %v4658_v56, %v9026_v51  ;;  %v9845_v56 = vld [vmem:[#allocation196_spill] sm:$0xff] }
 0x90d   : > { %v4650_v57 = vpop.permute.xlu0 %4649 }
 0x90e   : > { %v2688_v27 = vadd.f32 %v9837_v10, %v2576_v45  ;;  %v4693_v32 = vadd.f32 %v4650_v57, %v4581_v15 }
 0x90f   : > { %v9044_v11 = vpop.permute.xlu1 %4543 }
 0x910   : > { %v2800_v49 = vadd.f32 %v9838_v44, %v2688_v27 }
 0x911   : > { %v9048_v16 = vpop.permute.xlu0 %4549 }
 0x912   : > { %v2912_v24 = vadd.f32 %v9839_v33, %v2800_v49 }
 0x913   : > { %v4646_v38 = vpop.permute.xlu1 %4645 }
 0x914   : > { %v3024_v53 = vadd.f32 %v9840_v46, %v2912_v24  ;;  %v4691_v25 = vadd.f32 %v4646_v38, %v9022_v20 }
 0x915   : > { %v4660_v59 = vpop.permute.xlu0 %4659 }
 0x916   : > { %v3136_v30 = vadd.f32 %v9841_v14, %v3024_v53  ;;  %v4698_v21 = vadd.f32 %v4660_v59, %v4586_v35 }
 0x917   : > { %v4666_v41 = vpop.permute.xlu1 %4665 }
 0x918   : > { %v3248_v2 = vadd.f32 %v9842_v26, %v3136_v30 }
 0x919   : > { %v9056_v61 = vpop.permute.xlu0 %4557 }
 0x91a   : > { %v3360_v13 = vadd.f32 %v9843_v52, %v3248_v2 }
 0x91b   : > { %v4754_v4 = vpop.permute.xlu1 %4753 }
 0x91c   : > { %v4801_v6 = vadd.f32 %v4754_v4, %v4689_v8  ;;  %v9844_v4 = vld [vmem:[#allocation169_spill] sm:$0xff] }
 0x91d   : > { %v4654_v23 = vpop.permute.xlu0 %4653  ;;  %v3472_v45 = vadd.f32 %v9844_v4, %v3360_v13 }
 0x91e   : > { %v4818_v34 = vsel %vm4817_vm2, %v4801_v6, 0.0  ;;  %v9846_v6 = vld [vmem:[#allocation199_spill] sm:$0xff]  ;;  %v4695_v46 = vadd.f32 %v4654_v23, %v9032_v43  ;;  %v4587_v43 = vadd.f32 %v9048_v16, %v8822_v62 }
 0x91f   : > { %v4762_v1 = vpop.permute.xlu1 %4761  ;;  %v3584_v24 = vadd.f32 %v9845_v56, %v3472_v45  ;;  %v9849_v23 = vld [vmem:[#allocation235_spill] sm:$0xff] }
 0x920   : > { %v4805_v36 = vadd.f32 %v4762_v1, %v4693_v32 }
 0x921   : > { %v4668_v29 = vpop.permute.xlu0 %4667  ;;  %v3696_v20 = vadd.f32 %v9846_v6, %v3584_v24 }
 0x922   : > { %v4831_v22 = vsel %vm4817_vm2, %v4805_v36, 0.0 }
 0x923   : > { %v4552_v19 = vpop.permute.xlu1 %4551 }
 0x924   : > { %v4588_v2 = vadd.f32 %v4552_v19, %v8827_v60  ;;  %v9852_v60 = vld [vmem:[#allocation275_spill] sm:$0xff] }
 0x925   : > { %v4756_v5 = vpop.permute.xlu0 %4755  ;;  %v4479_v19 = vadd.f32 %v9011_v47, %v9852_v60 }
 0x926   : > { %v4802_v9 = vadd.f32 %v4756_v5, %v4690_v31  ;;  %v4701_v5 = vadd.f32 %v4666_v41, %v9040_v3 }
 0x927   : > { %v4770_v40 = vpop.permute.xlu1 %4769 }
 0x928   : > { %v4819_v39 = vsel %vm4817_vm2, %v4802_v9, 0.0  ;;  %v4809_v17 = vadd.f32 %v4770_v40, %v4697_v18  ;;  %v9847_v9 = vld [vmem:[#allocation106_spill] sm:$0xff]  ;;  %v4584_v40 = vadd.f32 %v9044_v11, %v8808_v0 }
 0x929   : > { %v4820_v55 = vadd.f32 %v4819_v39, %v4818_v34  ;;  %v4764_v37 = vpop.permute.xlu0 %4763  ;;  %v3808_v14 = vadd.f32 %v9847_v9, %v3696_v20  ;;  %v9848_v39 = vld [vmem:[#allocation220_spill] sm:$0xff] }
 0x92a   : > { %v4806_v54 = vadd.f32 %v4764_v37, %v4694_v48  ;;  %v4844_v27 = vsel %vm4817_vm2, %v4809_v17, 0.0  ;;  %v4702_v48 = vadd.f32 %v4668_v29, %v9036_v12 }
 0x92b   : > { %v9066_v8 = vpop.permute.xlu1 %4559 }
 0x92c   : > { %v4832_v15 = vsel %vm4817_vm2, %v4806_v54, 0.0 }
 0x92d   : > { %v4833_v57 = vadd.f32 %v4832_v15, %v4831_v22  ;;  %v4662_v42 = vpop.permute.xlu0 %4661  ;;  %v9850_v15 = vld [vmem:[#allocation250_spill] sm:$0xff] }
 0x92e   : > { %v4699_v0 = vadd.f32 %v4662_v42, %v4587_v43 }
 0x92f   : > { %v4656_v58 = vpop.permute.xlu1 %4655 }
 0x930   : > { %v4696_v3 = vadd.f32 %v4656_v58, %v4584_v40  ;;  %v9851_v58 = vld [vmem:[#allocation265_spill] sm:$0xff] }
 0x931   : > { %v4772_v7 = vpop.permute.xlu0 %4771 }
 0x932   : > { %v4810_v50 = vadd.f32 %v4772_v7, %v4698_v21 }
 0x933   : > { %v4758_v10 = vpop.permute.xlu1 %4757 }
 0x934   : > { %v4845_v1 = vsel %vm4817_vm2, %v4810_v50, 0.0  ;;  %v4803_v44 = vadd.f32 %v4758_v10, %v4691_v25 }
 0x935   : > { %v4846_v49 = vadd.f32 %v4845_v1, %v4844_v27  ;;  %v4648_v33 = vpop.permute.xlu0 %4647  ;;  %v9853_v27 = vld [vmem:[#allocation277_spill] sm:$0xff] }
 0x936   : > { %v4821_v51 = vsel %vm4817_vm2, %v4803_v44, 0.0  ;;  %v4692_v42 = vadd.f32 %v4648_v33, %v9029_v28  ;;  %v4591_v44 = vadd.f32 %v9056_v61, %v4479_v19 }
 0x937   : > { %v4822_v35 = vadd.f32 %v4821_v51, %v4820_v55  ;;  %v4778_v59 = vpop.permute.xlu1 %4777  ;;  %v3920_v55 = vadd.f32 %v9848_v39, %v3808_v14 }
 0x938   : > { %v4813_v34 = vadd.f32 %v4778_v59, %v4701_v5 }
 0x939   : > { %v4670_v31 = vpop.permute.xlu0 %4669  ;;  %v4032_v26 = vadd.f32 %v9849_v23, %v3920_v55 }
 0x93a   : > { %v4857_v12 = vsel %vm4817_vm2, %v4813_v34, 0.0  ;;  %v4703_v47 = vadd.f32 %v4670_v31, %v4591_v44 }
 0x93b   : > { %v4664_v38 = vpop.permute.xlu1 %4663  ;;  %v4144_v18 = vadd.f32 %v9850_v15, %v4032_v26 }
 0x93c   : > { %v4700_v13 = vadd.f32 %v4664_v38, %v4588_v2 }
 0x93d   : > { %v4766_v53 = vpop.permute.xlu0 %4765  ;;  %v4256_v21 = vadd.f32 %v9851_v58, %v4144_v18 }
 0x93e   : > { %v4807_v32 = vadd.f32 %v4766_v53, %v4695_v46 }
 0x93f   : > { %v4672_v30 = vpop.permute.xlu1 %4671  ;;  %v4368_v1 = vadd.f32 %v9853_v27, %v4256_v21 }
 0x940   : > { %v4834_v36 = vsel %vm4817_vm2, %v4807_v32, 0.0 }
 0x941   : > { %v4835_v37 = vadd.f32 %v4834_v36, %v4833_v57  ;;  %v4780_v54 = vpop.permute.xlu0 %4779  ;;  %v4480_v6 = vadd.f32 %v9015_v63, %v4368_v1 }
 0x942   : > { %v4814_v41 = vadd.f32 %v4780_v54, %v4702_v48 }
 0x943   : > { %v4768_v22 = vpop.permute.xlu1 %4767 }
 0x944   : > { %v4858_v11 = vsel %vm4817_vm2, %v4814_v41, 0.0  ;;  %v4808_v29 = vadd.f32 %v4768_v22, %v4696_v3 }
 0x945   : > { %v4859_v57 = vadd.f32 %v4858_v11, %v4857_v12  ;;  %v4774_v52 = vpop.permute.xlu0 %4773 }
 0x946   : > { %v4836_v62 = vsel %vm4817_vm2, %v4808_v29, 0.0  ;;  %v4811_v16 = vadd.f32 %v4774_v52, %v4699_v0 }
 0x947   : > { %v4837_v17 = vadd.f32 %v4836_v62, %v4835_v37  ;;  %v4776_v7 = vpop.permute.xlu1 %4775 }
 0x948   : > { %v4847_v25 = vsel %vm4817_vm2, %v4811_v16, 0.0  ;;  %v4812_v50 = vadd.f32 %v4776_v7, %v4700_v13 }
 0x949   : > { %v4838_v4 = vrot.slane %v4837_v17, 4  ;;  %v4848_v45 = vadd.f32 %v4847_v25, %v4846_v49  ;;  %v4760_v10 = vpop.permute.xlu0 %4759  ;;  %v4592_v49 = vadd.f32 %v9066_v8, %v4480_v6 }
 0x94a   : > { %v4849_v51 = vsel %vm4817_vm2, %v4812_v50, 0.0  ;;  %v4804_v56 = vadd.f32 %v4760_v10, %v4692_v42 }
 0x94b   : > { %v4839_v24 = vadd.f32 %v4838_v4, %v4837_v17  ;;  %v4850_v59 = vadd.f32 %v4849_v51, %v4848_v45  ;;  %v4704_v9 = vadd.f32 %v4672_v30, %v4592_v49 }
 0x94c   : > { %v4823_v28 = vsel %vm4817_vm2, %v4804_v56, 0.0 }
 0x94d   : > { %v4840_v33 = vrot.slane %v4839_v24, 2  ;;  %v4851_v20 = vrot.slane %v4850_v59, 4  ;;  %v4824_v38 = vadd.f32 %v4823_v28, %v4822_v35  ;;  %v4782_v46 = vpop.permute.xlu0 %4781 }
 0x94e   : > { %v4815_v53 = vadd.f32 %v4782_v46, %v4703_v47 }
 0x94f   : > { %v4852_v5 = vadd.f32 %v4851_v20, %v4850_v59  ;;  %v4825_v32 = vrot.slane %v4824_v38, 4  ;;  %v4841_v61 = vadd.f32 %v4840_v33, %v4839_v24 }
 0x950   : > { %v4860_v14 = vsel %vm4817_vm2, %v4815_v53, 0.0 }
 0x951   : > { %v4853_v40 = vrot.slane %v4852_v5, 2  ;;  %v4826_v48 = vadd.f32 %v4825_v32, %v4824_v38  ;;  %v4861_v63 = vadd.f32 %v4860_v14, %v4859_v57  ;;  %v4784_v31 = vpop.permute.xlu0 %4783  ;;  %v4842_v39 = vrot.slane %v4841_v61, 1 }
 0x952   : > { %v4816_v34 = vadd.f32 %v4784_v31, %v4704_v9 }
 0x953   : > { %v4827_v36 = vrot.slane %v4826_v48, 2  ;;  %v4854_v55 = vadd.f32 %v4853_v40, %v4852_v5  ;;  %v4843_v41 = vadd.f32 %v4842_v39, %v4841_v61 }
 0x954   : > { %v4862_v35 = vsel %vm4817_vm2, %v4816_v34, 0.0  ;;  %v4878_v30 = vpop.permute.xlu1 %4877 }
 0x955   : > { %v4863_v37 = vadd.f32 %v4862_v35, %v4861_v63  ;;  %v4828_v8 = vadd.f32 %v4827_v36, %v4826_v48  ;;  %v4855_v54 = vrot.slane %v4854_v55, 1  ;;  %v4881_v12 = vadd.f32 %v4878_v30, %v4843_v41 }
 0x957   : > { %v4864_v43 = vrot.slane %v4863_v37, 4  ;;  %v4829_v3 = vrot.slane %v4828_v8, 1  ;;  %v4856_v23 = vadd.f32 %v4855_v54, %v4854_v55 }
 0x959   : > { %v4865_v26 = vadd.f32 %v4864_v43, %v4863_v37  ;;  %v4830_v2 = vadd.f32 %v4829_v3, %v4828_v8  ;;  %v4882_v11 = vadd.f32 %v4878_v30, %v4856_v23 }
 0x95b   : > { %v4866_v22 = vrot.slane %v4865_v26, 2  ;;  %v4880_v0 = vadd.f32 %v4878_v30, %v4830_v2 }
 0x95d   : > { %v4867_v29 = vadd.f32 %v4866_v22, %v4865_v26  ;;  %v4889_v15 = vsel %vm4888_vm4, %v4881_v12, %v4880_v0 }
 0x95e   : > { %v4891_v18 = vsel %vm4890_vm6, %v4882_v11, %v4889_v15 }
 0x95f   : > { %v4868_v57 = vrot.slane %v4867_v29, 1 }
 0x961   : > { %v4869_v52 = vadd.f32 %v4868_v57, %v4867_v29 }
 0x963   : > { %v4883_v13 = vadd.f32 %v4878_v30, %v4869_v52 }
 0x965   : > { %v4893_v62 = vsel %vm4892_vm12, %v4883_v13, %v4891_v18 }
 0x966   : > { %4896 = vst.msk [vmem:[%s297_s16] sm:$0xf] %vm4895_vm14, %v4893_v62 }
 0x967   : > { %5639 = shalt.err (!%p5636_p5)
}
 0x968   : > { %s5640_s9 = scalar_lea.hbm %s9113_s20, 64  ;;  %s5644_s24 = scalar_lea.hbm %s9160_s7, 128 }
 0x969   : > { %p5641_p6 = scmp.ne.s32.totalorder %s9113_s20, %s5640_s9  ;;  %p5645_p10 = scmp.lt.s32.totalorder %s9113_s20, %s9160_s7 }
 0x96a   : > { %p5646_p11 = scmp.lt.s32.totalorder %s5644_s24, %s5640_s9 }
 0x96b   : > { %p5642_p7 = pnand %p5641_p6, %p5822_p4 }
 0x96c   : > { %p5647_p12 = por %p5646_p11, %p5645_p10 }
 0x96d   : > { %p5643_p9 = pneg %p5642_p7 }
 0x96f   : > { %p5648_p13 = pnand %p5647_p12, %p5643_p9 }
 0x971   : > { %5651 = shalt.err (!%p5648_p13)
}
 0x972   : > { %5451 = dma.vmem_to_hbm [thread:$0]  (%p5822_p4), %s4913_s17, 64, %s9113_s20, %s4898_s25  }
 0x973 PF: > { %p5457_p0 = scmp.ge.s32.totalorder %s5702_s8, 2  ;;  %s4924_s18 = sand.u32 1, %s5682_s26  }
 0x974   : > { %s4925_s19 = scalar_lea.sflag [#allocation4], %s4924_s18 }
 0x975   : > { %p5454_p1 = pnand %p5457_p0, %p5829_p8 }
 0x977   : > { %p5455_p2 = pneg %p5454_p1 }
 0x979   : > { %5677 = dma.done.wait (%p5455_p2), %s4925_s19, 64  }
 0x97a   : > { %5679 = vsyncadd (%p5455_p2), %s4925_s19, 4294967232  ;;  %s22_s8 = sadd.s32 1, %s5702_s8   ;;  %s9854_s26 = smov %s5686_s27 }
 0x97b   : > { %p19_p3 = scmp.ge.s32.totalorder %s22_s8, 4   ;;  %s9855_s27 = smov %s5690_s28 }
 0x97c   : > { %s9856_s28 = smov %s5835_s15  ;;  %s9857_s29 = smov %s5698_s30 }
 0x97d   : > { %s9858_s30 = smov %s9860_s10  ;;  %21 = sbr.rel (!%p19_p3) target bundleno = 7 (0x7), region = 83 }
 0x982   :  { %4930 = vsyncpa [#allocation4], 1 }
 0x983   :  { %4932 = vsyncpa [#allocation4 + $0x1], 1 }

</bundles_post_ra>
